<compile_context>
chip_gen: v6e
topology: v6e:2x2x1
jax: 0.10.0
libtpu: 0.0.40
codegen_flags: <defaults>
</compile_context>

<pallas_src>
import functools

import jax
import jax.numpy as jnp
from jax.experimental import pallas as pl
from jax.experimental.pallas import tpu as pltpu

# ---------------------------------------------------------------------------
# Small synthetic config (real module: 224x224 / patch-16 / 768-dim / 12-head /
# 12-block CLIP ViT with last_layer=11, masking_block=9).  Semantics (token
# masking, CLS readout, proj, head MLP) are preserved at reduced size.
# ---------------------------------------------------------------------------
BATCH      = 2
IN_CH      = 9                 # 3 stacked RGB frames (images.reshape(B*3, 3, H, W))
IMG        = 32
PATCH      = 8
GRID_HW    = IMG // PATCH      # "size" in VLLIP_encoder
NUM_TOK    = GRID_HW * GRID_HW # L
SEQ        = NUM_TOK + 1       # T = L + 1 (CLS)
T_PAD      = ((SEQ + 7) // 8) * 8   # sequence padded to a multiple of 8 sublanes
WIDTH      = 32                # D
NUM_HEADS  = 4
HEAD_DIM   = WIDTH // NUM_HEADS
NUM_BLOCKS = 3
LAST_LAYER = NUM_BLOCKS - 1    # == self.last_layer
MASK_BLOCK = 1                 # == masking_block argument
PROJ_DIM   = 16
MLP_HIDDEN = 32
MLP_OUT    = 16
LN_EPS     = 1e-5

_NT_DIMS = (((1,), (1,)), ((), ()))   # q @ k.T without materializing a transpose


# ---------------------------------------------------------------------------
# In-kernel helpers
# ---------------------------------------------------------------------------
def _ln(x, g, b):
    """LayerNorm over the last dim (f32 statistics); g/b are (1, D) f32."""
    x = x.astype(jnp.float32)
    mu = jnp.mean(x, axis=-1, keepdims=True)
    var = jnp.mean(jnp.square(x - mu), axis=-1, keepdims=True)
    return (x - mu) * jax.lax.rsqrt(var + LN_EPS) * g + b


def _full_spec(arr):
    """Whole-array block re-used at every grid step (weights / constants)."""
    nd = arr.ndim
    return pl.BlockSpec(arr.shape, lambda b, nd=nd: (0,) * nd)


# ---------------------------------------------------------------------------
# The fused kernel: one batch element per grid step, whole forward inside.
# ---------------------------------------------------------------------------
def _fused_kernel(patch_ref, mask_ref,
                  conv_w_ref, cls_pos_ref, pos_sp_ref, lnpre_g_ref, lnpre_b_ref,
                  ln1_g_ref, ln1_b_ref, qkv_w_ref, qkv_b_ref, out_w_ref, out_b_ref,
                  ln2_g_ref, ln2_b_ref, fc_w_ref, fc_b_ref, pj_w_ref, pj_b_ref,
                  lnpost_g_ref, lnpost_b_ref, clip_proj_ref,
                  w1_ref, b1_ref, w2_ref, b2_ref,
                  o_ref, *, masking_block):
    D, H, Dh = WIDTH, NUM_HEADS, HEAD_DIM
    scale = 1.0 / (float(Dh) ** 0.5)

    # --- patch embed (conv1-as-matmul) + positional add + ln_pre -----------
    px = jnp.dot(patch_ref[0].astype(jnp.bfloat16), conv_w_ref[...],
                 preferred_element_type=jnp.float32)                       # (L, D)
    spatial = _ln(px + pos_sp_ref[...], lnpre_g_ref[...], lnpre_b_ref[...])
    cls_row = _ln(cls_pos_ref[...], lnpre_g_ref[...], lnpre_b_ref[...])    # (1, D)
    pad_rows = jnp.zeros((T_PAD - SEQ, D), jnp.float32)
    x = jnp.concatenate([cls_row, spatial, pad_rows], axis=0)              # (T_PAD, D)

    # --- validity masks for the padded rows (full-sublane tiles everywhere) -
    row_ids = jax.lax.broadcasted_iota(jnp.int32, (T_PAD, 1), 0)
    valid = (row_ids < SEQ).astype(jnp.float32)                            # (T_PAD, 1)
    col_ids = jax.lax.broadcasted_iota(jnp.int32, (1, T_PAD), 1)
    key_bias = jnp.where(col_ids < SEQ, 0.0, -1e30)                        # (1, T_PAD)
    pred_mask = mask_ref[0]                                                # (T_PAD, D) lane-dense

    # --- statically unrolled transformer blocks -----------------------------
    for blk in range(NUM_BLOCKS):
        # token masking (re-applied every block >= masking_block, CLS row == 1,
        # pad rows == 0; unmasked blocks still zero the pad rows).
        m = pred_mask if blk >= masking_block else valid
        x = x * m

        # attention branch: LN1 -> QKV -> per-head softmax attn -> out-proj
        y = _ln(x, ln1_g_ref[blk], ln1_b_ref[blk]).astype(jnp.bfloat16)
        qkv = jnp.dot(y, qkv_w_ref[blk],
                      preferred_element_type=jnp.float32) + qkv_b_ref[blk]  # (T_PAD, 3D)
        q = (qkv[:, :D] * scale).astype(jnp.bfloat16)     # 1/sqrt(Dh) folded into q
        k = qkv[:, D:2 * D].astype(jnp.bfloat16)
        v = qkv[:, 2 * D:].astype(jnp.bfloat16)

        o_heads = []
        for h in range(H):                                 # static unroll
            lo, hi = h * Dh, (h + 1) * Dh
            s = jax.lax.dot_general(q[:, lo:hi], k[:, lo:hi], _NT_DIMS,
                                    preferred_element_type=jnp.float32)    # (T_PAD, T_PAD)
            s = s + key_bias                               # mask out pad keys
            s = s - jnp.max(s, axis=-1, keepdims=True)
            p = jnp.exp(s)
            # approx reciprocal (EUP) ~1e-3 rel. err; use approx=False for bit parity
            p = p * pl.reciprocal(jnp.sum(p, axis=-1, keepdims=True), approx=True)
            o_heads.append(jnp.dot(p.astype(jnp.bfloat16), v[:, lo:hi],
                                   preferred_element_type=jnp.float32))
        # heads dropped into their lane slots -> ONE out-projection matmul
        o_cat = jnp.concatenate(o_heads, axis=-1).astype(jnp.bfloat16)     # (T_PAD, D)
        attn = jnp.dot(o_cat, out_w_ref[blk],
                       preferred_element_type=jnp.float32) + out_b_ref[blk]
        x = x + attn                                                        # residual 1

        # MLP branch: LN2 -> fc -> QuickGELU -> proj
        y2 = _ln(x, ln2_g_ref[blk], ln2_b_ref[blk]).astype(jnp.bfloat16)
        h1 = jnp.dot(y2, fc_w_ref[blk],
                     preferred_element_type=jnp.float32) + fc_b_ref[blk]
        h1 = h1 * jax.nn.sigmoid(1.702 * h1)                               # CLIP QuickGELU
        h2 = jnp.dot(h1.astype(jnp.bfloat16), pj_w_ref[blk],
                     preferred_element_type=jnp.float32) + pj_b_ref[blk]
        x = x + h2                                                          # residual 2

    # --- fused CLS head: ln_post -> CLIP proj -> Linear -> ReLU -> Linear ---
    cls_tok = x[0:1, :]                                                     # (1, D)
    yh = _ln(cls_tok, lnpost_g_ref[...], lnpost_b_ref[...]).astype(jnp.bfloat16)
    e = jnp.dot(yh, clip_proj_ref[...], preferred_element_type=jnp.float32)
    hh = jnp.dot(e.astype(jnp.bfloat16), w1_ref[...],
                 preferred_element_type=jnp.float32) + b1_ref[...]
    hh = jnp.maximum(hh, 0.0)
    out = jnp.dot(hh.astype(jnp.bfloat16), w2_ref[...],
                  preferred_element_type=jnp.float32) + b2_ref[...]
    o_ref[0] = out.astype(o_ref.dtype)


# ---------------------------------------------------------------------------
# VLLIP_encoder (ViT + token-masking + CLS-proj + head MLP) -> one pallas_call.
# ---------------------------------------------------------------------------
def vllip_encoder(params, images, pred_masks, masking_block=MASK_BLOCK):
    # CLS readout only happens when the last layer is inside the masked region
    # (as in the reference, where it lives in the `block_idx >= masking_block` branch).
    assert masking_block <= LAST_LAYER, "masking_block must be <= last_layer"

    B, C, Himg, Wimg = images.shape
    P, D = PATCH, WIDTH
    Hp, Wp = Himg // P, Wimg // P
    L = Hp * Wp
    size = Hp

    # conv1 (stride=patch, bias=False) as patch extraction + fused in-kernel matmul.
    # TODO(synk): at real CLIP scale fold this NCHW -> patch-row relayout into the
    # kernel's DMA instead of an XLA reshape/transpose.
    patches = (images.reshape(B, C, Hp, P, Wp, P)
                     .transpose(0, 2, 4, 1, 3, 5)
                     .reshape(B, L, C * P * P))

    # CLS positional add is input-independent: one trivial XLA add.
    cls_pos = params["class_embedding"] + params["pos_embedding"][0:1]
    pos_spatial = params["pos_embedding"][1:]

    # pred_masks (B,1,H,W) -> per-token scalar; CLS row = 1, pad rows = 0, then
    # pre-broadcast across D so the in-kernel mask load is lane-dense.
    # TODO(synk): torchvision TF.resize uses antialiased bilinear; plain bilinear here.
    mask = jax.image.resize(pred_masks.astype(jnp.float32), (B, 1, size, size),
                            method="bilinear")
    mask_tok = jnp.concatenate([jnp.ones((B, 1), jnp.float32), mask.reshape(B, L)],
                               axis=1)                                      # (B, SEQ)
    mask_tok = jnp.pad(mask_tok, ((0, 0), (0, T_PAD - SEQ)))                # (B, T_PAD)
    mask_bcast = jnp.broadcast_to(mask_tok[:, :, None], (B, T_PAD, D))

    args = (patches, mask_bcast,
            params["conv1_w"], cls_pos, pos_spatial,
            params["ln_pre_g"], params["ln_pre_b"],
            params["ln1_g"], params["ln1_b"], params["qkv_w"], params["qkv_b"],
            params["out_w"], params["out_b"], params["ln2_g"], params["ln2_b"],
            params["fc_w"], params["fc_b"], params["proj_w"], params["proj_b"],
            params["ln_post_g"], params["ln_post_b"], params["proj"],
            params["mlp_w1"], params["mlp_b1"], params["mlp_w2"], params["mlp_b2"])

    in_specs = ([pl.BlockSpec((1, L, C * P * P), lambda b: (b, 0, 0)),
                 pl.BlockSpec((1, T_PAD, D), lambda b: (b, 0, 0))]
                + [_full_spec(a) for a in args[2:]])

    kernel = functools.partial(_fused_kernel, masking_block=masking_block)
    out = pl.pallas_call(
        kernel,
        out_shape=jax.ShapeDtypeStruct((B, 1, MLP_OUT), jnp.float32),
        grid=(B,),
        in_specs=in_specs,
        out_specs=pl.BlockSpec((1, 1, MLP_OUT), lambda b: (b, 0, 0)),
        compiler_params=pltpu.CompilerParams(dimension_semantics=("parallel",)),
    )(*args)
    return out.reshape(B, MLP_OUT)


# ---------------------------------------------------------------------------
# Full forward (VLLIP_SAM_test_encoder.forward).
# ---------------------------------------------------------------------------
def vllip_sam_test_encoder(params, images, frame_masks):
    # TODO(synk): GroundingDINO box prediction + SAM mask decoding need external
    # checkpoints / tokenizers and have no Pallas equivalent; per-frame binary
    # masks are taken as an input instead (matches the `masks is None` -> ones fallback).
    pred_masks = jnp.mean(frame_masks.astype(jnp.float32), axis=1, keepdims=True)
    return vllip_encoder(params, images, pred_masks)


# ---------------------------------------------------------------------------
# Deterministic parameter init (weights stored in bf16, biases/LN params in f32,
# per-block weights stacked along a leading block axis, conv1 pre-transposed).
# ---------------------------------------------------------------------------
def init_params(key):
    keys = iter(jax.random.split(key, 64))

    def nrm(shape, scale=0.02, dtype=jnp.float32):
        return (scale * jax.random.normal(next(keys), shape)).astype(dtype)

    D = WIDTH
    CPP = IN_CH * PATCH * PATCH
    params = {
        # (D, C, P, P) conv weight reshaped + transposed ONCE at init to the
        # (C*P*P, D) matmul layout, stored bf16 for the MXU.
        "conv1_w": nrm((D, CPP)).T.astype(jnp.bfloat16),
        "class_embedding": nrm((1, D)),
        "pos_embedding": nrm((SEQ, D)),
        "ln_pre_g": jnp.ones((1, D), jnp.float32),
        "ln_pre_b": jnp.zeros((1, D), jnp.float32),
        "ln_post_g": jnp.ones((1, D), jnp.float32),
        "ln_post_b": jnp.zeros((1, D), jnp.float32),
        "proj": nrm((D, PROJ_DIM), dtype=jnp.bfloat16),
        "mlp_w1": nrm((PROJ_DIM, MLP_HIDDEN), dtype=jnp.bfloat16),
        "mlp_b1": jnp.zeros((1, MLP_HIDDEN), jnp.float32),
        "mlp_w2": nrm((MLP_HIDDEN, MLP_OUT), dtype=jnp.bfloat16),
        "mlp_b2": jnp.zeros((1, MLP_OUT), jnp.float32),
    }

    def stack(shape):
        return jnp.stack([nrm(shape) for _ in range(NUM_BLOCKS)]).astype(jnp.bfloat16)

    params.update({
        "ln1_g": jnp.ones((NUM_BLOCKS, 1, D), jnp.float32),
        "ln1_b": jnp.zeros((NUM_BLOCKS, 1, D), jnp.float32),
        "qkv_w": stack((D, 3 * D)),
        "qkv_b": jnp.zeros((NUM_BLOCKS, 1, 3 * D), jnp.float32),
        "out_w": stack((D, D)),
        "out_b": jnp.zeros((NUM_BLOCKS, 1, D), jnp.float32),
        "ln2_g": jnp.ones((NUM_BLOCKS, 1, D), jnp.float32),
        "ln2_b": jnp.zeros((NUM_BLOCKS, 1, D), jnp.float32),
        "fc_w": stack((D, 4 * D)),
        "fc_b": jnp.zeros((NUM_BLOCKS, 1, 4 * D), jnp.float32),
        "proj_w": stack((4 * D, D)),
        "proj_b": jnp.zeros((NUM_BLOCKS, 1, D), jnp.float32),
    })
    return params


if __name__ == "__main__":
    key = jax.random.PRNGKey(0)
    k_img, k_mask, k_par = jax.random.split(key, 3)
    params = init_params(k_par)

    # images: (B, 9, H, W) == 3 RGB frames stacked in the channel dim (NCHW)
    images = jax.random.uniform(k_img, (BATCH, IN_CH, IMG, IMG), dtype=jnp.float32)
    # synthetic per-frame inverted SAM masks (0/1 ints), one per frame
    frame_masks = (jax.random.uniform(k_mask, (BATCH, 3, IMG, IMG)) > 0.3).astype(jnp.int32)

    fwd = jax.jit(vllip_sam_test_encoder)
    out = jax.block_until_ready(fwd(params, images, frame_masks))
    assert out.shape == (BATCH, MLP_OUT), out.shape
    assert bool(jnp.all(jnp.isfinite(out)))
    print("KERNEL_OK")
</pallas_src>

<mosaic_0001>
module attributes {stable_mosaic.version = 11 : i64} {
  func.func @_fused_kernel(%arg0: i32, %arg1: memref<1x16x576xf32, #tpu.memory_space<vmem>>, %arg2: memref<1x24x32xf32, #tpu.memory_space<vmem>>, %arg3: memref<576x32xbf16, #tpu.memory_space<vmem>>, %arg4: memref<1x32xf32, #tpu.memory_space<vmem>>, %arg5: memref<16x32xf32, #tpu.memory_space<vmem>>, %arg6: memref<1x32xf32, #tpu.memory_space<vmem>>, %arg7: memref<1x32xf32, #tpu.memory_space<vmem>>, %arg8: memref<3x1x32xf32, #tpu.memory_space<vmem>>, %arg9: memref<3x1x32xf32, #tpu.memory_space<vmem>>, %arg10: memref<3x32x96xbf16, #tpu.memory_space<vmem>>, %arg11: memref<3x1x96xf32, #tpu.memory_space<vmem>>, %arg12: memref<3x32x32xbf16, #tpu.memory_space<vmem>>, %arg13: memref<3x1x32xf32, #tpu.memory_space<vmem>>, %arg14: memref<3x1x32xf32, #tpu.memory_space<vmem>>, %arg15: memref<3x1x32xf32, #tpu.memory_space<vmem>>, %arg16: memref<3x32x128xbf16, #tpu.memory_space<vmem>>, %arg17: memref<3x1x128xf32, #tpu.memory_space<vmem>>, %arg18: memref<3x128x32xbf16, #tpu.memory_space<vmem>>, %arg19: memref<3x1x32xf32, #tpu.memory_space<vmem>>, %arg20: memref<1x32xf32, #tpu.memory_space<vmem>>, %arg21: memref<1x32xf32, #tpu.memory_space<vmem>>, %arg22: memref<32x16xbf16, #tpu.memory_space<vmem>>, %arg23: memref<16x32xbf16, #tpu.memory_space<vmem>>, %arg24: memref<1x32xf32, #tpu.memory_space<vmem>>, %arg25: memref<32x16xbf16, #tpu.memory_space<vmem>>, %arg26: memref<1x16xf32, #tpu.memory_space<vmem>>, %arg27: memref<1x1x16xf32, #tpu.memory_space<vmem>>) attributes {dimension_semantics = [#tpu.dimension_semantics<parallel>], iteration_bounds = array<i64: 2>, scalar_prefetch = 0 : i64, scratch_operands = 0 : i64, tpu.core_type = #tpu.core_type<tc>, window_params = [{transform_indices = @transform_0, window_bounds = array<i64: 1, 16, 576>}, {transform_indices = @transform_1, window_bounds = array<i64: 1, 24, 32>}, {pipeline_mode = #tpu.pipeline_mode<synchronous>, transform_indices = @transform_2, window_bounds = array<i64: 576, 32>}, {pipeline_mode = #tpu.pipeline_mode<synchronous>, transform_indices = @transform_3, window_bounds = array<i64: 1, 32>}, {pipeline_mode = #tpu.pipeline_mode<synchronous>, transform_indices = @transform_4, window_bounds = array<i64: 16, 32>}, {pipeline_mode = #tpu.pipeline_mode<synchronous>, transform_indices = @transform_5, window_bounds = array<i64: 1, 32>}, {pipeline_mode = #tpu.pipeline_mode<synchronous>, transform_indices = @transform_6, window_bounds = array<i64: 1, 32>}, {pipeline_mode = #tpu.pipeline_mode<synchronous>, transform_indices = @transform_7, window_bounds = array<i64: 3, 1, 32>}, {pipeline_mode = #tpu.pipeline_mode<synchronous>, transform_indices = @transform_8, window_bounds = array<i64: 3, 1, 32>}, {pipeline_mode = #tpu.pipeline_mode<synchronous>, transform_indices = @transform_9, window_bounds = array<i64: 3, 32, 96>}, {pipeline_mode = #tpu.pipeline_mode<synchronous>, transform_indices = @transform_10, window_bounds = array<i64: 3, 1, 96>}, {pipeline_mode = #tpu.pipeline_mode<synchronous>, transform_indices = @transform_11, window_bounds = array<i64: 3, 32, 32>}, {pipeline_mode = #tpu.pipeline_mode<synchronous>, transform_indices = @transform_12, window_bounds = array<i64: 3, 1, 32>}, {pipeline_mode = #tpu.pipeline_mode<synchronous>, transform_indices = @transform_13, window_bounds = array<i64: 3, 1, 32>}, {pipeline_mode = #tpu.pipeline_mode<synchronous>, transform_indices = @transform_14, window_bounds = array<i64: 3, 1, 32>}, {pipeline_mode = #tpu.pipeline_mode<synchronous>, transform_indices = @transform_15, window_bounds = array<i64: 3, 32, 128>}, {pipeline_mode = #tpu.pipeline_mode<synchronous>, transform_indices = @transform_16, window_bounds = array<i64: 3, 1, 128>}, {pipeline_mode = #tpu.pipeline_mode<synchronous>, transform_indices = @transform_17, window_bounds = array<i64: 3, 128, 32>}, {pipeline_mode = #tpu.pipeline_mode<synchronous>, transform_indices = @transform_18, window_bounds = array<i64: 3, 1, 32>}, {pipeline_mode = #tpu.pipeline_mode<synchronous>, transform_indices = @transform_19, window_bounds = array<i64: 1, 32>}, {pipeline_mode = #tpu.pipeline_mode<synchronous>, transform_indices = @transform_20, window_bounds = array<i64: 1, 32>}, {pipeline_mode = #tpu.pipeline_mode<synchronous>, transform_indices = @transform_21, window_bounds = array<i64: 32, 16>}, {pipeline_mode = #tpu.pipeline_mode<synchronous>, transform_indices = @transform_22, window_bounds = array<i64: 16, 32>}, {pipeline_mode = #tpu.pipeline_mode<synchronous>, transform_indices = @transform_23, window_bounds = array<i64: 1, 32>}, {pipeline_mode = #tpu.pipeline_mode<synchronous>, transform_indices = @transform_24, window_bounds = array<i64: 32, 16>}, {pipeline_mode = #tpu.pipeline_mode<synchronous>, transform_indices = @transform_25, window_bounds = array<i64: 1, 16>}, {transform_indices = @transform_26, window_bounds = array<i64: 1, 1, 16>}]} {
    %c0 = arith.constant 0 : index
    %c0_0 = arith.constant 0 : index
    %c0_1 = arith.constant 0 : index
    %0 = vector.load %arg1[%c0, %c0_0, %c0_1] : memref<1x16x576xf32, #tpu.memory_space<vmem>>, vector<1x16x576xf32>
    %1 = vector.shape_cast %0 : vector<1x16x576xf32> to vector<16x576xf32>
    %2 = arith.truncf %1 : vector<16x576xf32> to vector<16x576xbf16>
    %c0_2 = arith.constant 0 : index
    %c0_3 = arith.constant 0 : index
    %3 = vector.load %arg3[%c0_2, %c0_3] : memref<576x32xbf16, #tpu.memory_space<vmem>>, vector<576x32xbf16>
    %cst = arith.constant dense<0.000000e+00> : vector<16x32xf32>
    %4 = tpu.matmul %2, %3, %cst {dimension_numbers = #tpu.dot_dimension_numbers<[1], [0], [0], [1], [0, 0, 1, 1], [], []>} : vector<16x576xbf16>, vector<576x32xbf16>, vector<16x32xf32> -> vector<16x32xf32>
    %c0_4 = arith.constant 0 : index
    %c0_5 = arith.constant 0 : index
    %5 = vector.load %arg5[%c0_4, %c0_5] : memref<16x32xf32, #tpu.memory_space<vmem>>, vector<16x32xf32>
    %6 = arith.addf %4, %5 : vector<16x32xf32>
    %c0_6 = arith.constant 0 : index
    %c0_7 = arith.constant 0 : index
    %7 = vector.load %arg6[%c0_6, %c0_7] : memref<1x32xf32, #tpu.memory_space<vmem>>, vector<1x32xf32>
    %c0_8 = arith.constant 0 : index
    %c0_9 = arith.constant 0 : index
    %8 = vector.load %arg7[%c0_8, %c0_9] : memref<1x32xf32, #tpu.memory_space<vmem>>, vector<1x32xf32>
    %cst_10 = arith.constant dense<0.000000e+00> : vector<16xf32>
    %9 = vector.multi_reduction <add>, %6, %cst_10 [1] : vector<16x32xf32> to vector<16xf32>
    %10 = vector.shape_cast %9 : vector<16xf32> to vector<16x1xf32>
    %cst_11 = arith.constant 3.200000e+01 : f32
    %11 = vector.broadcast %cst_11 : f32 to vector<16x1xf32>
    %12 = arith.divf %10, %11 : vector<16x1xf32>
    %13 = vector.broadcast %12 : vector<16x1xf32> to vector<16x32xf32>
    %14 = arith.subf %6, %13 : vector<16x32xf32>
    %15 = arith.mulf %14, %14 : vector<16x32xf32>
    %cst_12 = arith.constant dense<0.000000e+00> : vector<16xf32>
    %16 = vector.multi_reduction <add>, %15, %cst_12 [1] : vector<16x32xf32> to vector<16xf32>
    %17 = vector.shape_cast %16 : vector<16xf32> to vector<16x1xf32>
    %cst_13 = arith.constant 3.200000e+01 : f32
    %18 = vector.broadcast %cst_13 : f32 to vector<16x1xf32>
    %19 = arith.divf %17, %18 : vector<16x1xf32>
    %20 = vector.broadcast %12 : vector<16x1xf32> to vector<16x32xf32>
    %21 = arith.subf %6, %20 : vector<16x32xf32>
    %cst_14 = arith.constant 9.99999974E-6 : f32
    %22 = vector.broadcast %cst_14 : f32 to vector<16x1xf32>
    %23 = arith.addf %19, %22 : vector<16x1xf32>
    %24 = math.rsqrt %23 : vector<16x1xf32>
    %25 = vector.broadcast %24 : vector<16x1xf32> to vector<16x32xf32>
    %26 = arith.mulf %21, %25 : vector<16x32xf32>
    %27 = vector.broadcast %7 : vector<1x32xf32> to vector<16x32xf32>
    %28 = arith.mulf %26, %27 : vector<16x32xf32>
    %29 = vector.broadcast %8 : vector<1x32xf32> to vector<16x32xf32>
    %30 = arith.addf %28, %29 : vector<16x32xf32>
    %c0_15 = arith.constant 0 : index
    %c0_16 = arith.constant 0 : index
    %31 = vector.load %arg4[%c0_15, %c0_16] : memref<1x32xf32, #tpu.memory_space<vmem>>, vector<1x32xf32>
    %c0_17 = arith.constant 0 : index
    %c0_18 = arith.constant 0 : index
    %32 = vector.load %arg6[%c0_17, %c0_18] : memref<1x32xf32, #tpu.memory_space<vmem>>, vector<1x32xf32>
    %c0_19 = arith.constant 0 : index
    %c0_20 = arith.constant 0 : index
    %33 = vector.load %arg7[%c0_19, %c0_20] : memref<1x32xf32, #tpu.memory_space<vmem>>, vector<1x32xf32>
    %cst_21 = arith.constant dense<0.000000e+00> : vector<1xf32>
    %34 = vector.multi_reduction <add>, %31, %cst_21 [1] : vector<1x32xf32> to vector<1xf32>
    %35 = vector.shape_cast %34 : vector<1xf32> to vector<1x1xf32>
    %cst_22 = arith.constant 3.200000e+01 : f32
    %36 = vector.broadcast %cst_22 : f32 to vector<1x1xf32>
    %37 = arith.divf %35, %36 : vector<1x1xf32>
    %38 = vector.broadcast %37 : vector<1x1xf32> to vector<1x32xf32>
    %39 = arith.subf %31, %38 : vector<1x32xf32>
    %40 = arith.mulf %39, %39 : vector<1x32xf32>
    %cst_23 = arith.constant dense<0.000000e+00> : vector<1xf32>
    %41 = vector.multi_reduction <add>, %40, %cst_23 [1] : vector<1x32xf32> to vector<1xf32>
    %42 = vector.shape_cast %41 : vector<1xf32> to vector<1x1xf32>
    %cst_24 = arith.constant 3.200000e+01 : f32
    %43 = vector.broadcast %cst_24 : f32 to vector<1x1xf32>
    %44 = arith.divf %42, %43 : vector<1x1xf32>
    %45 = vector.broadcast %37 : vector<1x1xf32> to vector<1x32xf32>
    %46 = arith.subf %31, %45 : vector<1x32xf32>
    %cst_25 = arith.constant 9.99999974E-6 : f32
    %47 = vector.broadcast %cst_25 : f32 to vector<1x1xf32>
    %48 = arith.addf %44, %47 : vector<1x1xf32>
    %49 = math.rsqrt %48 : vector<1x1xf32>
    %50 = vector.broadcast %49 : vector<1x1xf32> to vector<1x32xf32>
    %51 = arith.mulf %46, %50 : vector<1x32xf32>
    %52 = arith.mulf %51, %32 : vector<1x32xf32>
    %53 = arith.addf %52, %33 : vector<1x32xf32>
    %cst_26 = arith.constant 0.000000e+00 : f32
    %54 = vector.broadcast %cst_26 : f32 to vector<7x32xf32>
    %55 = tpu.concatenate %53, %30, %54 in 0 : vector<1x32xf32>, vector<16x32xf32>, vector<7x32xf32> -> vector<24x32xf32>
    %56 = tpu.iota {dimensions = array<i32: 0>} : vector<24x1xi32>
    %c17_i32 = arith.constant 17 : i32
    %57 = vector.broadcast %c17_i32 : i32 to vector<24x1xi32>
    %58 = arith.cmpi slt, %56, %57 : vector<24x1xi32>
    %59 = arith.extui %58 : vector<24x1xi1> to vector<24x1xi32>
    %60 = arith.sitofp %59 : vector<24x1xi32> to vector<24x1xf32>
    %61 = tpu.iota {dimensions = array<i32: 1>} : vector<1x24xi32>
    %c17_i32_27 = arith.constant 17 : i32
    %62 = vector.broadcast %c17_i32_27 : i32 to vector<1x24xi32>
    %63 = arith.cmpi slt, %61, %62 : vector<1x24xi32>
    %cst_28 = arith.constant 0.000000e+00 : f32
    %cst_29 = arith.constant -1.000000e+30 : f32
    %64 = vector.broadcast %cst_28 : f32 to vector<1x24xf32>
    %65 = vector.broadcast %cst_29 : f32 to vector<1x24xf32>
    %66 = arith.select %63, %64, %65 : vector<1x24xi1>, vector<1x24xf32>
    %c0_30 = arith.constant 0 : index
    %c0_31 = arith.constant 0 : index
    %c0_32 = arith.constant 0 : index
    %67 = vector.load %arg2[%c0_30, %c0_31, %c0_32] : memref<1x24x32xf32, #tpu.memory_space<vmem>>, vector<1x24x32xf32>
    %68 = vector.shape_cast %67 : vector<1x24x32xf32> to vector<24x32xf32>
    %69 = vector.broadcast %60 : vector<24x1xf32> to vector<24x32xf32>
    %70 = arith.mulf %55, %69 : vector<24x32xf32>
    %c0_33 = arith.constant 0 : index
    %c0_34 = arith.constant 0 : index
    %c0_35 = arith.constant 0 : index
    %71 = vector.load %arg8[%c0_33, %c0_34, %c0_35] : memref<3x1x32xf32, #tpu.memory_space<vmem>>, vector<1x1x32xf32>
    %72 = vector.shape_cast %71 : vector<1x1x32xf32> to vector<1x32xf32>
    %c0_36 = arith.constant 0 : index
    %c0_37 = arith.constant 0 : index
    %c0_38 = arith.constant 0 : index
    %73 = vector.load %arg9[%c0_36, %c0_37, %c0_38] : memref<3x1x32xf32, #tpu.memory_space<vmem>>, vector<1x1x32xf32>
    %74 = vector.shape_cast %73 : vector<1x1x32xf32> to vector<1x32xf32>
    %cst_39 = arith.constant dense<0.000000e+00> : vector<24xf32>
    %75 = vector.multi_reduction <add>, %70, %cst_39 [1] : vector<24x32xf32> to vector<24xf32>
    %76 = vector.shape_cast %75 : vector<24xf32> to vector<24x1xf32>
    %cst_40 = arith.constant 3.200000e+01 : f32
    %77 = vector.broadcast %cst_40 : f32 to vector<24x1xf32>
    %78 = arith.divf %76, %77 : vector<24x1xf32>
    %79 = vector.broadcast %78 : vector<24x1xf32> to vector<24x32xf32>
    %80 = arith.subf %70, %79 : vector<24x32xf32>
    %81 = arith.mulf %80, %80 : vector<24x32xf32>
    %cst_41 = arith.constant dense<0.000000e+00> : vector<24xf32>
    %82 = vector.multi_reduction <add>, %81, %cst_41 [1] : vector<24x32xf32> to vector<24xf32>
    %83 = vector.shape_cast %82 : vector<24xf32> to vector<24x1xf32>
    %cst_42 = arith.constant 3.200000e+01 : f32
    %84 = vector.broadcast %cst_42 : f32 to vector<24x1xf32>
    %85 = arith.divf %83, %84 : vector<24x1xf32>
    %86 = vector.broadcast %78 : vector<24x1xf32> to vector<24x32xf32>
    %87 = arith.subf %70, %86 : vector<24x32xf32>
    %cst_43 = arith.constant 9.99999974E-6 : f32
    %88 = vector.broadcast %cst_43 : f32 to vector<24x1xf32>
    %89 = arith.addf %85, %88 : vector<24x1xf32>
    %90 = math.rsqrt %89 : vector<24x1xf32>
    %91 = vector.broadcast %90 : vector<24x1xf32> to vector<24x32xf32>
    %92 = arith.mulf %87, %91 : vector<24x32xf32>
    %93 = vector.broadcast %72 : vector<1x32xf32> to vector<24x32xf32>
    %94 = arith.mulf %92, %93 : vector<24x32xf32>
    %95 = vector.broadcast %74 : vector<1x32xf32> to vector<24x32xf32>
    %96 = arith.addf %94, %95 : vector<24x32xf32>
    %97 = arith.truncf %96 : vector<24x32xf32> to vector<24x32xbf16>
    %c0_44 = arith.constant 0 : index
    %c0_45 = arith.constant 0 : index
    %c0_46 = arith.constant 0 : index
    %98 = vector.load %arg10[%c0_44, %c0_45, %c0_46] : memref<3x32x96xbf16, #tpu.memory_space<vmem>>, vector<1x32x96xbf16>
    %99 = vector.shape_cast %98 : vector<1x32x96xbf16> to vector<32x96xbf16>
    %cst_47 = arith.constant dense<0.000000e+00> : vector<24x96xf32>
    %100 = tpu.matmul %97, %99, %cst_47 {dimension_numbers = #tpu.dot_dimension_numbers<[1], [0], [0], [1], [0, 0, 1, 1], [], []>} : vector<24x32xbf16>, vector<32x96xbf16>, vector<24x96xf32> -> vector<24x96xf32>
    %c0_48 = arith.constant 0 : index
    %c0_49 = arith.constant 0 : index
    %c0_50 = arith.constant 0 : index
    %101 = vector.load %arg11[%c0_48, %c0_49, %c0_50] : memref<3x1x96xf32, #tpu.memory_space<vmem>>, vector<1x1x96xf32>
    %102 = vector.shape_cast %101 : vector<1x1x96xf32> to vector<1x96xf32>
    %103 = vector.broadcast %102 : vector<1x96xf32> to vector<24x96xf32>
    %104 = arith.addf %100, %103 : vector<24x96xf32>
    %105 = vector.extract_strided_slice %104 {offsets = [0, 0], sizes = [24, 32], strides = [1, 1]} : vector<24x96xf32> to vector<24x32xf32>
    %cst_51 = arith.constant 0.353553385 : f32
    %106 = vector.broadcast %cst_51 : f32 to vector<24x32xf32>
    %107 = arith.mulf %105, %106 : vector<24x32xf32>
    %108 = arith.truncf %107 : vector<24x32xf32> to vector<24x32xbf16>
    %109 = vector.extract_strided_slice %104 {offsets = [0, 32], sizes = [24, 32], strides = [1, 1]} : vector<24x96xf32> to vector<24x32xf32>
    %110 = arith.truncf %109 : vector<24x32xf32> to vector<24x32xbf16>
    %111 = vector.extract_strided_slice %104 {offsets = [0, 64], sizes = [24, 32], strides = [1, 1]} : vector<24x96xf32> to vector<24x32xf32>
    %112 = arith.truncf %111 : vector<24x32xf32> to vector<24x32xbf16>
    %113 = vector.extract_strided_slice %108 {offsets = [0, 0], sizes = [24, 8], strides = [1, 1]} : vector<24x32xbf16> to vector<24x8xbf16>
    %114 = vector.extract_strided_slice %110 {offsets = [0, 0], sizes = [24, 8], strides = [1, 1]} : vector<24x32xbf16> to vector<24x8xbf16>
    %cst_52 = arith.constant dense<0.000000e+00> : vector<24x24xf32>
    %115 = tpu.matmul %113, %114, %cst_52 {dimension_numbers = #tpu.dot_dimension_numbers<[1], [1], [0], [0], [0, 0, 1, 0], [], []>} : vector<24x8xbf16>, vector<24x8xbf16>, vector<24x24xf32> -> vector<24x24xf32>
    %116 = vector.broadcast %66 : vector<1x24xf32> to vector<24x24xf32>
    %117 = arith.addf %115, %116 : vector<24x24xf32>
    %cst_53 = arith.constant dense<0xFF800000> : vector<24xf32>
    %118 = vector.multi_reduction <maximumf>, %117, %cst_53 [1] : vector<24x24xf32> to vector<24xf32>
    %119 = vector.shape_cast %118 : vector<24xf32> to vector<24x1xf32>
    %120 = vector.broadcast %119 : vector<24x1xf32> to vector<24x24xf32>
    %121 = arith.subf %117, %120 : vector<24x24xf32>
    %122 = math.exp %121 : vector<24x24xf32>
    %cst_54 = arith.constant dense<0.000000e+00> : vector<24xf32>
    %123 = vector.multi_reduction <add>, %122, %cst_54 [1] : vector<24x24xf32> to vector<24xf32>
    %124 = vector.shape_cast %123 : vector<24xf32> to vector<24x1xf32>
    %125 = tpu.reciprocal %124 {approx = true} : vector<24x1xf32> -> vector<24x1xf32>
    %126 = vector.broadcast %125 : vector<24x1xf32> to vector<24x24xf32>
    %127 = arith.mulf %122, %126 : vector<24x24xf32>
    %128 = arith.truncf %127 : vector<24x24xf32> to vector<24x24xbf16>
    %129 = vector.extract_strided_slice %112 {offsets = [0, 0], sizes = [24, 8], strides = [1, 1]} : vector<24x32xbf16> to vector<24x8xbf16>
    %cst_55 = arith.constant dense<0.000000e+00> : vector<24x8xf32>
    %130 = tpu.matmul %128, %129, %cst_55 {dimension_numbers = #tpu.dot_dimension_numbers<[1], [0], [0], [1], [0, 0, 1, 1], [], []>} : vector<24x24xbf16>, vector<24x8xbf16>, vector<24x8xf32> -> vector<24x8xf32>
    %131 = vector.extract_strided_slice %108 {offsets = [0, 8], sizes = [24, 8], strides = [1, 1]} : vector<24x32xbf16> to vector<24x8xbf16>
    %132 = vector.extract_strided_slice %110 {offsets = [0, 8], sizes = [24, 8], strides = [1, 1]} : vector<24x32xbf16> to vector<24x8xbf16>
    %cst_56 = arith.constant dense<0.000000e+00> : vector<24x24xf32>
    %133 = tpu.matmul %131, %132, %cst_56 {dimension_numbers = #tpu.dot_dimension_numbers<[1], [1], [0], [0], [0, 0, 1, 0], [], []>} : vector<24x8xbf16>, vector<24x8xbf16>, vector<24x24xf32> -> vector<24x24xf32>
    %134 = vector.broadcast %66 : vector<1x24xf32> to vector<24x24xf32>
    %135 = arith.addf %133, %134 : vector<24x24xf32>
    %cst_57 = arith.constant dense<0xFF800000> : vector<24xf32>
    %136 = vector.multi_reduction <maximumf>, %135, %cst_57 [1] : vector<24x24xf32> to vector<24xf32>
    %137 = vector.shape_cast %136 : vector<24xf32> to vector<24x1xf32>
    %138 = vector.broadcast %137 : vector<24x1xf32> to vector<24x24xf32>
    %139 = arith.subf %135, %138 : vector<24x24xf32>
    %140 = math.exp %139 : vector<24x24xf32>
    %cst_58 = arith.constant dense<0.000000e+00> : vector<24xf32>
    %141 = vector.multi_reduction <add>, %140, %cst_58 [1] : vector<24x24xf32> to vector<24xf32>
    %142 = vector.shape_cast %141 : vector<24xf32> to vector<24x1xf32>
    %143 = tpu.reciprocal %142 {approx = true} : vector<24x1xf32> -> vector<24x1xf32>
    %144 = vector.broadcast %143 : vector<24x1xf32> to vector<24x24xf32>
    %145 = arith.mulf %140, %144 : vector<24x24xf32>
    %146 = arith.truncf %145 : vector<24x24xf32> to vector<24x24xbf16>
    %147 = vector.extract_strided_slice %112 {offsets = [0, 8], sizes = [24, 8], strides = [1, 1]} : vector<24x32xbf16> to vector<24x8xbf16>
    %cst_59 = arith.constant dense<0.000000e+00> : vector<24x8xf32>
    %148 = tpu.matmul %146, %147, %cst_59 {dimension_numbers = #tpu.dot_dimension_numbers<[1], [0], [0], [1], [0, 0, 1, 1], [], []>} : vector<24x24xbf16>, vector<24x8xbf16>, vector<24x8xf32> -> vector<24x8xf32>
    %149 = vector.extract_strided_slice %108 {offsets = [0, 16], sizes = [24, 8], strides = [1, 1]} : vector<24x32xbf16> to vector<24x8xbf16>
    %150 = vector.extract_strided_slice %110 {offsets = [0, 16], sizes = [24, 8], strides = [1, 1]} : vector<24x32xbf16> to vector<24x8xbf16>
    %cst_60 = arith.constant dense<0.000000e+00> : vector<24x24xf32>
    %151 = tpu.matmul %149, %150, %cst_60 {dimension_numbers = #tpu.dot_dimension_numbers<[1], [1], [0], [0], [0, 0, 1, 0], [], []>} : vector<24x8xbf16>, vector<24x8xbf16>, vector<24x24xf32> -> vector<24x24xf32>
    %152 = vector.broadcast %66 : vector<1x24xf32> to vector<24x24xf32>
    %153 = arith.addf %151, %152 : vector<24x24xf32>
    %cst_61 = arith.constant dense<0xFF800000> : vector<24xf32>
    %154 = vector.multi_reduction <maximumf>, %153, %cst_61 [1] : vector<24x24xf32> to vector<24xf32>
    %155 = vector.shape_cast %154 : vector<24xf32> to vector<24x1xf32>
    %156 = vector.broadcast %155 : vector<24x1xf32> to vector<24x24xf32>
    %157 = arith.subf %153, %156 : vector<24x24xf32>
    %158 = math.exp %157 : vector<24x24xf32>
    %cst_62 = arith.constant dense<0.000000e+00> : vector<24xf32>
    %159 = vector.multi_reduction <add>, %158, %cst_62 [1] : vector<24x24xf32> to vector<24xf32>
    %160 = vector.shape_cast %159 : vector<24xf32> to vector<24x1xf32>
    %161 = tpu.reciprocal %160 {approx = true} : vector<24x1xf32> -> vector<24x1xf32>
    %162 = vector.broadcast %161 : vector<24x1xf32> to vector<24x24xf32>
    %163 = arith.mulf %158, %162 : vector<24x24xf32>
    %164 = arith.truncf %163 : vector<24x24xf32> to vector<24x24xbf16>
    %165 = vector.extract_strided_slice %112 {offsets = [0, 16], sizes = [24, 8], strides = [1, 1]} : vector<24x32xbf16> to vector<24x8xbf16>
    %cst_63 = arith.constant dense<0.000000e+00> : vector<24x8xf32>
    %166 = tpu.matmul %164, %165, %cst_63 {dimension_numbers = #tpu.dot_dimension_numbers<[1], [0], [0], [1], [0, 0, 1, 1], [], []>} : vector<24x24xbf16>, vector<24x8xbf16>, vector<24x8xf32> -> vector<24x8xf32>
    %167 = vector.extract_strided_slice %108 {offsets = [0, 24], sizes = [24, 8], strides = [1, 1]} : vector<24x32xbf16> to vector<24x8xbf16>
    %168 = vector.extract_strided_slice %110 {offsets = [0, 24], sizes = [24, 8], strides = [1, 1]} : vector<24x32xbf16> to vector<24x8xbf16>
    %cst_64 = arith.constant dense<0.000000e+00> : vector<24x24xf32>
    %169 = tpu.matmul %167, %168, %cst_64 {dimension_numbers = #tpu.dot_dimension_numbers<[1], [1], [0], [0], [0, 0, 1, 0], [], []>} : vector<24x8xbf16>, vector<24x8xbf16>, vector<24x24xf32> -> vector<24x24xf32>
    %170 = vector.broadcast %66 : vector<1x24xf32> to vector<24x24xf32>
    %171 = arith.addf %169, %170 : vector<24x24xf32>
    %cst_65 = arith.constant dense<0xFF800000> : vector<24xf32>
    %172 = vector.multi_reduction <maximumf>, %171, %cst_65 [1] : vector<24x24xf32> to vector<24xf32>
    %173 = vector.shape_cast %172 : vector<24xf32> to vector<24x1xf32>
    %174 = vector.broadcast %173 : vector<24x1xf32> to vector<24x24xf32>
    %175 = arith.subf %171, %174 : vector<24x24xf32>
    %176 = math.exp %175 : vector<24x24xf32>
    %cst_66 = arith.constant dense<0.000000e+00> : vector<24xf32>
    %177 = vector.multi_reduction <add>, %176, %cst_66 [1] : vector<24x24xf32> to vector<24xf32>
    %178 = vector.shape_cast %177 : vector<24xf32> to vector<24x1xf32>
    %179 = tpu.reciprocal %178 {approx = true} : vector<24x1xf32> -> vector<24x1xf32>
    %180 = vector.broadcast %179 : vector<24x1xf32> to vector<24x24xf32>
    %181 = arith.mulf %176, %180 : vector<24x24xf32>
    %182 = arith.truncf %181 : vector<24x24xf32> to vector<24x24xbf16>
    %183 = vector.extract_strided_slice %112 {offsets = [0, 24], sizes = [24, 8], strides = [1, 1]} : vector<24x32xbf16> to vector<24x8xbf16>
    %cst_67 = arith.constant dense<0.000000e+00> : vector<24x8xf32>
    %184 = tpu.matmul %182, %183, %cst_67 {dimension_numbers = #tpu.dot_dimension_numbers<[1], [0], [0], [1], [0, 0, 1, 1], [], []>} : vector<24x24xbf16>, vector<24x8xbf16>, vector<24x8xf32> -> vector<24x8xf32>
    %185 = tpu.concatenate %130, %148, %166, %184 in 1 : vector<24x8xf32>, vector<24x8xf32>, vector<24x8xf32>, vector<24x8xf32> -> vector<24x32xf32>
    %186 = arith.truncf %185 : vector<24x32xf32> to vector<24x32xbf16>
    %c0_68 = arith.constant 0 : index
    %c0_69 = arith.constant 0 : index
    %c0_70 = arith.constant 0 : index
    %187 = vector.load %arg12[%c0_68, %c0_69, %c0_70] : memref<3x32x32xbf16, #tpu.memory_space<vmem>>, vector<1x32x32xbf16>
    %188 = vector.shape_cast %187 : vector<1x32x32xbf16> to vector<32x32xbf16>
    %cst_71 = arith.constant dense<0.000000e+00> : vector<24x32xf32>
    %189 = tpu.matmul %186, %188, %cst_71 {dimension_numbers = #tpu.dot_dimension_numbers<[1], [0], [0], [1], [0, 0, 1, 1], [], []>} : vector<24x32xbf16>, vector<32x32xbf16>, vector<24x32xf32> -> vector<24x32xf32>
    %c0_72 = arith.constant 0 : index
    %c0_73 = arith.constant 0 : index
    %c0_74 = arith.constant 0 : index
    %190 = vector.load %arg13[%c0_72, %c0_73, %c0_74] : memref<3x1x32xf32, #tpu.memory_space<vmem>>, vector<1x1x32xf32>
    %191 = vector.shape_cast %190 : vector<1x1x32xf32> to vector<1x32xf32>
    %192 = vector.broadcast %191 : vector<1x32xf32> to vector<24x32xf32>
    %193 = arith.addf %189, %192 : vector<24x32xf32>
    %194 = arith.addf %70, %193 : vector<24x32xf32>
    %c0_75 = arith.constant 0 : index
    %c0_76 = arith.constant 0 : index
    %c0_77 = arith.constant 0 : index
    %195 = vector.load %arg14[%c0_75, %c0_76, %c0_77] : memref<3x1x32xf32, #tpu.memory_space<vmem>>, vector<1x1x32xf32>
    %196 = vector.shape_cast %195 : vector<1x1x32xf32> to vector<1x32xf32>
    %c0_78 = arith.constant 0 : index
    %c0_79 = arith.constant 0 : index
    %c0_80 = arith.constant 0 : index
    %197 = vector.load %arg15[%c0_78, %c0_79, %c0_80] : memref<3x1x32xf32, #tpu.memory_space<vmem>>, vector<1x1x32xf32>
    %198 = vector.shape_cast %197 : vector<1x1x32xf32> to vector<1x32xf32>
    %cst_81 = arith.constant dense<0.000000e+00> : vector<24xf32>
    %199 = vector.multi_reduction <add>, %194, %cst_81 [1] : vector<24x32xf32> to vector<24xf32>
    %200 = vector.shape_cast %199 : vector<24xf32> to vector<24x1xf32>
    %cst_82 = arith.constant 3.200000e+01 : f32
    %201 = vector.broadcast %cst_82 : f32 to vector<24x1xf32>
    %202 = arith.divf %200, %201 : vector<24x1xf32>
    %203 = vector.broadcast %202 : vector<24x1xf32> to vector<24x32xf32>
    %204 = arith.subf %194, %203 : vector<24x32xf32>
    %205 = arith.mulf %204, %204 : vector<24x32xf32>
    %cst_83 = arith.constant dense<0.000000e+00> : vector<24xf32>
    %206 = vector.multi_reduction <add>, %205, %cst_83 [1] : vector<24x32xf32> to vector<24xf32>
    %207 = vector.shape_cast %206 : vector<24xf32> to vector<24x1xf32>
    %cst_84 = arith.constant 3.200000e+01 : f32
    %208 = vector.broadcast %cst_84 : f32 to vector<24x1xf32>
    %209 = arith.divf %207, %208 : vector<24x1xf32>
    %210 = vector.broadcast %202 : vector<24x1xf32> to vector<24x32xf32>
    %211 = arith.subf %194, %210 : vector<24x32xf32>
    %cst_85 = arith.constant 9.99999974E-6 : f32
    %212 = vector.broadcast %cst_85 : f32 to vector<24x1xf32>
    %213 = arith.addf %209, %212 : vector<24x1xf32>
    %214 = math.rsqrt %213 : vector<24x1xf32>
    %215 = vector.broadcast %214 : vector<24x1xf32> to vector<24x32xf32>
    %216 = arith.mulf %211, %215 : vector<24x32xf32>
    %217 = vector.broadcast %196 : vector<1x32xf32> to vector<24x32xf32>
    %218 = arith.mulf %216, %217 : vector<24x32xf32>
    %219 = vector.broadcast %198 : vector<1x32xf32> to vector<24x32xf32>
    %220 = arith.addf %218, %219 : vector<24x32xf32>
    %221 = arith.truncf %220 : vector<24x32xf32> to vector<24x32xbf16>
    %c0_86 = arith.constant 0 : index
    %c0_87 = arith.constant 0 : index
    %c0_88 = arith.constant 0 : index
    %222 = vector.load %arg16[%c0_86, %c0_87, %c0_88] : memref<3x32x128xbf16, #tpu.memory_space<vmem>>, vector<1x32x128xbf16>
    %223 = vector.shape_cast %222 : vector<1x32x128xbf16> to vector<32x128xbf16>
    %cst_89 = arith.constant dense<0.000000e+00> : vector<24x128xf32>
    %224 = tpu.matmul %221, %223, %cst_89 {dimension_numbers = #tpu.dot_dimension_numbers<[1], [0], [0], [1], [0, 0, 1, 1], [], []>} : vector<24x32xbf16>, vector<32x128xbf16>, vector<24x128xf32> -> vector<24x128xf32>
    %c0_90 = arith.constant 0 : index
    %c0_91 = arith.constant 0 : index
    %c0_92 = arith.constant 0 : index
    %225 = vector.load %arg17[%c0_90, %c0_91, %c0_92] : memref<3x1x128xf32, #tpu.memory_space<vmem>>, vector<1x1x128xf32>
    %226 = vector.shape_cast %225 : vector<1x1x128xf32> to vector<1x128xf32>
    %227 = vector.broadcast %226 : vector<1x128xf32> to vector<24x128xf32>
    %228 = arith.addf %224, %227 : vector<24x128xf32>
    %cst_93 = arith.constant 1.702000e+00 : f32
    %229 = vector.broadcast %cst_93 : f32 to vector<24x128xf32>
    %230 = arith.mulf %229, %228 : vector<24x128xf32>
    %231 = arith.negf %230 : vector<24x128xf32>
    %232 = math.exp %231 : vector<24x128xf32>
    %cst_94 = arith.constant 1.000000e+00 : f32
    %233 = vector.broadcast %cst_94 : f32 to vector<24x128xf32>
    %234 = arith.addf %233, %232 : vector<24x128xf32>
    %235 = arith.divf %233, %234 : vector<24x128xf32>
    %236 = arith.mulf %228, %235 : vector<24x128xf32>
    %237 = arith.truncf %236 : vector<24x128xf32> to vector<24x128xbf16>
    %c0_95 = arith.constant 0 : index
    %c0_96 = arith.constant 0 : index
    %c0_97 = arith.constant 0 : index
    %238 = vector.load %arg18[%c0_95, %c0_96, %c0_97] : memref<3x128x32xbf16, #tpu.memory_space<vmem>>, vector<1x128x32xbf16>
    %239 = vector.shape_cast %238 : vector<1x128x32xbf16> to vector<128x32xbf16>
    %cst_98 = arith.constant dense<0.000000e+00> : vector<24x32xf32>
    %240 = tpu.matmul %237, %239, %cst_98 {dimension_numbers = #tpu.dot_dimension_numbers<[1], [0], [0], [1], [0, 0, 1, 1], [], []>} : vector<24x128xbf16>, vector<128x32xbf16>, vector<24x32xf32> -> vector<24x32xf32>
    %c0_99 = arith.constant 0 : index
    %c0_100 = arith.constant 0 : index
    %c0_101 = arith.constant 0 : index
    %241 = vector.load %arg19[%c0_99, %c0_100, %c0_101] : memref<3x1x32xf32, #tpu.memory_space<vmem>>, vector<1x1x32xf32>
    %242 = vector.shape_cast %241 : vector<1x1x32xf32> to vector<1x32xf32>
    %243 = vector.broadcast %242 : vector<1x32xf32> to vector<24x32xf32>
    %244 = arith.addf %240, %243 : vector<24x32xf32>
    %245 = arith.addf %194, %244 : vector<24x32xf32>
    %246 = arith.mulf %245, %68 : vector<24x32xf32>
    %c1 = arith.constant 1 : index
    %c0_102 = arith.constant 0 : index
    %c0_103 = arith.constant 0 : index
    %247 = vector.load %arg8[%c1, %c0_102, %c0_103] : memref<3x1x32xf32, #tpu.memory_space<vmem>>, vector<1x1x32xf32>
    %248 = vector.shape_cast %247 : vector<1x1x32xf32> to vector<1x32xf32>
    %c1_104 = arith.constant 1 : index
    %c0_105 = arith.constant 0 : index
    %c0_106 = arith.constant 0 : index
    %249 = vector.load %arg9[%c1_104, %c0_105, %c0_106] : memref<3x1x32xf32, #tpu.memory_space<vmem>>, vector<1x1x32xf32>
    %250 = vector.shape_cast %249 : vector<1x1x32xf32> to vector<1x32xf32>
    %cst_107 = arith.constant dense<0.000000e+00> : vector<24xf32>
    %251 = vector.multi_reduction <add>, %246, %cst_107 [1] : vector<24x32xf32> to vector<24xf32>
    %252 = vector.shape_cast %251 : vector<24xf32> to vector<24x1xf32>
    %cst_108 = arith.constant 3.200000e+01 : f32
    %253 = vector.broadcast %cst_108 : f32 to vector<24x1xf32>
    %254 = arith.divf %252, %253 : vector<24x1xf32>
    %255 = vector.broadcast %254 : vector<24x1xf32> to vector<24x32xf32>
    %256 = arith.subf %246, %255 : vector<24x32xf32>
    %257 = arith.mulf %256, %256 : vector<24x32xf32>
    %cst_109 = arith.constant dense<0.000000e+00> : vector<24xf32>
    %258 = vector.multi_reduction <add>, %257, %cst_109 [1] : vector<24x32xf32> to vector<24xf32>
    %259 = vector.shape_cast %258 : vector<24xf32> to vector<24x1xf32>
    %cst_110 = arith.constant 3.200000e+01 : f32
    %260 = vector.broadcast %cst_110 : f32 to vector<24x1xf32>
    %261 = arith.divf %259, %260 : vector<24x1xf32>
    %262 = vector.broadcast %254 : vector<24x1xf32> to vector<24x32xf32>
    %263 = arith.subf %246, %262 : vector<24x32xf32>
    %cst_111 = arith.constant 9.99999974E-6 : f32
    %264 = vector.broadcast %cst_111 : f32 to vector<24x1xf32>
    %265 = arith.addf %261, %264 : vector<24x1xf32>
    %266 = math.rsqrt %265 : vector<24x1xf32>
    %267 = vector.broadcast %266 : vector<24x1xf32> to vector<24x32xf32>
    %268 = arith.mulf %263, %267 : vector<24x32xf32>
    %269 = vector.broadcast %248 : vector<1x32xf32> to vector<24x32xf32>
    %270 = arith.mulf %268, %269 : vector<24x32xf32>
    %271 = vector.broadcast %250 : vector<1x32xf32> to vector<24x32xf32>
    %272 = arith.addf %270, %271 : vector<24x32xf32>
    %273 = arith.truncf %272 : vector<24x32xf32> to vector<24x32xbf16>
    %c1_112 = arith.constant 1 : index
    %c0_113 = arith.constant 0 : index
    %c0_114 = arith.constant 0 : index
    %274 = vector.load %arg10[%c1_112, %c0_113, %c0_114] : memref<3x32x96xbf16, #tpu.memory_space<vmem>>, vector<1x32x96xbf16>
    %275 = vector.shape_cast %274 : vector<1x32x96xbf16> to vector<32x96xbf16>
    %cst_115 = arith.constant dense<0.000000e+00> : vector<24x96xf32>
    %276 = tpu.matmul %273, %275, %cst_115 {dimension_numbers = #tpu.dot_dimension_numbers<[1], [0], [0], [1], [0, 0, 1, 1], [], []>} : vector<24x32xbf16>, vector<32x96xbf16>, vector<24x96xf32> -> vector<24x96xf32>
    %c1_116 = arith.constant 1 : index
    %c0_117 = arith.constant 0 : index
    %c0_118 = arith.constant 0 : index
    %277 = vector.load %arg11[%c1_116, %c0_117, %c0_118] : memref<3x1x96xf32, #tpu.memory_space<vmem>>, vector<1x1x96xf32>
    %278 = vector.shape_cast %277 : vector<1x1x96xf32> to vector<1x96xf32>
    %279 = vector.broadcast %278 : vector<1x96xf32> to vector<24x96xf32>
    %280 = arith.addf %276, %279 : vector<24x96xf32>
    %281 = vector.extract_strided_slice %280 {offsets = [0, 0], sizes = [24, 32], strides = [1, 1]} : vector<24x96xf32> to vector<24x32xf32>
    %cst_119 = arith.constant 0.353553385 : f32
    %282 = vector.broadcast %cst_119 : f32 to vector<24x32xf32>
    %283 = arith.mulf %281, %282 : vector<24x32xf32>
    %284 = arith.truncf %283 : vector<24x32xf32> to vector<24x32xbf16>
    %285 = vector.extract_strided_slice %280 {offsets = [0, 32], sizes = [24, 32], strides = [1, 1]} : vector<24x96xf32> to vector<24x32xf32>
    %286 = arith.truncf %285 : vector<24x32xf32> to vector<24x32xbf16>
    %287 = vector.extract_strided_slice %280 {offsets = [0, 64], sizes = [24, 32], strides = [1, 1]} : vector<24x96xf32> to vector<24x32xf32>
    %288 = arith.truncf %287 : vector<24x32xf32> to vector<24x32xbf16>
    %289 = vector.extract_strided_slice %284 {offsets = [0, 0], sizes = [24, 8], strides = [1, 1]} : vector<24x32xbf16> to vector<24x8xbf16>
    %290 = vector.extract_strided_slice %286 {offsets = [0, 0], sizes = [24, 8], strides = [1, 1]} : vector<24x32xbf16> to vector<24x8xbf16>
    %cst_120 = arith.constant dense<0.000000e+00> : vector<24x24xf32>
    %291 = tpu.matmul %289, %290, %cst_120 {dimension_numbers = #tpu.dot_dimension_numbers<[1], [1], [0], [0], [0, 0, 1, 0], [], []>} : vector<24x8xbf16>, vector<24x8xbf16>, vector<24x24xf32> -> vector<24x24xf32>
    %292 = vector.broadcast %66 : vector<1x24xf32> to vector<24x24xf32>
    %293 = arith.addf %291, %292 : vector<24x24xf32>
    %cst_121 = arith.constant dense<0xFF800000> : vector<24xf32>
    %294 = vector.multi_reduction <maximumf>, %293, %cst_121 [1] : vector<24x24xf32> to vector<24xf32>
    %295 = vector.shape_cast %294 : vector<24xf32> to vector<24x1xf32>
    %296 = vector.broadcast %295 : vector<24x1xf32> to vector<24x24xf32>
    %297 = arith.subf %293, %296 : vector<24x24xf32>
    %298 = math.exp %297 : vector<24x24xf32>
    %cst_122 = arith.constant dense<0.000000e+00> : vector<24xf32>
    %299 = vector.multi_reduction <add>, %298, %cst_122 [1] : vector<24x24xf32> to vector<24xf32>
    %300 = vector.shape_cast %299 : vector<24xf32> to vector<24x1xf32>
    %301 = tpu.reciprocal %300 {approx = true} : vector<24x1xf32> -> vector<24x1xf32>
    %302 = vector.broadcast %301 : vector<24x1xf32> to vector<24x24xf32>
    %303 = arith.mulf %298, %302 : vector<24x24xf32>
    %304 = arith.truncf %303 : vector<24x24xf32> to vector<24x24xbf16>
    %305 = vector.extract_strided_slice %288 {offsets = [0, 0], sizes = [24, 8], strides = [1, 1]} : vector<24x32xbf16> to vector<24x8xbf16>
    %cst_123 = arith.constant dense<0.000000e+00> : vector<24x8xf32>
    %306 = tpu.matmul %304, %305, %cst_123 {dimension_numbers = #tpu.dot_dimension_numbers<[1], [0], [0], [1], [0, 0, 1, 1], [], []>} : vector<24x24xbf16>, vector<24x8xbf16>, vector<24x8xf32> -> vector<24x8xf32>
    %307 = vector.extract_strided_slice %284 {offsets = [0, 8], sizes = [24, 8], strides = [1, 1]} : vector<24x32xbf16> to vector<24x8xbf16>
    %308 = vector.extract_strided_slice %286 {offsets = [0, 8], sizes = [24, 8], strides = [1, 1]} : vector<24x32xbf16> to vector<24x8xbf16>
    %cst_124 = arith.constant dense<0.000000e+00> : vector<24x24xf32>
    %309 = tpu.matmul %307, %308, %cst_124 {dimension_numbers = #tpu.dot_dimension_numbers<[1], [1], [0], [0], [0, 0, 1, 0], [], []>} : vector<24x8xbf16>, vector<24x8xbf16>, vector<24x24xf32> -> vector<24x24xf32>
    %310 = vector.broadcast %66 : vector<1x24xf32> to vector<24x24xf32>
    %311 = arith.addf %309, %310 : vector<24x24xf32>
    %cst_125 = arith.constant dense<0xFF800000> : vector<24xf32>
    %312 = vector.multi_reduction <maximumf>, %311, %cst_125 [1] : vector<24x24xf32> to vector<24xf32>
    %313 = vector.shape_cast %312 : vector<24xf32> to vector<24x1xf32>
    %314 = vector.broadcast %313 : vector<24x1xf32> to vector<24x24xf32>
    %315 = arith.subf %311, %314 : vector<24x24xf32>
    %316 = math.exp %315 : vector<24x24xf32>
    %cst_126 = arith.constant dense<0.000000e+00> : vector<24xf32>
    %317 = vector.multi_reduction <add>, %316, %cst_126 [1] : vector<24x24xf32> to vector<24xf32>
    %318 = vector.shape_cast %317 : vector<24xf32> to vector<24x1xf32>
    %319 = tpu.reciprocal %318 {approx = true} : vector<24x1xf32> -> vector<24x1xf32>
    %320 = vector.broadcast %319 : vector<24x1xf32> to vector<24x24xf32>
    %321 = arith.mulf %316, %320 : vector<24x24xf32>
    %322 = arith.truncf %321 : vector<24x24xf32> to vector<24x24xbf16>
    %323 = vector.extract_strided_slice %288 {offsets = [0, 8], sizes = [24, 8], strides = [1, 1]} : vector<24x32xbf16> to vector<24x8xbf16>
    %cst_127 = arith.constant dense<0.000000e+00> : vector<24x8xf32>
    %324 = tpu.matmul %322, %323, %cst_127 {dimension_numbers = #tpu.dot_dimension_numbers<[1], [0], [0], [1], [0, 0, 1, 1], [], []>} : vector<24x24xbf16>, vector<24x8xbf16>, vector<24x8xf32> -> vector<24x8xf32>
    %325 = vector.extract_strided_slice %284 {offsets = [0, 16], sizes = [24, 8], strides = [1, 1]} : vector<24x32xbf16> to vector<24x8xbf16>
    %326 = vector.extract_strided_slice %286 {offsets = [0, 16], sizes = [24, 8], strides = [1, 1]} : vector<24x32xbf16> to vector<24x8xbf16>
    %cst_128 = arith.constant dense<0.000000e+00> : vector<24x24xf32>
    %327 = tpu.matmul %325, %326, %cst_128 {dimension_numbers = #tpu.dot_dimension_numbers<[1], [1], [0], [0], [0, 0, 1, 0], [], []>} : vector<24x8xbf16>, vector<24x8xbf16>, vector<24x24xf32> -> vector<24x24xf32>
    %328 = vector.broadcast %66 : vector<1x24xf32> to vector<24x24xf32>
    %329 = arith.addf %327, %328 : vector<24x24xf32>
    %cst_129 = arith.constant dense<0xFF800000> : vector<24xf32>
    %330 = vector.multi_reduction <maximumf>, %329, %cst_129 [1] : vector<24x24xf32> to vector<24xf32>
    %331 = vector.shape_cast %330 : vector<24xf32> to vector<24x1xf32>
    %332 = vector.broadcast %331 : vector<24x1xf32> to vector<24x24xf32>
    %333 = arith.subf %329, %332 : vector<24x24xf32>
    %334 = math.exp %333 : vector<24x24xf32>
    %cst_130 = arith.constant dense<0.000000e+00> : vector<24xf32>
    %335 = vector.multi_reduction <add>, %334, %cst_130 [1] : vector<24x24xf32> to vector<24xf32>
    %336 = vector.shape_cast %335 : vector<24xf32> to vector<24x1xf32>
    %337 = tpu.reciprocal %336 {approx = true} : vector<24x1xf32> -> vector<24x1xf32>
    %338 = vector.broadcast %337 : vector<24x1xf32> to vector<24x24xf32>
    %339 = arith.mulf %334, %338 : vector<24x24xf32>
    %340 = arith.truncf %339 : vector<24x24xf32> to vector<24x24xbf16>
    %341 = vector.extract_strided_slice %288 {offsets = [0, 16], sizes = [24, 8], strides = [1, 1]} : vector<24x32xbf16> to vector<24x8xbf16>
    %cst_131 = arith.constant dense<0.000000e+00> : vector<24x8xf32>
    %342 = tpu.matmul %340, %341, %cst_131 {dimension_numbers = #tpu.dot_dimension_numbers<[1], [0], [0], [1], [0, 0, 1, 1], [], []>} : vector<24x24xbf16>, vector<24x8xbf16>, vector<24x8xf32> -> vector<24x8xf32>
    %343 = vector.extract_strided_slice %284 {offsets = [0, 24], sizes = [24, 8], strides = [1, 1]} : vector<24x32xbf16> to vector<24x8xbf16>
    %344 = vector.extract_strided_slice %286 {offsets = [0, 24], sizes = [24, 8], strides = [1, 1]} : vector<24x32xbf16> to vector<24x8xbf16>
    %cst_132 = arith.constant dense<0.000000e+00> : vector<24x24xf32>
    %345 = tpu.matmul %343, %344, %cst_132 {dimension_numbers = #tpu.dot_dimension_numbers<[1], [1], [0], [0], [0, 0, 1, 0], [], []>} : vector<24x8xbf16>, vector<24x8xbf16>, vector<24x24xf32> -> vector<24x24xf32>
    %346 = vector.broadcast %66 : vector<1x24xf32> to vector<24x24xf32>
    %347 = arith.addf %345, %346 : vector<24x24xf32>
    %cst_133 = arith.constant dense<0xFF800000> : vector<24xf32>
    %348 = vector.multi_reduction <maximumf>, %347, %cst_133 [1] : vector<24x24xf32> to vector<24xf32>
    %349 = vector.shape_cast %348 : vector<24xf32> to vector<24x1xf32>
    %350 = vector.broadcast %349 : vector<24x1xf32> to vector<24x24xf32>
    %351 = arith.subf %347, %350 : vector<24x24xf32>
    %352 = math.exp %351 : vector<24x24xf32>
    %cst_134 = arith.constant dense<0.000000e+00> : vector<24xf32>
    %353 = vector.multi_reduction <add>, %352, %cst_134 [1] : vector<24x24xf32> to vector<24xf32>
    %354 = vector.shape_cast %353 : vector<24xf32> to vector<24x1xf32>
    %355 = tpu.reciprocal %354 {approx = true} : vector<24x1xf32> -> vector<24x1xf32>
    %356 = vector.broadcast %355 : vector<24x1xf32> to vector<24x24xf32>
    %357 = arith.mulf %352, %356 : vector<24x24xf32>
    %358 = arith.truncf %357 : vector<24x24xf32> to vector<24x24xbf16>
    %359 = vector.extract_strided_slice %288 {offsets = [0, 24], sizes = [24, 8], strides = [1, 1]} : vector<24x32xbf16> to vector<24x8xbf16>
    %cst_135 = arith.constant dense<0.000000e+00> : vector<24x8xf32>
    %360 = tpu.matmul %358, %359, %cst_135 {dimension_numbers = #tpu.dot_dimension_numbers<[1], [0], [0], [1], [0, 0, 1, 1], [], []>} : vector<24x24xbf16>, vector<24x8xbf16>, vector<24x8xf32> -> vector<24x8xf32>
    %361 = tpu.concatenate %306, %324, %342, %360 in 1 : vector<24x8xf32>, vector<24x8xf32>, vector<24x8xf32>, vector<24x8xf32> -> vector<24x32xf32>
    %362 = arith.truncf %361 : vector<24x32xf32> to vector<24x32xbf16>
    %c1_136 = arith.constant 1 : index
    %c0_137 = arith.constant 0 : index
    %c0_138 = arith.constant 0 : index
    %363 = vector.load %arg12[%c1_136, %c0_137, %c0_138] : memref<3x32x32xbf16, #tpu.memory_space<vmem>>, vector<1x32x32xbf16>
    %364 = vector.shape_cast %363 : vector<1x32x32xbf16> to vector<32x32xbf16>
    %cst_139 = arith.constant dense<0.000000e+00> : vector<24x32xf32>
    %365 = tpu.matmul %362, %364, %cst_139 {dimension_numbers = #tpu.dot_dimension_numbers<[1], [0], [0], [1], [0, 0, 1, 1], [], []>} : vector<24x32xbf16>, vector<32x32xbf16>, vector<24x32xf32> -> vector<24x32xf32>
    %c1_140 = arith.constant 1 : index
    %c0_141 = arith.constant 0 : index
    %c0_142 = arith.constant 0 : index
    %366 = vector.load %arg13[%c1_140, %c0_141, %c0_142] : memref<3x1x32xf32, #tpu.memory_space<vmem>>, vector<1x1x32xf32>
    %367 = vector.shape_cast %366 : vector<1x1x32xf32> to vector<1x32xf32>
    %368 = vector.broadcast %367 : vector<1x32xf32> to vector<24x32xf32>
    %369 = arith.addf %365, %368 : vector<24x32xf32>
    %370 = arith.addf %246, %369 : vector<24x32xf32>
    %c1_143 = arith.constant 1 : index
    %c0_144 = arith.constant 0 : index
    %c0_145 = arith.constant 0 : index
    %371 = vector.load %arg14[%c1_143, %c0_144, %c0_145] : memref<3x1x32xf32, #tpu.memory_space<vmem>>, vector<1x1x32xf32>
    %372 = vector.shape_cast %371 : vector<1x1x32xf32> to vector<1x32xf32>
    %c1_146 = arith.constant 1 : index
    %c0_147 = arith.constant 0 : index
    %c0_148 = arith.constant 0 : index
    %373 = vector.load %arg15[%c1_146, %c0_147, %c0_148] : memref<3x1x32xf32, #tpu.memory_space<vmem>>, vector<1x1x32xf32>
    %374 = vector.shape_cast %373 : vector<1x1x32xf32> to vector<1x32xf32>
    %cst_149 = arith.constant dense<0.000000e+00> : vector<24xf32>
    %375 = vector.multi_reduction <add>, %370, %cst_149 [1] : vector<24x32xf32> to vector<24xf32>
    %376 = vector.shape_cast %375 : vector<24xf32> to vector<24x1xf32>
    %cst_150 = arith.constant 3.200000e+01 : f32
    %377 = vector.broadcast %cst_150 : f32 to vector<24x1xf32>
    %378 = arith.divf %376, %377 : vector<24x1xf32>
    %379 = vector.broadcast %378 : vector<24x1xf32> to vector<24x32xf32>
    %380 = arith.subf %370, %379 : vector<24x32xf32>
    %381 = arith.mulf %380, %380 : vector<24x32xf32>
    %cst_151 = arith.constant dense<0.000000e+00> : vector<24xf32>
    %382 = vector.multi_reduction <add>, %381, %cst_151 [1] : vector<24x32xf32> to vector<24xf32>
    %383 = vector.shape_cast %382 : vector<24xf32> to vector<24x1xf32>
    %cst_152 = arith.constant 3.200000e+01 : f32
    %384 = vector.broadcast %cst_152 : f32 to vector<24x1xf32>
    %385 = arith.divf %383, %384 : vector<24x1xf32>
    %386 = vector.broadcast %378 : vector<24x1xf32> to vector<24x32xf32>
    %387 = arith.subf %370, %386 : vector<24x32xf32>
    %cst_153 = arith.constant 9.99999974E-6 : f32
    %388 = vector.broadcast %cst_153 : f32 to vector<24x1xf32>
    %389 = arith.addf %385, %388 : vector<24x1xf32>
    %390 = math.rsqrt %389 : vector<24x1xf32>
    %391 = vector.broadcast %390 : vector<24x1xf32> to vector<24x32xf32>
    %392 = arith.mulf %387, %391 : vector<24x32xf32>
    %393 = vector.broadcast %372 : vector<1x32xf32> to vector<24x32xf32>
    %394 = arith.mulf %392, %393 : vector<24x32xf32>
    %395 = vector.broadcast %374 : vector<1x32xf32> to vector<24x32xf32>
    %396 = arith.addf %394, %395 : vector<24x32xf32>
    %397 = arith.truncf %396 : vector<24x32xf32> to vector<24x32xbf16>
    %c1_154 = arith.constant 1 : index
    %c0_155 = arith.constant 0 : index
    %c0_156 = arith.constant 0 : index
    %398 = vector.load %arg16[%c1_154, %c0_155, %c0_156] : memref<3x32x128xbf16, #tpu.memory_space<vmem>>, vector<1x32x128xbf16>
    %399 = vector.shape_cast %398 : vector<1x32x128xbf16> to vector<32x128xbf16>
    %cst_157 = arith.constant dense<0.000000e+00> : vector<24x128xf32>
    %400 = tpu.matmul %397, %399, %cst_157 {dimension_numbers = #tpu.dot_dimension_numbers<[1], [0], [0], [1], [0, 0, 1, 1], [], []>} : vector<24x32xbf16>, vector<32x128xbf16>, vector<24x128xf32> -> vector<24x128xf32>
    %c1_158 = arith.constant 1 : index
    %c0_159 = arith.constant 0 : index
    %c0_160 = arith.constant 0 : index
    %401 = vector.load %arg17[%c1_158, %c0_159, %c0_160] : memref<3x1x128xf32, #tpu.memory_space<vmem>>, vector<1x1x128xf32>
    %402 = vector.shape_cast %401 : vector<1x1x128xf32> to vector<1x128xf32>
    %403 = vector.broadcast %402 : vector<1x128xf32> to vector<24x128xf32>
    %404 = arith.addf %400, %403 : vector<24x128xf32>
    %cst_161 = arith.constant 1.702000e+00 : f32
    %405 = vector.broadcast %cst_161 : f32 to vector<24x128xf32>
    %406 = arith.mulf %405, %404 : vector<24x128xf32>
    %407 = arith.negf %406 : vector<24x128xf32>
    %408 = math.exp %407 : vector<24x128xf32>
    %cst_162 = arith.constant 1.000000e+00 : f32
    %409 = vector.broadcast %cst_162 : f32 to vector<24x128xf32>
    %410 = arith.addf %409, %408 : vector<24x128xf32>
    %411 = arith.divf %409, %410 : vector<24x128xf32>
    %412 = arith.mulf %404, %411 : vector<24x128xf32>
    %413 = arith.truncf %412 : vector<24x128xf32> to vector<24x128xbf16>
    %c1_163 = arith.constant 1 : index
    %c0_164 = arith.constant 0 : index
    %c0_165 = arith.constant 0 : index
    %414 = vector.load %arg18[%c1_163, %c0_164, %c0_165] : memref<3x128x32xbf16, #tpu.memory_space<vmem>>, vector<1x128x32xbf16>
    %415 = vector.shape_cast %414 : vector<1x128x32xbf16> to vector<128x32xbf16>
    %cst_166 = arith.constant dense<0.000000e+00> : vector<24x32xf32>
    %416 = tpu.matmul %413, %415, %cst_166 {dimension_numbers = #tpu.dot_dimension_numbers<[1], [0], [0], [1], [0, 0, 1, 1], [], []>} : vector<24x128xbf16>, vector<128x32xbf16>, vector<24x32xf32> -> vector<24x32xf32>
    %c1_167 = arith.constant 1 : index
    %c0_168 = arith.constant 0 : index
    %c0_169 = arith.constant 0 : index
    %417 = vector.load %arg19[%c1_167, %c0_168, %c0_169] : memref<3x1x32xf32, #tpu.memory_space<vmem>>, vector<1x1x32xf32>
    %418 = vector.shape_cast %417 : vector<1x1x32xf32> to vector<1x32xf32>
    %419 = vector.broadcast %418 : vector<1x32xf32> to vector<24x32xf32>
    %420 = arith.addf %416, %419 : vector<24x32xf32>
    %421 = arith.addf %370, %420 : vector<24x32xf32>
    %422 = arith.mulf %421, %68 : vector<24x32xf32>
    %c2 = arith.constant 2 : index
    %c0_170 = arith.constant 0 : index
    %c0_171 = arith.constant 0 : index
    %423 = vector.load %arg8[%c2, %c0_170, %c0_171] : memref<3x1x32xf32, #tpu.memory_space<vmem>>, vector<1x1x32xf32>
    %424 = vector.shape_cast %423 : vector<1x1x32xf32> to vector<1x32xf32>
    %c2_172 = arith.constant 2 : index
    %c0_173 = arith.constant 0 : index
    %c0_174 = arith.constant 0 : index
    %425 = vector.load %arg9[%c2_172, %c0_173, %c0_174] : memref<3x1x32xf32, #tpu.memory_space<vmem>>, vector<1x1x32xf32>
    %426 = vector.shape_cast %425 : vector<1x1x32xf32> to vector<1x32xf32>
    %cst_175 = arith.constant dense<0.000000e+00> : vector<24xf32>
    %427 = vector.multi_reduction <add>, %422, %cst_175 [1] : vector<24x32xf32> to vector<24xf32>
    %428 = vector.shape_cast %427 : vector<24xf32> to vector<24x1xf32>
    %cst_176 = arith.constant 3.200000e+01 : f32
    %429 = vector.broadcast %cst_176 : f32 to vector<24x1xf32>
    %430 = arith.divf %428, %429 : vector<24x1xf32>
    %431 = vector.broadcast %430 : vector<24x1xf32> to vector<24x32xf32>
    %432 = arith.subf %422, %431 : vector<24x32xf32>
    %433 = arith.mulf %432, %432 : vector<24x32xf32>
    %cst_177 = arith.constant dense<0.000000e+00> : vector<24xf32>
    %434 = vector.multi_reduction <add>, %433, %cst_177 [1] : vector<24x32xf32> to vector<24xf32>
    %435 = vector.shape_cast %434 : vector<24xf32> to vector<24x1xf32>
    %cst_178 = arith.constant 3.200000e+01 : f32
    %436 = vector.broadcast %cst_178 : f32 to vector<24x1xf32>
    %437 = arith.divf %435, %436 : vector<24x1xf32>
    %438 = vector.broadcast %430 : vector<24x1xf32> to vector<24x32xf32>
    %439 = arith.subf %422, %438 : vector<24x32xf32>
    %cst_179 = arith.constant 9.99999974E-6 : f32
    %440 = vector.broadcast %cst_179 : f32 to vector<24x1xf32>
    %441 = arith.addf %437, %440 : vector<24x1xf32>
    %442 = math.rsqrt %441 : vector<24x1xf32>
    %443 = vector.broadcast %442 : vector<24x1xf32> to vector<24x32xf32>
    %444 = arith.mulf %439, %443 : vector<24x32xf32>
    %445 = vector.broadcast %424 : vector<1x32xf32> to vector<24x32xf32>
    %446 = arith.mulf %444, %445 : vector<24x32xf32>
    %447 = vector.broadcast %426 : vector<1x32xf32> to vector<24x32xf32>
    %448 = arith.addf %446, %447 : vector<24x32xf32>
    %449 = arith.truncf %448 : vector<24x32xf32> to vector<24x32xbf16>
    %c2_180 = arith.constant 2 : index
    %c0_181 = arith.constant 0 : index
    %c0_182 = arith.constant 0 : index
    %450 = vector.load %arg10[%c2_180, %c0_181, %c0_182] : memref<3x32x96xbf16, #tpu.memory_space<vmem>>, vector<1x32x96xbf16>
    %451 = vector.shape_cast %450 : vector<1x32x96xbf16> to vector<32x96xbf16>
    %cst_183 = arith.constant dense<0.000000e+00> : vector<24x96xf32>
    %452 = tpu.matmul %449, %451, %cst_183 {dimension_numbers = #tpu.dot_dimension_numbers<[1], [0], [0], [1], [0, 0, 1, 1], [], []>} : vector<24x32xbf16>, vector<32x96xbf16>, vector<24x96xf32> -> vector<24x96xf32>
    %c2_184 = arith.constant 2 : index
    %c0_185 = arith.constant 0 : index
    %c0_186 = arith.constant 0 : index
    %453 = vector.load %arg11[%c2_184, %c0_185, %c0_186] : memref<3x1x96xf32, #tpu.memory_space<vmem>>, vector<1x1x96xf32>
    %454 = vector.shape_cast %453 : vector<1x1x96xf32> to vector<1x96xf32>
    %455 = vector.broadcast %454 : vector<1x96xf32> to vector<24x96xf32>
    %456 = arith.addf %452, %455 : vector<24x96xf32>
    %457 = vector.extract_strided_slice %456 {offsets = [0, 0], sizes = [24, 32], strides = [1, 1]} : vector<24x96xf32> to vector<24x32xf32>
    %cst_187 = arith.constant 0.353553385 : f32
    %458 = vector.broadcast %cst_187 : f32 to vector<24x32xf32>
    %459 = arith.mulf %457, %458 : vector<24x32xf32>
    %460 = arith.truncf %459 : vector<24x32xf32> to vector<24x32xbf16>
    %461 = vector.extract_strided_slice %456 {offsets = [0, 32], sizes = [24, 32], strides = [1, 1]} : vector<24x96xf32> to vector<24x32xf32>
    %462 = arith.truncf %461 : vector<24x32xf32> to vector<24x32xbf16>
    %463 = vector.extract_strided_slice %456 {offsets = [0, 64], sizes = [24, 32], strides = [1, 1]} : vector<24x96xf32> to vector<24x32xf32>
    %464 = arith.truncf %463 : vector<24x32xf32> to vector<24x32xbf16>
    %465 = vector.extract_strided_slice %460 {offsets = [0, 0], sizes = [24, 8], strides = [1, 1]} : vector<24x32xbf16> to vector<24x8xbf16>
    %466 = vector.extract_strided_slice %462 {offsets = [0, 0], sizes = [24, 8], strides = [1, 1]} : vector<24x32xbf16> to vector<24x8xbf16>
    %cst_188 = arith.constant dense<0.000000e+00> : vector<24x24xf32>
    %467 = tpu.matmul %465, %466, %cst_188 {dimension_numbers = #tpu.dot_dimension_numbers<[1], [1], [0], [0], [0, 0, 1, 0], [], []>} : vector<24x8xbf16>, vector<24x8xbf16>, vector<24x24xf32> -> vector<24x24xf32>
    %468 = vector.broadcast %66 : vector<1x24xf32> to vector<24x24xf32>
    %469 = arith.addf %467, %468 : vector<24x24xf32>
    %cst_189 = arith.constant dense<0xFF800000> : vector<24xf32>
    %470 = vector.multi_reduction <maximumf>, %469, %cst_189 [1] : vector<24x24xf32> to vector<24xf32>
    %471 = vector.shape_cast %470 : vector<24xf32> to vector<24x1xf32>
    %472 = vector.broadcast %471 : vector<24x1xf32> to vector<24x24xf32>
    %473 = arith.subf %469, %472 : vector<24x24xf32>
    %474 = math.exp %473 : vector<24x24xf32>
    %cst_190 = arith.constant dense<0.000000e+00> : vector<24xf32>
    %475 = vector.multi_reduction <add>, %474, %cst_190 [1] : vector<24x24xf32> to vector<24xf32>
    %476 = vector.shape_cast %475 : vector<24xf32> to vector<24x1xf32>
    %477 = tpu.reciprocal %476 {approx = true} : vector<24x1xf32> -> vector<24x1xf32>
    %478 = vector.broadcast %477 : vector<24x1xf32> to vector<24x24xf32>
    %479 = arith.mulf %474, %478 : vector<24x24xf32>
    %480 = arith.truncf %479 : vector<24x24xf32> to vector<24x24xbf16>
    %481 = vector.extract_strided_slice %464 {offsets = [0, 0], sizes = [24, 8], strides = [1, 1]} : vector<24x32xbf16> to vector<24x8xbf16>
    %cst_191 = arith.constant dense<0.000000e+00> : vector<24x8xf32>
    %482 = tpu.matmul %480, %481, %cst_191 {dimension_numbers = #tpu.dot_dimension_numbers<[1], [0], [0], [1], [0, 0, 1, 1], [], []>} : vector<24x24xbf16>, vector<24x8xbf16>, vector<24x8xf32> -> vector<24x8xf32>
    %483 = vector.extract_strided_slice %460 {offsets = [0, 8], sizes = [24, 8], strides = [1, 1]} : vector<24x32xbf16> to vector<24x8xbf16>
    %484 = vector.extract_strided_slice %462 {offsets = [0, 8], sizes = [24, 8], strides = [1, 1]} : vector<24x32xbf16> to vector<24x8xbf16>
    %cst_192 = arith.constant dense<0.000000e+00> : vector<24x24xf32>
    %485 = tpu.matmul %483, %484, %cst_192 {dimension_numbers = #tpu.dot_dimension_numbers<[1], [1], [0], [0], [0, 0, 1, 0], [], []>} : vector<24x8xbf16>, vector<24x8xbf16>, vector<24x24xf32> -> vector<24x24xf32>
    %486 = vector.broadcast %66 : vector<1x24xf32> to vector<24x24xf32>
    %487 = arith.addf %485, %486 : vector<24x24xf32>
    %cst_193 = arith.constant dense<0xFF800000> : vector<24xf32>
    %488 = vector.multi_reduction <maximumf>, %487, %cst_193 [1] : vector<24x24xf32> to vector<24xf32>
    %489 = vector.shape_cast %488 : vector<24xf32> to vector<24x1xf32>
    %490 = vector.broadcast %489 : vector<24x1xf32> to vector<24x24xf32>
    %491 = arith.subf %487, %490 : vector<24x24xf32>
    %492 = math.exp %491 : vector<24x24xf32>
    %cst_194 = arith.constant dense<0.000000e+00> : vector<24xf32>
    %493 = vector.multi_reduction <add>, %492, %cst_194 [1] : vector<24x24xf32> to vector<24xf32>
    %494 = vector.shape_cast %493 : vector<24xf32> to vector<24x1xf32>
    %495 = tpu.reciprocal %494 {approx = true} : vector<24x1xf32> -> vector<24x1xf32>
    %496 = vector.broadcast %495 : vector<24x1xf32> to vector<24x24xf32>
    %497 = arith.mulf %492, %496 : vector<24x24xf32>
    %498 = arith.truncf %497 : vector<24x24xf32> to vector<24x24xbf16>
    %499 = vector.extract_strided_slice %464 {offsets = [0, 8], sizes = [24, 8], strides = [1, 1]} : vector<24x32xbf16> to vector<24x8xbf16>
    %cst_195 = arith.constant dense<0.000000e+00> : vector<24x8xf32>
    %500 = tpu.matmul %498, %499, %cst_195 {dimension_numbers = #tpu.dot_dimension_numbers<[1], [0], [0], [1], [0, 0, 1, 1], [], []>} : vector<24x24xbf16>, vector<24x8xbf16>, vector<24x8xf32> -> vector<24x8xf32>
    %501 = vector.extract_strided_slice %460 {offsets = [0, 16], sizes = [24, 8], strides = [1, 1]} : vector<24x32xbf16> to vector<24x8xbf16>
    %502 = vector.extract_strided_slice %462 {offsets = [0, 16], sizes = [24, 8], strides = [1, 1]} : vector<24x32xbf16> to vector<24x8xbf16>
    %cst_196 = arith.constant dense<0.000000e+00> : vector<24x24xf32>
    %503 = tpu.matmul %501, %502, %cst_196 {dimension_numbers = #tpu.dot_dimension_numbers<[1], [1], [0], [0], [0, 0, 1, 0], [], []>} : vector<24x8xbf16>, vector<24x8xbf16>, vector<24x24xf32> -> vector<24x24xf32>
    %504 = vector.broadcast %66 : vector<1x24xf32> to vector<24x24xf32>
    %505 = arith.addf %503, %504 : vector<24x24xf32>
    %cst_197 = arith.constant dense<0xFF800000> : vector<24xf32>
    %506 = vector.multi_reduction <maximumf>, %505, %cst_197 [1] : vector<24x24xf32> to vector<24xf32>
    %507 = vector.shape_cast %506 : vector<24xf32> to vector<24x1xf32>
    %508 = vector.broadcast %507 : vector<24x1xf32> to vector<24x24xf32>
    %509 = arith.subf %505, %508 : vector<24x24xf32>
    %510 = math.exp %509 : vector<24x24xf32>
    %cst_198 = arith.constant dense<0.000000e+00> : vector<24xf32>
    %511 = vector.multi_reduction <add>, %510, %cst_198 [1] : vector<24x24xf32> to vector<24xf32>
    %512 = vector.shape_cast %511 : vector<24xf32> to vector<24x1xf32>
    %513 = tpu.reciprocal %512 {approx = true} : vector<24x1xf32> -> vector<24x1xf32>
    %514 = vector.broadcast %513 : vector<24x1xf32> to vector<24x24xf32>
    %515 = arith.mulf %510, %514 : vector<24x24xf32>
    %516 = arith.truncf %515 : vector<24x24xf32> to vector<24x24xbf16>
    %517 = vector.extract_strided_slice %464 {offsets = [0, 16], sizes = [24, 8], strides = [1, 1]} : vector<24x32xbf16> to vector<24x8xbf16>
    %cst_199 = arith.constant dense<0.000000e+00> : vector<24x8xf32>
    %518 = tpu.matmul %516, %517, %cst_199 {dimension_numbers = #tpu.dot_dimension_numbers<[1], [0], [0], [1], [0, 0, 1, 1], [], []>} : vector<24x24xbf16>, vector<24x8xbf16>, vector<24x8xf32> -> vector<24x8xf32>
    %519 = vector.extract_strided_slice %460 {offsets = [0, 24], sizes = [24, 8], strides = [1, 1]} : vector<24x32xbf16> to vector<24x8xbf16>
    %520 = vector.extract_strided_slice %462 {offsets = [0, 24], sizes = [24, 8], strides = [1, 1]} : vector<24x32xbf16> to vector<24x8xbf16>
    %cst_200 = arith.constant dense<0.000000e+00> : vector<24x24xf32>
    %521 = tpu.matmul %519, %520, %cst_200 {dimension_numbers = #tpu.dot_dimension_numbers<[1], [1], [0], [0], [0, 0, 1, 0], [], []>} : vector<24x8xbf16>, vector<24x8xbf16>, vector<24x24xf32> -> vector<24x24xf32>
    %522 = vector.broadcast %66 : vector<1x24xf32> to vector<24x24xf32>
    %523 = arith.addf %521, %522 : vector<24x24xf32>
    %cst_201 = arith.constant dense<0xFF800000> : vector<24xf32>
    %524 = vector.multi_reduction <maximumf>, %523, %cst_201 [1] : vector<24x24xf32> to vector<24xf32>
    %525 = vector.shape_cast %524 : vector<24xf32> to vector<24x1xf32>
    %526 = vector.broadcast %525 : vector<24x1xf32> to vector<24x24xf32>
    %527 = arith.subf %523, %526 : vector<24x24xf32>
    %528 = math.exp %527 : vector<24x24xf32>
    %cst_202 = arith.constant dense<0.000000e+00> : vector<24xf32>
    %529 = vector.multi_reduction <add>, %528, %cst_202 [1] : vector<24x24xf32> to vector<24xf32>
    %530 = vector.shape_cast %529 : vector<24xf32> to vector<24x1xf32>
    %531 = tpu.reciprocal %530 {approx = true} : vector<24x1xf32> -> vector<24x1xf32>
    %532 = vector.broadcast %531 : vector<24x1xf32> to vector<24x24xf32>
    %533 = arith.mulf %528, %532 : vector<24x24xf32>
    %534 = arith.truncf %533 : vector<24x24xf32> to vector<24x24xbf16>
    %535 = vector.extract_strided_slice %464 {offsets = [0, 24], sizes = [24, 8], strides = [1, 1]} : vector<24x32xbf16> to vector<24x8xbf16>
    %cst_203 = arith.constant dense<0.000000e+00> : vector<24x8xf32>
    %536 = tpu.matmul %534, %535, %cst_203 {dimension_numbers = #tpu.dot_dimension_numbers<[1], [0], [0], [1], [0, 0, 1, 1], [], []>} : vector<24x24xbf16>, vector<24x8xbf16>, vector<24x8xf32> -> vector<24x8xf32>
    %537 = tpu.concatenate %482, %500, %518, %536 in 1 : vector<24x8xf32>, vector<24x8xf32>, vector<24x8xf32>, vector<24x8xf32> -> vector<24x32xf32>
    %538 = arith.truncf %537 : vector<24x32xf32> to vector<24x32xbf16>
    %c2_204 = arith.constant 2 : index
    %c0_205 = arith.constant 0 : index
    %c0_206 = arith.constant 0 : index
    %539 = vector.load %arg12[%c2_204, %c0_205, %c0_206] : memref<3x32x32xbf16, #tpu.memory_space<vmem>>, vector<1x32x32xbf16>
    %540 = vector.shape_cast %539 : vector<1x32x32xbf16> to vector<32x32xbf16>
    %cst_207 = arith.constant dense<0.000000e+00> : vector<24x32xf32>
    %541 = tpu.matmul %538, %540, %cst_207 {dimension_numbers = #tpu.dot_dimension_numbers<[1], [0], [0], [1], [0, 0, 1, 1], [], []>} : vector<24x32xbf16>, vector<32x32xbf16>, vector<24x32xf32> -> vector<24x32xf32>
    %c2_208 = arith.constant 2 : index
    %c0_209 = arith.constant 0 : index
    %c0_210 = arith.constant 0 : index
    %542 = vector.load %arg13[%c2_208, %c0_209, %c0_210] : memref<3x1x32xf32, #tpu.memory_space<vmem>>, vector<1x1x32xf32>
    %543 = vector.shape_cast %542 : vector<1x1x32xf32> to vector<1x32xf32>
    %544 = vector.broadcast %543 : vector<1x32xf32> to vector<24x32xf32>
    %545 = arith.addf %541, %544 : vector<24x32xf32>
    %546 = arith.addf %422, %545 : vector<24x32xf32>
    %c2_211 = arith.constant 2 : index
    %c0_212 = arith.constant 0 : index
    %c0_213 = arith.constant 0 : index
    %547 = vector.load %arg14[%c2_211, %c0_212, %c0_213] : memref<3x1x32xf32, #tpu.memory_space<vmem>>, vector<1x1x32xf32>
    %548 = vector.shape_cast %547 : vector<1x1x32xf32> to vector<1x32xf32>
    %c2_214 = arith.constant 2 : index
    %c0_215 = arith.constant 0 : index
    %c0_216 = arith.constant 0 : index
    %549 = vector.load %arg15[%c2_214, %c0_215, %c0_216] : memref<3x1x32xf32, #tpu.memory_space<vmem>>, vector<1x1x32xf32>
    %550 = vector.shape_cast %549 : vector<1x1x32xf32> to vector<1x32xf32>
    %cst_217 = arith.constant dense<0.000000e+00> : vector<24xf32>
    %551 = vector.multi_reduction <add>, %546, %cst_217 [1] : vector<24x32xf32> to vector<24xf32>
    %552 = vector.shape_cast %551 : vector<24xf32> to vector<24x1xf32>
    %cst_218 = arith.constant 3.200000e+01 : f32
    %553 = vector.broadcast %cst_218 : f32 to vector<24x1xf32>
    %554 = arith.divf %552, %553 : vector<24x1xf32>
    %555 = vector.broadcast %554 : vector<24x1xf32> to vector<24x32xf32>
    %556 = arith.subf %546, %555 : vector<24x32xf32>
    %557 = arith.mulf %556, %556 : vector<24x32xf32>
    %cst_219 = arith.constant dense<0.000000e+00> : vector<24xf32>
    %558 = vector.multi_reduction <add>, %557, %cst_219 [1] : vector<24x32xf32> to vector<24xf32>
    %559 = vector.shape_cast %558 : vector<24xf32> to vector<24x1xf32>
    %cst_220 = arith.constant 3.200000e+01 : f32
    %560 = vector.broadcast %cst_220 : f32 to vector<24x1xf32>
    %561 = arith.divf %559, %560 : vector<24x1xf32>
    %562 = vector.broadcast %554 : vector<24x1xf32> to vector<24x32xf32>
    %563 = arith.subf %546, %562 : vector<24x32xf32>
    %cst_221 = arith.constant 9.99999974E-6 : f32
    %564 = vector.broadcast %cst_221 : f32 to vector<24x1xf32>
    %565 = arith.addf %561, %564 : vector<24x1xf32>
    %566 = math.rsqrt %565 : vector<24x1xf32>
    %567 = vector.broadcast %566 : vector<24x1xf32> to vector<24x32xf32>
    %568 = arith.mulf %563, %567 : vector<24x32xf32>
    %569 = vector.broadcast %548 : vector<1x32xf32> to vector<24x32xf32>
    %570 = arith.mulf %568, %569 : vector<24x32xf32>
    %571 = vector.broadcast %550 : vector<1x32xf32> to vector<24x32xf32>
    %572 = arith.addf %570, %571 : vector<24x32xf32>
    %573 = arith.truncf %572 : vector<24x32xf32> to vector<24x32xbf16>
    %c2_222 = arith.constant 2 : index
    %c0_223 = arith.constant 0 : index
    %c0_224 = arith.constant 0 : index
    %574 = vector.load %arg16[%c2_222, %c0_223, %c0_224] : memref<3x32x128xbf16, #tpu.memory_space<vmem>>, vector<1x32x128xbf16>
    %575 = vector.shape_cast %574 : vector<1x32x128xbf16> to vector<32x128xbf16>
    %cst_225 = arith.constant dense<0.000000e+00> : vector<24x128xf32>
    %576 = tpu.matmul %573, %575, %cst_225 {dimension_numbers = #tpu.dot_dimension_numbers<[1], [0], [0], [1], [0, 0, 1, 1], [], []>} : vector<24x32xbf16>, vector<32x128xbf16>, vector<24x128xf32> -> vector<24x128xf32>
    %c2_226 = arith.constant 2 : index
    %c0_227 = arith.constant 0 : index
    %c0_228 = arith.constant 0 : index
    %577 = vector.load %arg17[%c2_226, %c0_227, %c0_228] : memref<3x1x128xf32, #tpu.memory_space<vmem>>, vector<1x1x128xf32>
    %578 = vector.shape_cast %577 : vector<1x1x128xf32> to vector<1x128xf32>
    %579 = vector.broadcast %578 : vector<1x128xf32> to vector<24x128xf32>
    %580 = arith.addf %576, %579 : vector<24x128xf32>
    %cst_229 = arith.constant 1.702000e+00 : f32
    %581 = vector.broadcast %cst_229 : f32 to vector<24x128xf32>
    %582 = arith.mulf %581, %580 : vector<24x128xf32>
    %583 = arith.negf %582 : vector<24x128xf32>
    %584 = math.exp %583 : vector<24x128xf32>
    %cst_230 = arith.constant 1.000000e+00 : f32
    %585 = vector.broadcast %cst_230 : f32 to vector<24x128xf32>
    %586 = arith.addf %585, %584 : vector<24x128xf32>
    %587 = arith.divf %585, %586 : vector<24x128xf32>
    %588 = arith.mulf %580, %587 : vector<24x128xf32>
    %589 = arith.truncf %588 : vector<24x128xf32> to vector<24x128xbf16>
    %c2_231 = arith.constant 2 : index
    %c0_232 = arith.constant 0 : index
    %c0_233 = arith.constant 0 : index
    %590 = vector.load %arg18[%c2_231, %c0_232, %c0_233] : memref<3x128x32xbf16, #tpu.memory_space<vmem>>, vector<1x128x32xbf16>
    %591 = vector.shape_cast %590 : vector<1x128x32xbf16> to vector<128x32xbf16>
    %cst_234 = arith.constant dense<0.000000e+00> : vector<24x32xf32>
    %592 = tpu.matmul %589, %591, %cst_234 {dimension_numbers = #tpu.dot_dimension_numbers<[1], [0], [0], [1], [0, 0, 1, 1], [], []>} : vector<24x128xbf16>, vector<128x32xbf16>, vector<24x32xf32> -> vector<24x32xf32>
    %c2_235 = arith.constant 2 : index
    %c0_236 = arith.constant 0 : index
    %c0_237 = arith.constant 0 : index
    %593 = vector.load %arg19[%c2_235, %c0_236, %c0_237] : memref<3x1x32xf32, #tpu.memory_space<vmem>>, vector<1x1x32xf32>
    %594 = vector.shape_cast %593 : vector<1x1x32xf32> to vector<1x32xf32>
    %595 = vector.broadcast %594 : vector<1x32xf32> to vector<24x32xf32>
    %596 = arith.addf %592, %595 : vector<24x32xf32>
    %597 = arith.addf %546, %596 : vector<24x32xf32>
    %598 = vector.extract_strided_slice %597 {offsets = [0, 0], sizes = [1, 32], strides = [1, 1]} : vector<24x32xf32> to vector<1x32xf32>
    %c0_238 = arith.constant 0 : index
    %c0_239 = arith.constant 0 : index
    %599 = vector.load %arg20[%c0_238, %c0_239] : memref<1x32xf32, #tpu.memory_space<vmem>>, vector<1x32xf32>
    %c0_240 = arith.constant 0 : index
    %c0_241 = arith.constant 0 : index
    %600 = vector.load %arg21[%c0_240, %c0_241] : memref<1x32xf32, #tpu.memory_space<vmem>>, vector<1x32xf32>
    %cst_242 = arith.constant dense<0.000000e+00> : vector<1xf32>
    %601 = vector.multi_reduction <add>, %598, %cst_242 [1] : vector<1x32xf32> to vector<1xf32>
    %602 = vector.shape_cast %601 : vector<1xf32> to vector<1x1xf32>
    %cst_243 = arith.constant 3.200000e+01 : f32
    %603 = vector.broadcast %cst_243 : f32 to vector<1x1xf32>
    %604 = arith.divf %602, %603 : vector<1x1xf32>
    %605 = vector.broadcast %604 : vector<1x1xf32> to vector<1x32xf32>
    %606 = arith.subf %598, %605 : vector<1x32xf32>
    %607 = arith.mulf %606, %606 : vector<1x32xf32>
    %cst_244 = arith.constant dense<0.000000e+00> : vector<1xf32>
    %608 = vector.multi_reduction <add>, %607, %cst_244 [1] : vector<1x32xf32> to vector<1xf32>
    %609 = vector.shape_cast %608 : vector<1xf32> to vector<1x1xf32>
    %cst_245 = arith.constant 3.200000e+01 : f32
    %610 = vector.broadcast %cst_245 : f32 to vector<1x1xf32>
    %611 = arith.divf %609, %610 : vector<1x1xf32>
    %612 = vector.broadcast %604 : vector<1x1xf32> to vector<1x32xf32>
    %613 = arith.subf %598, %612 : vector<1x32xf32>
    %cst_246 = arith.constant 9.99999974E-6 : f32
    %614 = vector.broadcast %cst_246 : f32 to vector<1x1xf32>
    %615 = arith.addf %611, %614 : vector<1x1xf32>
    %616 = math.rsqrt %615 : vector<1x1xf32>
    %617 = vector.broadcast %616 : vector<1x1xf32> to vector<1x32xf32>
    %618 = arith.mulf %613, %617 : vector<1x32xf32>
    %619 = arith.mulf %618, %599 : vector<1x32xf32>
    %620 = arith.addf %619, %600 : vector<1x32xf32>
    %621 = arith.truncf %620 : vector<1x32xf32> to vector<1x32xbf16>
    %c0_247 = arith.constant 0 : index
    %c0_248 = arith.constant 0 : index
    %622 = vector.load %arg22[%c0_247, %c0_248] : memref<32x16xbf16, #tpu.memory_space<vmem>>, vector<32x16xbf16>
    %cst_249 = arith.constant dense<0.000000e+00> : vector<1x16xf32>
    %623 = tpu.matmul %621, %622, %cst_249 {dimension_numbers = #tpu.dot_dimension_numbers<[1], [0], [0], [1], [0, 0, 1, 1], [], []>} : vector<1x32xbf16>, vector<32x16xbf16>, vector<1x16xf32> -> vector<1x16xf32>
    %624 = arith.truncf %623 : vector<1x16xf32> to vector<1x16xbf16>
    %c0_250 = arith.constant 0 : index
    %c0_251 = arith.constant 0 : index
    %625 = vector.load %arg23[%c0_250, %c0_251] : memref<16x32xbf16, #tpu.memory_space<vmem>>, vector<16x32xbf16>
    %cst_252 = arith.constant dense<0.000000e+00> : vector<1x32xf32>
    %626 = tpu.matmul %624, %625, %cst_252 {dimension_numbers = #tpu.dot_dimension_numbers<[1], [0], [0], [1], [0, 0, 1, 1], [], []>} : vector<1x16xbf16>, vector<16x32xbf16>, vector<1x32xf32> -> vector<1x32xf32>
    %c0_253 = arith.constant 0 : index
    %c0_254 = arith.constant 0 : index
    %627 = vector.load %arg24[%c0_253, %c0_254] : memref<1x32xf32, #tpu.memory_space<vmem>>, vector<1x32xf32>
    %628 = arith.addf %626, %627 : vector<1x32xf32>
    %cst_255 = arith.constant 0.000000e+00 : f32
    %629 = vector.broadcast %cst_255 : f32 to vector<1x32xf32>
    %630 = arith.maximumf %628, %629 : vector<1x32xf32>
    %631 = arith.truncf %630 : vector<1x32xf32> to vector<1x32xbf16>
    %c0_256 = arith.constant 0 : index
    %c0_257 = arith.constant 0 : index
    %632 = vector.load %arg25[%c0_256, %c0_257] : memref<32x16xbf16, #tpu.memory_space<vmem>>, vector<32x16xbf16>
    %cst_258 = arith.constant dense<0.000000e+00> : vector<1x16xf32>
    %633 = tpu.matmul %631, %632, %cst_258 {dimension_numbers = #tpu.dot_dimension_numbers<[1], [0], [0], [1], [0, 0, 1, 1], [], []>} : vector<1x32xbf16>, vector<32x16xbf16>, vector<1x16xf32> -> vector<1x16xf32>
    %c0_259 = arith.constant 0 : index
    %c0_260 = arith.constant 0 : index
    %634 = vector.load %arg26[%c0_259, %c0_260] : memref<1x16xf32, #tpu.memory_space<vmem>>, vector<1x16xf32>
    %635 = arith.addf %633, %634 : vector<1x16xf32>
    %c0_261 = arith.constant 0 : index
    %c0_262 = arith.constant 0 : index
    %c0_263 = arith.constant 0 : index
    %636 = vector.load %arg27[%c0_261, %c0_262, %c0_263] : memref<1x1x16xf32, #tpu.memory_space<vmem>>, vector<1x1x16xf32>
    %637 = vector.shape_cast %636 : vector<1x1x16xf32> to vector<1x16xf32>
    %638 = vector.shape_cast %635 : vector<1x16xf32> to vector<1x1x16xf32>
    tpu.vector_store %arg27[%c0_261, %c0_262, %c0_263], %638 {strides = array<i32>} : memref<1x1x16xf32, #tpu.memory_space<vmem>>, vector<1x1x16xf32>,
    return
  }
  func.func @transform_0(%arg0: i32) -> (i32, i32, i32) {
    %c0_i32 = arith.constant 0 : i32
    %c0_i32_0 = arith.constant 0 : i32
    %c0_i32_1 = arith.constant 0 : i32
    return %arg0, %c0_i32, %c0_i32_0 : i32, i32, i32
  }
  func.func @transform_1(%arg0: i32) -> (i32, i32, i32) {
    %c0_i32 = arith.constant 0 : i32
    %c0_i32_0 = arith.constant 0 : i32
    %c0_i32_1 = arith.constant 0 : i32
    return %arg0, %c0_i32, %c0_i32_0 : i32, i32, i32
  }
  func.func @transform_2(%arg0: i32) -> (i32, i32) {
    %c0_i32 = arith.constant 0 : i32
    %c0_i32_0 = arith.constant 0 : i32
    %c0_i32_1 = arith.constant 0 : i32
    return %c0_i32, %c0_i32_0 : i32, i32
  }
  func.func @transform_3(%arg0: i32) -> (i32, i32) {
    %c0_i32 = arith.constant 0 : i32
    %c0_i32_0 = arith.constant 0 : i32
    %c0_i32_1 = arith.constant 0 : i32
    return %c0_i32, %c0_i32_0 : i32, i32
  }
  func.func @transform_4(%arg0: i32) -> (i32, i32) {
    %c0_i32 = arith.constant 0 : i32
    %c0_i32_0 = arith.constant 0 : i32
    %c0_i32_1 = arith.constant 0 : i32
    return %c0_i32, %c0_i32_0 : i32, i32
  }
  func.func @transform_5(%arg0: i32) -> (i32, i32) {
    %c0_i32 = arith.constant 0 : i32
    %c0_i32_0 = arith.constant 0 : i32
    %c0_i32_1 = arith.constant 0 : i32
    return %c0_i32, %c0_i32_0 : i32, i32
  }
  func.func @transform_6(%arg0: i32) -> (i32, i32) {
    %c0_i32 = arith.constant 0 : i32
    %c0_i32_0 = arith.constant 0 : i32
    %c0_i32_1 = arith.constant 0 : i32
    return %c0_i32, %c0_i32_0 : i32, i32
  }
  func.func @transform_7(%arg0: i32) -> (i32, i32, i32) {
    %c0_i32 = arith.constant 0 : i32
    %c0_i32_0 = arith.constant 0 : i32
    %c0_i32_1 = arith.constant 0 : i32
    %c0_i32_2 = arith.constant 0 : i32
    return %c0_i32, %c0_i32_0, %c0_i32_1 : i32, i32, i32
  }
  func.func @transform_8(%arg0: i32) -> (i32, i32, i32) {
    %c0_i32 = arith.constant 0 : i32
    %c0_i32_0 = arith.constant 0 : i32
    %c0_i32_1 = arith.constant 0 : i32
    %c0_i32_2 = arith.constant 0 : i32
    return %c0_i32, %c0_i32_0, %c0_i32_1 : i32, i32, i32
  }
  func.func @transform_9(%arg0: i32) -> (i32, i32, i32) {
    %c0_i32 = arith.constant 0 : i32
    %c0_i32_0 = arith.constant 0 : i32
    %c0_i32_1 = arith.constant 0 : i32
    %c0_i32_2 = arith.constant 0 : i32
    return %c0_i32, %c0_i32_0, %c0_i32_1 : i32, i32, i32
  }
  func.func @transform_10(%arg0: i32) -> (i32, i32, i32) {
    %c0_i32 = arith.constant 0 : i32
    %c0_i32_0 = arith.constant 0 : i32
    %c0_i32_1 = arith.constant 0 : i32
    %c0_i32_2 = arith.constant 0 : i32
    return %c0_i32, %c0_i32_0, %c0_i32_1 : i32, i32, i32
  }
  func.func @transform_11(%arg0: i32) -> (i32, i32, i32) {
    %c0_i32 = arith.constant 0 : i32
    %c0_i32_0 = arith.constant 0 : i32
    %c0_i32_1 = arith.constant 0 : i32
    %c0_i32_2 = arith.constant 0 : i32
    return %c0_i32, %c0_i32_0, %c0_i32_1 : i32, i32, i32
  }
  func.func @transform_12(%arg0: i32) -> (i32, i32, i32) {
    %c0_i32 = arith.constant 0 : i32
    %c0_i32_0 = arith.constant 0 : i32
    %c0_i32_1 = arith.constant 0 : i32
    %c0_i32_2 = arith.constant 0 : i32
    return %c0_i32, %c0_i32_0, %c0_i32_1 : i32, i32, i32
  }
  func.func @transform_13(%arg0: i32) -> (i32, i32, i32) {
    %c0_i32 = arith.constant 0 : i32
    %c0_i32_0 = arith.constant 0 : i32
    %c0_i32_1 = arith.constant 0 : i32
    %c0_i32_2 = arith.constant 0 : i32
    return %c0_i32, %c0_i32_0, %c0_i32_1 : i32, i32, i32
  }
  func.func @transform_14(%arg0: i32) -> (i32, i32, i32) {
    %c0_i32 = arith.constant 0 : i32
    %c0_i32_0 = arith.constant 0 : i32
    %c0_i32_1 = arith.constant 0 : i32
    %c0_i32_2 = arith.constant 0 : i32
    return %c0_i32, %c0_i32_0, %c0_i32_1 : i32, i32, i32
  }
  func.func @transform_15(%arg0: i32) -> (i32, i32, i32) {
    %c0_i32 = arith.constant 0 : i32
    %c0_i32_0 = arith.constant 0 : i32
    %c0_i32_1 = arith.constant 0 : i32
    %c0_i32_2 = arith.constant 0 : i32
    return %c0_i32, %c0_i32_0, %c0_i32_1 : i32, i32, i32
  }
  func.func @transform_16(%arg0: i32) -> (i32, i32, i32) {
    %c0_i32 = arith.constant 0 : i32
    %c0_i32_0 = arith.constant 0 : i32
    %c0_i32_1 = arith.constant 0 : i32
    %c0_i32_2 = arith.constant 0 : i32
    return %c0_i32, %c0_i32_0, %c0_i32_1 : i32, i32, i32
  }
  func.func @transform_17(%arg0: i32) -> (i32, i32, i32) {
    %c0_i32 = arith.constant 0 : i32
    %c0_i32_0 = arith.constant 0 : i32
    %c0_i32_1 = arith.constant 0 : i32
    %c0_i32_2 = arith.constant 0 : i32
    return %c0_i32, %c0_i32_0, %c0_i32_1 : i32, i32, i32
  }
  func.func @transform_18(%arg0: i32) -> (i32, i32, i32) {
    %c0_i32 = arith.constant 0 : i32
    %c0_i32_0 = arith.constant 0 : i32
    %c0_i32_1 = arith.constant 0 : i32
    %c0_i32_2 = arith.constant 0 : i32
    return %c0_i32, %c0_i32_0, %c0_i32_1 : i32, i32, i32
  }
  func.func @transform_19(%arg0: i32) -> (i32, i32) {
    %c0_i32 = arith.constant 0 : i32
    %c0_i32_0 = arith.constant 0 : i32
    %c0_i32_1 = arith.constant 0 : i32
    return %c0_i32, %c0_i32_0 : i32, i32
  }
  func.func @transform_20(%arg0: i32) -> (i32, i32) {
    %c0_i32 = arith.constant 0 : i32
    %c0_i32_0 = arith.constant 0 : i32
    %c0_i32_1 = arith.constant 0 : i32
    return %c0_i32, %c0_i32_0 : i32, i32
  }
  func.func @transform_21(%arg0: i32) -> (i32, i32) {
    %c0_i32 = arith.constant 0 : i32
    %c0_i32_0 = arith.constant 0 : i32
    %c0_i32_1 = arith.constant 0 : i32
    return %c0_i32, %c0_i32_0 : i32, i32
  }
  func.func @transform_22(%arg0: i32) -> (i32, i32) {
    %c0_i32 = arith.constant 0 : i32
    %c0_i32_0 = arith.constant 0 : i32
    %c0_i32_1 = arith.constant 0 : i32
    return %c0_i32, %c0_i32_0 : i32, i32
  }
  func.func @transform_23(%arg0: i32) -> (i32, i32) {
    %c0_i32 = arith.constant 0 : i32
    %c0_i32_0 = arith.constant 0 : i32
    %c0_i32_1 = arith.constant 0 : i32
    return %c0_i32, %c0_i32_0 : i32, i32
  }
  func.func @transform_24(%arg0: i32) -> (i32, i32) {
    %c0_i32 = arith.constant 0 : i32
    %c0_i32_0 = arith.constant 0 : i32
    %c0_i32_1 = arith.constant 0 : i32
    return %c0_i32, %c0_i32_0 : i32, i32
  }
  func.func @transform_25(%arg0: i32) -> (i32, i32) {
    %c0_i32 = arith.constant 0 : i32
    %c0_i32_0 = arith.constant 0 : i32
    %c0_i32_1 = arith.constant 0 : i32
    return %c0_i32, %c0_i32_0 : i32, i32
  }
  func.func @transform_26(%arg0: i32) -> (i32, i32, i32) {
    %c0_i32 = arith.constant 0 : i32
    %c0_i32_0 = arith.constant 0 : i32
    %c0_i32_1 = arith.constant 0 : i32
    return %arg0, %c0_i32, %c0_i32_0 : i32, i32, i32
  }
}

</mosaic_0001>

<bundles_post_ra>
// kernel: vllip_sam_test_encoder.1
= control target key start
LH: loop header
LB: loop body
LE: loop exit
PB: predicated region body
PF: predicated region fallthrough
CT: control target
= control target key end

     0   :  { %s7961_s0 = inlined_call_operand.vmem [shape: f32[2,16,576], index: 0, kind: input, shape index: {}]   ;;  %s7962_s1 = inlined_call_operand.vmem [shape: f32[2,24,32], index: 1, kind: input, shape index: {}]   ;;  %s7963_s2 = inlined_call_operand.vmem [shape: bf16[576,32], index: 2, kind: input, shape index: {}]   ;;  %s7964_s3 = inlined_call_operand.vmem [shape: f32[1,32], index: 3, kind: input, shape index: {}]   ;;  %s7965_s4 = inlined_call_operand.vmem [shape: f32[16,32], index: 4, kind: input, shape index: {}]   ;;  %s7966_s5 = inlined_call_operand.vmem [shape: f32[1,32], index: 5, kind: input, shape index: {}]   ;;  %s7967_s6 = inlined_call_operand.vmem [shape: f32[1,32], index: 6, kind: input, shape index: {}]   ;;  %s7968_s7 = inlined_call_operand.vmem [shape: f32[3,1,32], index: 7, kind: input, shape index: {}]   ;;  %s7969_s8 = inlined_call_operand.vmem [shape: f32[3,1,32], index: 8, kind: input, shape index: {}]   ;;  %s7970_s9 = inlined_call_operand.vmem [shape: bf16[3,32,96], index: 9, kind: input, shape index: {}]   ;;  %s7971_s10 = inlined_call_operand.vmem [shape: f32[3,1,96], index: 10, kind: input, shape index: {}]   ;;  %s7972_s11 = inlined_call_operand.vmem [shape: bf16[3,32,32], index: 11, kind: input, shape index: {}]   ;;  %s7973_s12 = inlined_call_operand.vmem [shape: f32[3,1,32], index: 12, kind: input, shape index: {}]   ;;  %s7974_s13 = inlined_call_operand.vmem [shape: f32[3,1,32], index: 13, kind: input, shape index: {}]   ;;  %s7975_s14 = inlined_call_operand.vmem [shape: f32[3,1,32], index: 14, kind: input, shape index: {}]   ;;  %s7976_s15 = inlined_call_operand.vmem [shape: bf16[3,32,128], index: 15, kind: input, shape index: {}]   ;;  %s7977_s16 = inlined_call_operand.vmem [shape: f32[3,1,128], index: 16, kind: input, shape index: {}]   ;;  %s7978_s17 = inlined_call_operand.vmem [shape: bf16[3,128,32], index: 17, kind: input, shape index: {}]   ;;  %s7979_s18 = inlined_call_operand.vmem [shape: f32[3,1,32], index: 18, kind: input, shape index: {}]   ;;  %s7980_s19 = inlined_call_operand.vmem [shape: f32[1,32], index: 19, kind: input, shape index: {}]   ;;  %s7981_s20 = inlined_call_operand.vmem [shape: f32[1,32], index: 20, kind: input, shape index: {}]   ;;  %s7982_s21 = inlined_call_operand.vmem [shape: bf16[32,16], index: 21, kind: input, shape index: {}]   ;;  %s7983_s22 = inlined_call_operand.vmem [shape: bf16[16,32], index: 22, kind: input, shape index: {}]   ;;  %s7984_s23 = inlined_call_operand.vmem [shape: f32[1,32], index: 23, kind: input, shape index: {}]   ;;  %s7985_s24 = inlined_call_operand.vmem [shape: bf16[32,16], index: 24, kind: input, shape index: {}]   ;;  %s7986_s25 = inlined_call_operand.vmem [shape: f32[1,16], index: 25, kind: input, shape index: {}]   ;;  %s7987_s26 = inlined_call_operand.hbm [shape: f32[2,1,16], index: 26, kind: output, shape index: {}]  }
   0x1   :  { %8038 = sst [smem:[#allocation14_spill]] %s7961_s0 }
   0x2   :  { %8039 = sst [smem:[#allocation15_spill]] %s7962_s1 }
   0x3   :  { %8040 = sst [smem:[#allocation16_spill]] %s7963_s2 }
   0x4   :  { %8041 = sst [smem:[#allocation17_spill]] %s7964_s3 }
   0x5   :  { %8042 = sst [smem:[#allocation18_spill]] %s7965_s4 }
   0x6   :  { %8043 = sst [smem:[#allocation19_spill]] %s7966_s5 }
   0x7   :  { %8044 = sst [smem:[#allocation20_spill]] %s7967_s6 }
   0x8   :  { %8045 = sst [smem:[#allocation21_spill]] %s7968_s7 }
   0x9   :  { %8046 = sst [smem:[#allocation22_spill]] %s7969_s8 }
   0xa   :  { %8047 = sst [smem:[#allocation23_spill]] %s7970_s9 }
   0xb   :  { %8048 = sst [smem:[#allocation24_spill]] %s7971_s10 }
   0xc   :  { %8049 = sst [smem:[#allocation25_spill]] %s7973_s12 }
   0xd   :  { %8050 = sst [smem:[#allocation26_spill]] %s7974_s13 }
   0xe   :  { %8051 = sst [smem:[#allocation27_spill]] %s7975_s14 }
   0xf   :  { %8052 = sst [smem:[#allocation28_spill]] %s7976_s15 }
  0x10   :  { %8053 = sst [smem:[#allocation29_spill]] %s7980_s19 }
  0x11   :  { %8054 = sst [smem:[#allocation30_spill]] %s7981_s20 }
  0x12   :  { %8055 = sst [smem:[#allocation31_spill]] %s7982_s21 }
  0x13   :  { %8056 = sst [smem:[#allocation32_spill]] %s7983_s22 }
  0x14   :  { %8057 = sst [smem:[#allocation33_spill]] %s7984_s23 }
  0x15   :  { %8058 = sst [smem:[#allocation34_spill]] %s7985_s24 }
  0x16   :  { %8059 = sst [smem:[#allocation35_spill]] %s7986_s25 }
  0x17   :  { %8060 = sst [smem:[#allocation36_spill]] %s7987_s26 }
  0x18   :  { %31 = vsyncpa [#allocation3], 0 }
  0x19   :  { %33 = vsyncpa [#allocation3 + $0x1], 0  ;;  %s6806_s27 = smov 0   ;;  %s6808_s3 = smov 0  }
  0x1a   :  { %s6810_s7 = smov 0   ;;  %s6812_s28 = smov 0  }
  0x1b LB: > { %8061 = sst [smem:[#allocation5_spill]] %s6639_s27  ;;  %s6827_s8 = sadd.s32 4294967295, %s6651_s28   ;;  %s6651_s28 = sphi %s6812_s28, %s8120_s28   ;;  %s6647_s7 = sphi %s6810_s7, %s8123_s7   ;;  %s6643_s3 = sphi %s6808_s3, %s8122_s3   ;;  %s6639_s27 = sphi %s6806_s27, %s8121_s27  }
  0x1c   : > { %8062 = sst [smem:[#allocation6_spill]] %s6643_s3  ;;  %s5297_s4 = sadd.s32 4294967294, %s6651_s28  }
  0x1d   : > { %8063 = sst [smem:[#allocation7_spill]] %s6647_s7  ;;  %s6831_s29 = sadd.s32 1, %s6651_s28  }
  0x1e   : > { %8064 = sst [smem:[#allocation8_spill]] %s6651_s28  ;;  %s602_s0 = sadd.s32 1, %s6647_s7 }
  0x1f   : > { %8065 = sst [smem:[#allocation9_spill]] %s6827_s8  ;;  %s599_s9 = ssub.s32 %s6651_s28, %s6831_s29 }
  0x20   : > { %8066 = sst [smem:[#allocation10_spill]] %s6831_s29  ;;  %p612_p0 = scmp.ne.s32.totalorder %s6647_s7, %s6643_s3 }
  0x21   : > { %p600_p1 = scmp.eq.s32.totalorder %s599_s9, 0  ;;  %p613_p2 = scmp.eq.s32.totalorder %s6827_s8, 1 }
  0x22   : > { %p618_p3 = scmp.ne.s32.totalorder %s6643_s3, %s6639_s27  ;;  %p619_p4 = scmp.eq.s32.totalorder %s5297_s4, 1 }
  0x23   : > { %s6842_s30 = scalar_select %p600_p1, %s6647_s7, %s602_s0  }
  0x24   : > { %p6844_p5 = por %p613_p2, %p612_p0  ;;  %p6848_p6 = por %p619_p4, %p618_p3 }
  0x25   : > { %8067 = sst [smem:[#allocation11_spill]] %s6842_s30  ;;  %p5300_p7 = scmp.ge.s32.totalorder %s6651_s28, 1 }
  0x26   : > { %s8068_s2 = scalar_select %p6844_p5, 1, 0 }
  0x27   : > { %s8070_s5 = scalar_select %p6848_p6, 1, 0 }
  0x28   : > { %8069 = sst [smem:[#allocation12_spill]] %s8068_s2  ;;  %p725_p8 = scmp.lt.s32.totalorder %s6651_s28, 3 }
  0x29   : > { %8071 = sst [smem:[#allocation13_spill]] %s8070_s5 }
  0x2a   : > { %p726_p9 = pnand %p5300_p7, %p725_p8 }
  0x2b   : > { %s8072_s1 = sld [smem:[#allocation16_spill]] (!%p726_p9)  ;;  %p799_p10 = scmp.lt.s32.totalorder (!%p726_p9), %s6827_s8, 1 }
  0x2c   : > { %729 = sbr.rel (%p726_p9) target bundleno = 12714 (0x31aa), region = 124  ;;  %s8073_s2 = sld [smem:[#allocation14_spill]] (!%p726_p9) }
  0x2d   : > { %s8075_s29 = sld [smem:[#allocation18_spill]] (!%p726_p9)  ;;  %s8029_s10 = smov (!%p726_p9), 96  }
  0x2e   : > { %s8076_s30 = sld [smem:[#allocation19_spill]] (!%p726_p9)  ;;  %s8021_s4 = smov (!%p726_p9), 64  }
  0x2f   : > { %s8077_s26 = sld [smem:[#allocation20_spill]] (!%p726_p9)  ;;  %s8027_s0 = smov (!%p726_p9), 120  }
  0x30   : > { %s8081_s27 = sld [smem:[#allocation24_spill]] (!%p726_p9)  ;;  %s8023_s7 = smov (!%p726_p9), 88  }
  0x31   : > { %v6281_v0 = vld [vmem:[%s8072_s1 + $0x78] sm:$0xff]   ;;  %v6285_v4 = vld [vmem:[%s8072_s1 + $0x70] sm:$0xff]   ;;  %v6289_v8 = vld [vmem:[%s8072_s1 + $0x68] sm:$0xff]   ;;  %s6919_s9 = scalar_select %p799_p10, %s6827_s8, 1  ;;  %v6653_v36 = vmov 0.0   ;;  %vm6654_vm0 = vmmov 0  }
  0x32   : > { %v6282_v1 = vld [vmem:[%s8072_s1 + $0x38] sm:$0xff]   ;;  %5565 = vmatprep.subr.bf16.mxu0 %v6281_v0  ;;  %v6286_v5 = vld [vmem:[%s8072_s1 + $0x30] sm:$0xff]   ;;  %v6290_v9 = vld [vmem:[%s8072_s1 + $0x28] sm:$0xff]   ;;  %vm1115_vm1 = vcmask 523264   ;;  %vm1289_vm2 = vcmask 253952   ;;  %vm1244_vm3 = vcmask 261120  }
  0x33   : > { %v6283_v2 = vld [vmem:[%s8072_s1 + $0xf8] sm:$0xff]   ;;  %5566 = vmatpush3.bf16.msra.mxu0 %v6282_v1  ;;  %v6287_v6 = vld [vmem:[%s8072_s1 + $0xf0] sm:$0xff]   ;;  %v6291_v10 = vld [vmem:[%s8072_s1 + $0xe8] sm:$0xff]   ;;  %s6178_s6 = smul.u32 80, %s6919_s9  ;;  %vm1307_vm4 = vcmask 1040384   ;;  %vm1490_vm6 = vcmask 64512  }
  0x34   : > { %v6284_v3 = vld [vmem:[%s8072_s1 + $0xb8] sm:$0xff]   ;;  %5587 = vmatprep.subr.bf16.mxu1 %v6283_v2  ;;  %5567 = vmatprep.subr.bf16.mxu0 %v6285_v4  ;;  %v6288_v7 = vld [vmem:[%s8072_s1 + $0xb0] sm:$0xff]   ;;  %v6292_v11 = vld [vmem:[%s8072_s1 + $0xa8] sm:$0xff]   ;;  %vm1551_vm8 = vcmask 195584   ;;  %vm1598_vm9 = vcmask 1043456   ;;  %vm2186_vm10 = vcmask 130048  }
  0x35   : > { %5588 = vmatpush3.bf16.msra.mxu1 %v6284_v3  ;;  %v6293_v12 = vld [vmem:[%s8072_s1 + $0x60] sm:$0xff]   ;;  %v6297_v16 = vld [vmem:[%s8072_s1 + $0x58] sm:$0xff]   ;;  %v6301_v20 = vld [vmem:[%s8072_s1 + $0x50] sm:$0xff]   ;;  %s6949_s28 = scalar_lea.vmem %s8073_s2, %s6178_s6  ;;  %s8074_s2 = sld [smem:[#allocation17_spill]]  ;;  %vm5215_vm11 = vcmask 122880  }
  0x36   : > { %5589 = vmatprep.subr.bf16.mxu1 %v6287_v6  ;;  %v6294_v13 = vld [vmem:[%s8072_s1 + $0x20] sm:$0xff]   ;;  %v6298_v17 = vld [vmem:[%s8072_s1 + $0x18] sm:$0xff]   ;;  %v6302_v21 = vld [vmem:[%s8072_s1 + $0x10] sm:$0xff]   ;;  %s8078_s6 = sld [smem:[#allocation23_spill]]  ;;  %s8082_s5 = smov %s8081_s27 }
  0x37   : > { %5568 = vmatpush3.bf16.msra.mxu0 %v6286_v5  ;;  %v6295_v14 = vld [vmem:[%s8072_s1 + $0xe0] sm:$0xff]   ;;  %v6299_v18 = vld [vmem:[%s8072_s1 + $0xd8] sm:$0xff]   ;;  %v6303_v22 = vld [vmem:[%s8072_s1 + $0xd0] sm:$0xff]   ;;  %s8083_s12 = sld [smem:[#allocation25_spill]]  ;;  %s8097_s25 = smov 104  }
  0x38   : > { %5569 = vmatprep.subr.bf16.mxu0 %v6289_v8  ;;  %v6296_v15 = vld [vmem:[%s8072_s1 + $0xa0] sm:$0xff]   ;;  %v6300_v19 = vld [vmem:[%s8072_s1 + $0x98] sm:$0xff]   ;;  %v6304_v23 = vld [vmem:[%s8072_s1 + $0x90] sm:$0xff]   ;;  %s8084_s15 = sld [smem:[#allocation28_spill]]  ;;  %s8098_s23 = smov 40  }
  0x39   : > { %5590 = vmatpush3.bf16.msra.mxu1 %v6288_v7  ;;  %v6305_v24 = vld [vmem:[%s8072_s1 + $0x48] sm:$0xff]   ;;  %v6309_v28 = vld [vmem:[%s8072_s1 + $0x40] sm:$0xff]   ;;  %v816_v32 = vld [vmem:[%s6949_s28 + $0x30] sm:$0xff]  ;;  %s8085_s13 = sld [smem:[#allocation26_spill]]  ;;  %s8099_s8 = smov 8  }
  0x3a   : > { %5591 = vmatprep.subr.bf16.mxu1 %v6291_v10  ;;  %v6306_v25 = vld [vmem:[%s8072_s1 + $0x8] sm:$0xff]   ;;  %v6310_v29 = vld [vmem:[%s8072_s1] sm:$0xff]   ;;  %v813_v38 = vld [vmem:[%s6949_s28 + $0x18] sm:$0xff]  ;;  %s8086_s14 = sld [smem:[#allocation27_spill]]  ;;  %s8100_s3 = smov 16  }
  0x3b   : > { %5570 = vmatpush3.bf16.msra.mxu0 %v6290_v9  ;;  %v6307_v26 = vld [vmem:[%s8072_s1 + $0xc8] sm:$0xff]   ;;  %v6311_v30 = vld [vmem:[%s8072_s1 + $0xc0] sm:$0xff]   ;;  %v6313_v42 = vld [vmem:[%s8072_s1 + $0x118] sm:$0xff]   ;;  %s8101_s21 = smov 24   ;;  %s8113_s20 = sld [smem:[#allocation33_spill]] }
  0x3c   : > { %5571 = vmatprep.subr.bf16.mxu0 %v6293_v12  ;;  %v6308_v27 = vld [vmem:[%s8072_s1 + $0x88] sm:$0xff]   ;;  %v6312_v34 = vld [vmem:[%s8072_s1 + $0x80] sm:$0xff]   ;;  %v812_v43 = vld [vmem:[%s6949_s28 + $0x10] sm:$0xff] }
  0x3d   : > { %5592 = vmatpush3.bf16.msra.mxu1 %v6292_v11  ;;  %v811_v31 = vld [vmem:[%s6949_s28 + $0x8] sm:$0xff]  ;;  %v810_v35 = vld [vmem:[%s6949_s28] sm:$0xff]  ;;  %v817_v44 = vld [vmem:[%s6949_s28 + $0x38] sm:$0xff] }
  0x3e   : > { %5593 = vmatprep.subr.bf16.mxu1 %v6295_v14  ;;  %v821_v33 = vpack.c.bf16 %v816_v32, %v811_v31  ;;  %v815_v37 = vld [vmem:[%s6949_s28 + $0x28] sm:$0xff]  ;;  %v818_v39 = vld [vmem:[%s6949_s28 + $0x40] sm:$0xff]  ;;  %v822_v45 = vpack.c.bf16 %v817_v44, %v812_v43  ;;  %v6314_v46 = vld [vmem:[%s8072_s1 + $0x110] sm:$0xff]  }
  0x3f   : > { %5572 = vmatpush3.bf16.msra.mxu0 %v6294_v13  ;;  %v820_v40 = vpack.c.bf16 %v815_v37, %v810_v35  ;;  %v823_v41 = vpack.c.bf16 %v818_v39, %v813_v38  ;;  %v6315_v47 = vld [vmem:[%s8072_s1 + $0x108] sm:$0xff]   ;;  %v6316_v48 = vld [vmem:[%s8072_s1 + $0x100] sm:$0xff]   ;;  %v1273_v39 = vlaneseq  ;;  %s8092_s1 = smov 56  }
  0x40   : > { %5573 = vmatprep.subr.bf16.mxu0 %v6297_v16  ;;  %1151 = vmatprep.mubr.bf16.mxu0 %v821_v33  ;;  %v814_v49 = vld [vmem:[%s6949_s28 + $0x20] sm:$0xff]  ;;  %v819_v50 = vld [vmem:[%s6949_s28 + $0x48] sm:$0xff]  ;;  %s8005_s28 = smov 80  }
  0x41   : > { %5594 = vmatpush3.bf16.msra.mxu1 %v6296_v15  ;;  %1192 = vmatprep.mubr.bf16.mxu1 %v823_v41  ;;  %v824_v51 = vpack.c.bf16 %v819_v50, %v814_v49  ;;  %v1288_v52 = vld [vmem:[%s8074_s2] sm:$0x1]  ;;  %v898_v62 = vld [vmem:[%s8075_s29 + $0x8] sm:$0xff]  ;;  %s8007_s2 = smov 56  }
  0x42   : > { %5595 = vmatprep.subr.bf16.mxu1 %v6299_v18  ;;  %v1290_v53 = vsel %vm1289_vm2, %v1288_v52, 0.0  ;;  %v897_v1 = vld [vmem:[%s8075_s29] sm:$0xff]  ;;  %s8096_s29 = smov 72  }
  0x43   : > { %5574 = vmatpush3.bf16.msra.mxu0 %v6298_v17  ;;  %1291 = vadd.xlane.f32.xlu1 %v1290_v53  ;;  %v1242_v44 = vld [vmem:[%s8076_s30] sm:$0x1]  ;;  %s8079_s30 = sld [smem:[#allocation21_spill]] }
  0x44   : > { %5575 = vmatprep.subr.bf16.mxu0 %v6301_v20 }
  0x45   : > { %5596 = vmatpush3.bf16.msra.mxu1 %v6300_v19 }
  0x46   : > { %5597 = vmatprep.subr.bf16.mxu1 %v6303_v22 }
  0x47   : > { %5576 = vmatpush3.bf16.msra.mxu0 %v6302_v21 }
  0x48   : > { %5577 = vmatprep.subr.bf16.mxu0 %v6305_v24 }
  0x49   : > { %5598 = vmatpush3.bf16.msra.mxu1 %v6304_v23 }
  0x4a   : > { %5599 = vmatprep.subr.bf16.mxu1 %v6307_v26 }
  0x4b   : > { %5578 = vmatpush3.bf16.msra.mxu0 %v6306_v25 }
  0x4c   : > { %5579 = vmatprep.subr.bf16.mxu0 %v6309_v28 }
  0x4d   : > { %5600 = vmatpush3.bf16.msra.mxu1 %v6308_v27 }
  0x4e   : > { %5601 = vmatprep.subr.bf16.mxu1 %v6311_v30 }
  0x4f   : > { %5580 = vmatpush3.bf16.msra.mxu0 %v6310_v29 }
  0x50   : > { %5784 = vmatprep.subr.bf16.mxu0 %v6653_v36 }
  0x51   : > { %5602 = vmatpush3.bf16.msra.mxu1 %v6312_v34 }
  0x52   : > { %1152 = vmatmul.mubr.bf16.vlgmr.msra.gmra.mxu0 %v820_v40 }
  0x53   : > { %5785 = vmatpush3.bf16.msra.mxu0 %v6313_v42  ;;  %5792 = vmatprep.mubr.msk.bf16.mxu0 %vm6654_vm0, %v6653_v36  ;;  %v1274_v42 = vshrl.u32 %v1273_v39, 7 }
  0x54   : > { %1193 = vmatmul.mubr.bf16.vlgmr.msra.gmra.mxu1 %v822_v45  ;;  %5786 = vmatprep.subr.bf16.mxu0 %v6653_v36  ;;  %v1243_v45 = vld [vmem:[%s8077_s26] sm:$0x1]  ;;  %s8080_s26 = sld [smem:[#allocation22_spill]] }
  0x55   : > { %v1275_v43 = vsub.s32 0, %v1274_v42 }
  0x57   : > { %5787 = vmatpush3.bf16.msra.mxu0 %v6314_v46  ;;  %v1276_v46 = vrot.slane %v1242_v44, %v1275_v43 }
  0x58   : > { %5788 = vmatprep.subr.bf16.mxu0 %v6653_v36 }
  0x5b   : > { %5789 = vmatpush3.bf16.msra.mxu0 %v6315_v47 }
  0x5c   : > { %5790 = vmatprep.subr.bf16.mxu0 %v6653_v36 }
  0x5f   : > { %5791 = vmatpush3.bf16.msra.mxu0 %v6316_v48  ;;  %v1284_v48 = vrot.slane %v1243_v45, %v1275_v43 }
  0x62   : > { %5793 = vmatmul.mubr.msk.bf16.vlgmr.msra.gmra.mxu0 %vm1115_vm1, %v824_v51 }
  0xcc   : > { %v1292_v16 = vpop.xlane.xlu1 %1291 }
  0xcd   : > { %v1293_v17 = vmul.f32 0.03125, %v1292_v16 }
  0xcf   : > { %v1294_v20 = vsub.f32 %v1288_v52, %v1293_v17 }
  0xd1   : > { %v1295_v25 = vmul.f32 %v1294_v20, %v1294_v20 }
  0xd3   : > { %v1296_v28 = vsel %vm1289_vm2, %v1295_v25, 0.0 }
 0x112   : > { %v5581_v54 = vpop.f32.mrf.mxu0 }
 0x114   : > { %v5582_v55 = vpop.f32.mrf.mxu0  ;;  %v5603_v56 = vpop.f32.mrf.mxu1 }
 0x115   : > { %v5583_v0 = vadd.f32 %v5582_v55, %v5581_v54  ;;  %v1319_v55 = vadd.s32 16, %v1274_v42 }
 0x116   : > { %v5584_v57 = vpop.f32.mrf.mxu0  ;;  %v5604_v58 = vpop.f32.mrf.mxu1 }
 0x117   : > { %v1154_v5 = vadd.f32 %v5583_v0, %v897_v1  ;;  %v5605_v6 = vadd.f32 %v5604_v58, %v5603_v56  ;;  %vm1322_vm5 = vcmp.lt.s32.totalorder %v1319_v55, 17 }
 0x118   : > { %v5585_v59 = vpop.f32.mrf.mxu0  ;;  %v5606_v60 = vpop.f32.mrf.mxu1  ;;  %v5340_v0 = vsel %vm1322_vm5, 1.0, %v6653_v36 }
 0x119   : > { %v5586_v61 = vadd.f32 %v5585_v59, %v5584_v57  ;;  %v1195_v10 = vadd.f32 %v5605_v6, %v1154_v5 }
 0x11a   : > { %v5607_v63 = vpop.f32.mrf.mxu1 }
 0x11b   : > { %v1157_v2 = vadd.f32 %v5586_v61, %v898_v62  ;;  %v5608_v3 = vadd.f32 %v5607_v63, %v5606_v60 }
 0x11d   : > { %v1198_v8 = vadd.f32 %v5608_v3, %v1157_v2 }
 0x122   : > { %v1235_v4 = vpop.f32.mrf.mxu0 }
 0x123   : > { %v1236_v13 = vadd.f32 %v1235_v4, %v1195_v10 }
 0x124   : > { %v5794_v7 = vpop.f32.mrf.mxu0 }
 0x125   : > { %v1245_v15 = vsel %vm1244_vm3, %v1236_v13, 0.0 }
 0x126   : > { %v1238_v9 = vpop.f32.mrf.mxu0 }
 0x127   : > { %v1239_v11 = vadd.f32 %v1238_v9, %v1198_v8 }
 0x128   : > { %v5795_v12 = vpop.f32.mrf.mxu0 }
 0x129   : > { %v1248_v14 = vsel %vm1244_vm3, %v1239_v11, 0.0 }
 0x12a   : > { %1249 = vadd.xlane.f32.xlu0 %v1248_v14 }
 0x12e   : > { %1246 = vadd.xlane.f32.xlu0 %v1245_v15 }
 0x1b3   : > { %v1250_v18 = vpop.xlane.xlu0 %1249 }
 0x1b4   : > { %v1253_v19 = vmul.f32 0.03125, %v1250_v18 }
 0x1b6   : > { %v1255_v21 = vsub.f32 %v1239_v11, %v1253_v19 }
 0x1b7   : > { %v1247_v22 = vpop.xlane.xlu0 %1246 }
 0x1b8   : > { %v1252_v23 = vmul.f32 0.03125, %v1247_v22  ;;  %v1257_v24 = vmul.f32 %v1255_v21, %v1255_v21  ;;  %v6317_v22 = vld [vmem:[%s8078_s6 + $0x8] sm:$0xff]  }
 0x1b9   : > { %5796 = vmatprep.subr.bf16.mxu1 %v6317_v22 }
 0x1ba   : > { %v1254_v26 = vsub.f32 %v1236_v13, %v1252_v23  ;;  %v1261_v27 = vsel %vm1244_vm3, %v1257_v24, 0.0  ;;  %v6318_v23 = vld [vmem:[%s8078_s6] sm:$0xff]   ;;  %5797 = vmatpush3.bf16.msra.mxu1 %v6317_v22 }
 0x1bb   : > { %1262 = vadd.xlane.f32.xlu1 %v1261_v27  ;;  %5798 = vmatprep.subr.bf16.mxu1 %v6318_v23 }
 0x1bc   : > { %v1256_v29 = vmul.f32 %v1254_v26, %v1254_v26 }
 0x1be   : > { %v1258_v30 = vsel %vm1244_vm3, %v1256_v29, 0.0  ;;  %5799 = vmatpush3.bf16.msra.mxu1 %v6318_v23 }
 0x1bf   : > { %1297 = vadd.xlane.f32.xlu1 %v1296_v28  ;;  %1259 = vadd.xlane.f32.xlu0 %v1258_v30 }
 0x244   : > { %v1263_v31 = vpop.xlane.xlu1 %1262 }
 0x245   : > { %v1265_v32 = vmul.f32 0.03125, %v1263_v31 }
 0x247   : > { %v1267_v33 = vadd.f32 1e-05, %v1265_v32 }
 0x248   : > { %v1298_v34 = vpop.xlane.xlu1 %1297  ;;  %v1260_v35 = vpop.xlane.xlu0 %1259 }
 0x249   : > { %6364 = vrsqrt.f32 %v1267_v33  ;;  %v1299_v37 = vmul.f32 0.03125, %v1298_v34  ;;  %v1264_v38 = vmul.f32 0.03125, %v1260_v35  ;;  %v5341_v34 = vld [vmem:[%s8079_s30] ss:$0 sm:$0xff] }
 0x24b   : > { %v1300_v40 = vadd.f32 1e-05, %v1299_v37  ;;  %v1266_v41 = vadd.f32 1e-05, %v1264_v38  ;;  %v5342_v38 = vld [vmem:[%s8080_s26] ss:$0 sm:$0xff] }
 0x24d   : > { %6366 = vrsqrt.f32 %v1300_v40 }
 0x24e   : > { %6368 = vrsqrt.f32 %v1266_v41 }
 0x256   : > { %v6365_v47 = vpop.eup %6364 }
 0x257   : > { %v1271_v49 = vmul.f32 %v6365_v47, %v1255_v21 }
 0x259   : > { %v1279_v50 = vmul.f32 %v1276_v46, %v1271_v49 }
 0x25a   : > { %v6367_v51 = vpop.eup %6366 }
 0x25b   : > { %v6369_v52 = vpop.eup %6368  ;;  %v1302_v53 = vmul.f32 %v6367_v51, %v1294_v20  ;;  %v1287_v54 = vadd.f32 %v1284_v48, %v1279_v50  ;;  %v5343_v51 = vld [vmem:[%s8081_s27] ss:$0 sm:$0xff]  ;;  %s8003_s27 = smov 112  }
 0x25c   : > { %v1270_v56 = vmul.f32 %v6369_v52, %v1254_v26 }
 0x25d   : > { %v1303_v58 = vmul.f32 %v1302_v53, %v1242_v44  ;;  %v1309_v59 = vrot.slane %v1287_v54, 7 }
 0x25e   : > { %v1278_v57 = vmul.f32 %v1276_v46, %v1270_v56 }
 0x25f   : > { %v1304_v61 = vadd.f32 %v1303_v58, %v1243_v45  ;;  %v1315_v63 = vsel %vm1307_vm4, %v1309_v59, 0.0 }
 0x260   : > { %v1286_v60 = vadd.f32 %v1284_v48, %v1278_v57  ;;  %v7019_v5 = vmul.f32 %v5340_v0, %v1315_v63 }
 0x262   : > { %v1308_v62 = vrot.slane %v1286_v60, 7  ;;  %v1347_v6 = vsel %vm1244_vm3, %v7019_v5, 0.0 }
 0x264   : > { %v7011_v1 = vsel %vm1307_vm4, %v1304_v61, %v1308_v62  ;;  %v7013_v2 = vsel %vm1307_vm4, %v1308_v62, %v1309_v59 }
 0x265   : > { %v1341_v3 = vsel %vm1244_vm3, %v7011_v1, 0.0  ;;  %v1344_v4 = vsel %vm1244_vm3, %v7013_v2, 0.0 }
 0x266   : > { %1342 = vadd.xlane.f32.xlu0 %v1341_v3  ;;  %1345 = vadd.xlane.f32.xlu1 %v1344_v4 }
 0x26a   : > { %1348 = vadd.xlane.f32.xlu0 %v1347_v6 }
 0x2ef   : > { %v1343_v7 = vpop.xlane.xlu0 %1342  ;;  %v1346_v8 = vpop.xlane.xlu1 %1345 }
 0x2f0   : > { %v1350_v9 = vmul.f32 0.03125, %v1343_v7  ;;  %v1351_v10 = vmul.f32 0.03125, %v1346_v8 }
 0x2f2   : > { %v1353_v11 = vsub.f32 %v7011_v1, %v1350_v9  ;;  %v1354_v12 = vsub.f32 %v7013_v2, %v1351_v10  ;;  %v1330_v9 = vand.u32 127, %v1273_v39 }
 0x2f3   : > { %v1349_v13 = vpop.xlane.xlu0 %1348 }
 0x2f4   : > { %v1352_v14 = vmul.f32 0.03125, %v1349_v13  ;;  %v1356_v15 = vmul.f32 %v1353_v11, %v1353_v11  ;;  %v1357_v16 = vmul.f32 %v1354_v12, %v1354_v12  ;;  %vm1331_vm7 = vcmp.lt.s32.totalorder %v1330_v9, 17 }
 0x2f6   : > { %v1355_v17 = vsub.f32 %v7019_v5, %v1352_v14  ;;  %v1359_v18 = vsel %vm1244_vm3, %v1356_v15, 0.0  ;;  %v1362_v19 = vsel %vm1244_vm3, %v1357_v16, 0.0 }
 0x2f7   : > { %1360 = vadd.xlane.f32.xlu1 %v1359_v18  ;;  %1363 = vadd.xlane.f32.xlu0 %v1362_v19 }
 0x2f8   : > { %v1358_v20 = vmul.f32 %v1355_v17, %v1355_v17 }
 0x2fa   : > { %v1365_v21 = vsel %vm1244_vm3, %v1358_v20, 0.0 }
 0x2fb   : > { %1366 = vadd.xlane.f32.xlu1 %v1365_v21 }
 0x380   : > { %v1364_v24 = vpop.xlane.xlu0 %1363  ;;  %v1361_v25 = vpop.xlane.xlu1 %1360 }
 0x381   : > { %v1369_v26 = vmul.f32 0.03125, %v1364_v24  ;;  %v1368_v27 = vmul.f32 0.03125, %v1361_v25 }
 0x383   : > { %v1372_v28 = vadd.f32 1e-05, %v1369_v26  ;;  %v1371_v29 = vadd.f32 1e-05, %v1368_v27 }
 0x384   : > { %v1367_v30 = vpop.xlane.xlu1 %1366 }
 0x385   : > { %6370 = vrsqrt.f32 %v1372_v28  ;;  %v1370_v31 = vmul.f32 0.03125, %v1367_v30 }
 0x386   : > { %6372 = vrsqrt.f32 %v1371_v29 }
 0x387   : > { %v1373_v32 = vadd.f32 1e-05, %v1370_v31 }
 0x389   : > { %6374 = vrsqrt.f32 %v1373_v32 }
 0x392   : > { %v6371_v33 = vpop.eup %6370 }
 0x393   : > { %v6373_v35 = vpop.eup %6372  ;;  %v1378_v37 = vmul.f32 %v6371_v33, %v1354_v12 }
 0x394   : > { %v1377_v40 = vmul.f32 %v6373_v35, %v1353_v11  ;;  %v6656_v11 = vmov -1e+30  }
 0x395   : > { %v1387_v41 = vmul.f32 %v5341_v34, %v1378_v37  ;;  %v7067_v12 = vsel %vm1331_vm7, 0.0, %v6656_v11 }
 0x396   : > { %v6375_v42 = vpop.eup %6374  ;;  %v1386_v43 = vmul.f32 %v5341_v34, %v1377_v40 }
 0x397   : > { %v1396_v44 = vadd.f32 %v5342_v38, %v1387_v41  ;;  %v1379_v45 = vmul.f32 %v6375_v42, %v1355_v17 }
 0x398   : > { %v1395_v46 = vadd.f32 %v5342_v38, %v1386_v43 }
 0x399   : > { %v1388_v47 = vmul.f32 %v5341_v34, %v1379_v45 }
 0x39a   : > { %v1398_v48 = vpack.c.bf16 %v1396_v44, %v1395_v46 }
 0x39b   : > { %v1397_v49 = vadd.f32 %v5342_v38, %v1388_v47 }
 0x39c   : > { %5800 = vmatprep.mubr.msk.bf16.mxu1 %vm1244_vm3, %v1398_v48 }
 0x39d   : > { %v1399_v50 = vpack.c.bf16 %v1397_v49, %v1397_v49 }
 0x39f   : > { %5801 = vmatmul.mubr.msk.bf16.vlgmr.msra.gmra.mxu1 %vm1244_vm3, %v1399_v50 }
 0x45f   : > { %v5802_v52 = vpop.f32.mrf.mxu1 }
 0x460   : > { %v1472_v53 = vadd.f32 %v5802_v52, %v5343_v51 }
 0x461   : > { %v1463_v54 = vpop.f32.mrf.mxu1 }
 0x462   : > { %v7046_v55 = vpack.c.bf16 %v1472_v53, %v1472_v53  ;;  %v1464_v57 = vadd.f32 %v5343_v51, %v1463_v54  ;;  %v1479_v7 = vmul.f32 0.35355338, %v1472_v53 }
 0x463   : > { %v5803_v56 = vpop.f32.mrf.mxu1 }
 0x464   : > { %1488 = vrot.lane.b32.xlu0 %v7046_v55, %s8029_s10  ;;  %v1477_v60 = vmul.f32 0.35355338, %v1464_v57  ;;  %v7062_v8 = vpack.c.bf16 %v1479_v7, %v1479_v7 }
 0x465   : > { %v1466_v58 = vpop.f32.mrf.mxu1 }
 0x466   : > { %v1467_v59 = vadd.f32 %v5343_v51, %v1466_v58 }
 0x468   : > { %v1478_v61 = vmul.f32 0.35355338, %v1467_v59  ;;  %v7050_v62 = vpack.c.bf16 %v1467_v59, %v1464_v57 }
 0x46a   : > { %v7052_v63 = vpack.c.bf16 %v1478_v61, %v1477_v60  ;;  %1486 = vrot.lane.b32.xlu1 %v7050_v62, %s8029_s10  ;;  %s8087_s10 = sld [smem:[#allocation15_spill]] }
 0x46c   : > { %5808 = vmatprep.mubr.msk.bf16.mxu1 %vm1490_vm6, %v7052_v63 }
 0x4d6   : > { %v1489_v0 = vpop.permute.xlu0 %1488 }
 0x4d7   : > { %6142 = vmatprep.subr.msk.bf16.mxu1 %vm1490_vm6, %v1489_v0  ;;  %v1501_v3 = vsel %vm1490_vm6, %v1489_v0, 0 }
 0x4d8   : > { %5805 = vmatpush3.bf16.xpose.msra.mxu1 %v1501_v3 }
 0x4dc   : > { %v1487_v4 = vpop.permute.xlu1 %1486 }
 0x4dd   : > { %6143 = vmatprep.subr.msk.bf16.mxu1 %vm1490_vm6, %v1487_v4  ;;  %v1498_v6 = vsel %vm1490_vm6, %v1487_v4, 0 }
 0x4e0   : > { %5807 = vmatpush3.bf16.xpose.msra.mxu1 %v1498_v6 }
 0x4e7   : > { %5809 = vmatmul.mubr.msk.bf16.vlgmr.msra.gmra.mxu1 %vm1490_vm6, %v7062_v8 }
 0x5a7   : > { %v5810_v10 = vpop.f32.mrf.mxu1 }
 0x5a8   : > { %v1546_v19 = vadd.f32 %v5810_v10, %v7067_v12 }
 0x5a9   : > { %v1537_v13 = vpop.f32.mrf.mxu1 }
 0x5aa   : > { %v1538_v14 = vadd.f32 %v1537_v13, %v7067_v12  ;;  %v1558_v20 = vsel %vm1551_vm8, %v1546_v19, -inf }
 0x5ab   : > { %v5811_v15 = vpop.f32.mrf.mxu1 }
 0x5ac   : > { %v1552_v16 = vsel %vm1551_vm8, %v1538_v14, -inf }
 0x5ad   : > { %v1540_v17 = vpop.f32.mrf.mxu1  ;;  %1553 = vmax.xlane.f32.xlu1 %v1552_v16 }
 0x5ae   : > { %v1541_v18 = vadd.f32 %v1540_v17, %v7067_v12 }
 0x5b0   : > { %v1555_v39 = vsel %vm1551_vm8, %v1541_v18, -inf }
 0x5b1   : > { %1556 = vmax.xlane.f32.xlu0 %v1555_v39 }
 0x5b5   : > { %1559 = vmax.xlane.f32.xlu0 %v1558_v20 }
 0x636   : > { %v1554_v21 = vpop.xlane.xlu1 %1553 }
 0x637   : > { %v1561_v24 = vsub.f32 %v1538_v14, %v1554_v21 }
 0x639   : > { %v1564_v28 = vmul.f32 1.442695, %v1561_v24 }
 0x63a   : > { %v1557_v22 = vpop.xlane.xlu0 %1556 }
 0x63b   : > { %v1562_v23 = vsub.f32 %v1541_v18, %v1557_v22 }
 0x63d   : > { %v1566_v25 = vmul.f32 1.442695, %v1562_v23 }
 0x63e   : > { %v1560_v26 = vpop.xlane.xlu0 %1559 }
 0x63f   : > { %6376 = vpow2.f32 %v1566_v25  ;;  %v1563_v27 = vsub.f32 %v1546_v19, %v1560_v26 }
 0x641   : > { %v1568_v29 = vmul.f32 1.442695, %v1563_v27 }
 0x643   : > { %6378 = vpow2.f32 %v1568_v29 }
 0x644   : > { %6380 = vpow2.f32 %v1564_v28 }
 0x64c   : > { %v6377_v30 = vpop.eup %6376 }
 0x64d   : > { %v1573_v31 = vsel %vm1551_vm8, %v6377_v30, 0.0 }
 0x64e   : > { %1574 = vadd.xlane.f32.xlu0 %v1573_v31 }
 0x650   : > { %v6379_v32 = vpop.eup %6378 }
 0x651   : > { %v1576_v33 = vsel %vm1551_vm8, %v6379_v32, 0.0  ;;  %v6381_v34 = vpop.eup %6380 }
 0x652   : > { %1577 = vadd.xlane.f32.xlu1 %v1576_v33  ;;  %v1570_v35 = vsel %vm1551_vm8, %v6381_v34, 0.0 }
 0x656   : > { %1571 = vadd.xlane.f32.xlu1 %v1570_v35 }
 0x664   : > { %1589 = vrot.lane.b32.xlu0 %v7046_v55, %s8021_s4 }
 0x667   : > { %1587 = vrot.lane.b32.xlu1 %v7050_v62, %s8021_s4  ;;  %s8089_s4 = smov 120  }
 0x668   : > { %1652 = vrot.lane.b32.xlu0 %v7052_v63, %s8027_s0 }
 0x66b   : > { %1658 = vrot.lane.b32.xlu1 %v7046_v55, %s8023_s7 }
 0x66f   : > { %1656 = vrot.lane.b32.xlu1 %v7050_v62, %s8023_s7  ;;  %s8025_s7 = smov 24  }
 0x673   : > { %1654 = vrot.lane.b32.xlu1 %v7062_v8, %s8027_s0  ;;  %s6179_s0 = smul.u32 24, %s6919_s9  ;;  %s8094_s9 = smov 112  }
 0x6d7   : > { %v1575_v37 = vpop.xlane.xlu0 %1574 }
 0x6db   : > { %v1590_v38 = vpop.permute.xlu0 %1589  ;;  %v1578_v40 = vpop.xlane.xlu1 %1577 }
 0x6dc   : > { %6144 = vmatprep.subr.msk.bf16.mxu0 %vm1598_vm9, %v1590_v38  ;;  %v1600_v41 = vsel %vm1598_vm9, %v1590_v38, 0  ;;  %6382 = vrcp.f32 %v1578_v40 }
 0x6dd   : > { %5813 = vmatpush3.bf16.msra.mxu0 %v1600_v41  ;;  %6384 = vrcp.f32 %v1575_v37 }
 0x6df   : > { %v1572_v42 = vpop.xlane.xlu1 %1571  ;;  %v1653_v53 = vpop.permute.xlu0 %1652 }
 0x6e0   : > { %6386 = vrcp.f32 %v1572_v42 }
 0x6e3   : > { %v1588_v43 = vpop.permute.xlu1 %1587 }
 0x6e4   : > { %5814 = vmatprep.subr.bf16.mxu0 %v1588_v43 }
 0x6e5   : > { %5815 = vmatpush3.bf16.msra.mxu0 %v1588_v43 }
 0x6e7   : > { %v1659_v44 = vpop.permute.xlu1 %1658 }
 0x6e8   : > { %6145 = vmatprep.subr.msk.bf16.mxu0 %vm1490_vm6, %v1659_v44  ;;  %v1670_v54 = vsel %vm1490_vm6, %v1659_v44, 0 }
 0x6e9   : > { %v6383_v45 = vpop.eup %6382 }
 0x6ea   : > { %v6385_v46 = vpop.eup %6384  ;;  %v1584_v48 = vmul.f32 %v6383_v45, %v6379_v32 }
 0x6eb   : > { %v1583_v50 = vmul.f32 %v6385_v46, %v6377_v30  ;;  %v1657_v56 = vpop.permute.xlu1 %1656 }
 0x6ec   : > { %v1586_v52 = vpack.c.bf16 %v1584_v48, %v1584_v48  ;;  %v1667_v57 = vsel %vm1490_vm6, %v1657_v56, 0 }
 0x6ed   : > { %v6387_v47 = vpop.eup %6386 }
 0x6ee   : > { %v1582_v49 = vmul.f32 %v6387_v47, %v6381_v34 }
 0x6ef   : > { %v1655_v58 = vpop.permute.xlu1 %1654 }
 0x6f0   : > { %v1585_v51 = vpack.c.bf16 %v1583_v50, %v1582_v49 }
 0x6f2   : > { %5816 = vmatprep.mubr.msk.bf16.mxu0 %vm1551_vm8, %v1585_v51 }
 0x6f3   : > { %5817 = vmatmul.mubr.msk.bf16.vlgmr.msra.gmra.mxu0 %vm1551_vm8, %v1586_v52 }
 0x6f4   : > { %5821 = vmatpush3.bf16.xpose.msra.mxu0 %v1670_v54  ;;  %5824 = vmatprep.mubr.msk.bf16.mxu0 %vm1490_vm6, %v1653_v53 }
 0x6f5   : > { %6146 = vmatprep.subr.msk.bf16.mxu0 %vm1490_vm6, %v1657_v56 }
 0x6fc   : > { %5823 = vmatpush3.bf16.xpose.msra.mxu0 %v1667_v57 }
 0x703   : > { %5825 = vmatmul.mubr.msk.bf16.vlgmr.msra.gmra.mxu0 %vm1490_vm6, %v1655_v58 }
 0x7b3   : > { %v7100_v59 = vpop.f32.mrf.mxu0 }
 0x7b5   : > { %v7102_v60 = vpop.f32.mrf.mxu0 }
 0x7b7   : > { %v5819_v61 = vpop.f32.mrf.mxu0 }
 0x7b9   : > { %v7104_v0 = vpop.f32.mrf.mxu0 }
 0x7c3   : > { %v5826_v3 = vpop.f32.mrf.mxu0 }
 0x7c4   : > { %v1715_v9 = vadd.f32 %v5826_v3, %v7067_v12 }
 0x7c5   : > { %v1706_v4 = vpop.f32.mrf.mxu0 }
 0x7c6   : > { %v1707_v6 = vadd.f32 %v1706_v4, %v7067_v12  ;;  %v1726_v15 = vsel %vm1551_vm8, %v1715_v9, -inf }
 0x7c7   : > { %v5827_v7 = vpop.f32.mrf.mxu0 }
 0x7c8   : > { %v1720_v10 = vsel %vm1551_vm8, %v1707_v6, -inf }
 0x7c9   : > { %v1709_v11 = vpop.f32.mrf.mxu0  ;;  %1721 = vmax.xlane.f32.xlu0 %v1720_v10 }
 0x7ca   : > { %v1710_v13 = vadd.f32 %v1709_v11, %v7067_v12 }
 0x7cc   : > { %v1723_v14 = vsel %vm1551_vm8, %v1710_v13, -inf }
 0x7cd   : > { %1724 = vmax.xlane.f32.xlu1 %v1723_v14  ;;  %1727 = vmax.xlane.f32.xlu0 %v1726_v15 }
 0x852   : > { %v1722_v16 = vpop.xlane.xlu0 %1721 }
 0x853   : > { %v1729_v17 = vsub.f32 %v1707_v6, %v1722_v16 }
 0x855   : > { %v1732_v18 = vmul.f32 1.442695, %v1729_v17 }
 0x856   : > { %v1725_v19 = vpop.xlane.xlu1 %1724  ;;  %v1728_v39 = vpop.xlane.xlu0 %1727 }
 0x857   : > { %6388 = vpow2.f32 %v1732_v18  ;;  %v1730_v20 = vsub.f32 %v1710_v13, %v1725_v19  ;;  %v1731_v21 = vsub.f32 %v1715_v9, %v1728_v39 }
 0x859   : > { %v1734_v22 = vmul.f32 1.442695, %v1730_v20  ;;  %v1736_v23 = vmul.f32 1.442695, %v1731_v21 }
 0x85b   : > { %6390 = vpow2.f32 %v1734_v22 }
 0x85c   : > { %6392 = vpow2.f32 %v1736_v23 }
 0x864   : > { %v6389_v24 = vpop.eup %6388 }
 0x865   : > { %v1738_v25 = vsel %vm1551_vm8, %v6389_v24, 0.0 }
 0x866   : > { %1739 = vadd.xlane.f32.xlu0 %v1738_v25 }
 0x868   : > { %v6391_v26 = vpop.eup %6390 }
 0x869   : > { %v6393_v27 = vpop.eup %6392  ;;  %v1741_v28 = vsel %vm1551_vm8, %v6391_v26, 0.0 }
 0x86a   : > { %1742 = vadd.xlane.f32.xlu0 %v1741_v28  ;;  %v1744_v29 = vsel %vm1551_vm8, %v6393_v27, 0.0 }
 0x86b   : > { %1745 = vadd.xlane.f32.xlu1 %v1744_v29 }
 0x87c   : > { %1755 = vrot.lane.b32.xlu1 %v7050_v62, %s8007_s2 }
 0x880   : > { %1823 = vrot.lane.b32.xlu1 %v7046_v55, %s8005_s28  ;;  %1757 = vrot.lane.b32.xlu0 %v7046_v55, %s8007_s2  ;;  %s8009_s2 = smov 104  }
 0x884   : > { %1821 = vrot.lane.b32.xlu1 %v7050_v62, %s8005_s28  ;;  %1817 = vrot.lane.b32.xlu0 %v7052_v63, %s8003_s27  ;;  %s8011_s28 = smov 72  }
 0x888   : > { %1819 = vrot.lane.b32.xlu1 %v7062_v8, %s8003_s27  ;;  %s8013_s27 = smov 48  }
 0x8ef   : > { %v1740_v30 = vpop.xlane.xlu0 %1739 }
 0x8f0   : > { %6394 = vrcp.f32 %v1740_v30 }
 0x8f3   : > { %v1743_v31 = vpop.xlane.xlu0 %1742 }
 0x8f4   : > { %v1746_v32 = vpop.xlane.xlu1 %1745  ;;  %6396 = vrcp.f32 %v1743_v31 }
 0x8f5   : > { %6398 = vrcp.f32 %v1746_v32 }
 0x8f7   : > { %v1758_v33 = vpop.permute.xlu0 %1757 }
 0x8f8   : > { %v1756_v34 = vpop.permute.xlu1 %1755  ;;  %6147 = vmatprep.subr.msk.bf16.mxu1 %vm1598_vm9, %v1758_v33  ;;  %v1767_v35 = vsel %vm1598_vm9, %v1758_v33, 0 }
 0x8f9   : > { %5829 = vmatpush3.bf16.msra.mxu1 %v1767_v35 }
 0x8fa   : > { %5830 = vmatprep.subr.bf16.mxu1 %v1756_v34 }
 0x8fb   : > { %v1818_v47 = vpop.permute.xlu0 %1817 }
 0x8fc   : > { %v1824_v37 = vpop.permute.xlu1 %1823 }
 0x8fd   : > { %5831 = vmatpush3.bf16.msra.mxu1 %v1756_v34  ;;  %v6395_v38 = vpop.eup %6394  ;;  %v1835_v48 = vsel %vm1490_vm6, %v1824_v37, 0 }
 0x8fe   : > { %6148 = vmatprep.subr.msk.bf16.mxu1 %vm1490_vm6, %v1824_v37  ;;  %v1750_v42 = vmul.f32 %v6395_v38, %v6389_v24 }
 0x900   : > { %v1822_v49 = vpop.permute.xlu1 %1821 }
 0x901   : > { %v6397_v40 = vpop.eup %6396  ;;  %v1832_v50 = vsel %vm1490_vm6, %v1822_v49, 0 }
 0x902   : > { %v6399_v41 = vpop.eup %6398  ;;  %v1751_v43 = vmul.f32 %v6397_v40, %v6391_v26 }
 0x903   : > { %v1752_v44 = vmul.f32 %v6399_v41, %v6393_v27 }
 0x904   : > { %v1753_v45 = vpack.c.bf16 %v1751_v43, %v1750_v42  ;;  %v1820_v51 = vpop.permute.xlu1 %1819 }
 0x905   : > { %v1754_v46 = vpack.c.bf16 %v1752_v44, %v1752_v44 }
 0x906   : > { %5832 = vmatprep.mubr.msk.bf16.mxu1 %vm1551_vm8, %v1753_v45 }
 0x907   : > { %5833 = vmatmul.mubr.msk.bf16.vlgmr.msra.gmra.mxu1 %vm1551_vm8, %v1754_v46 }
 0x908   : > { %5837 = vmatpush3.bf16.xpose.msra.mxu1 %v1835_v48  ;;  %5840 = vmatprep.mubr.msk.bf16.mxu1 %vm1490_vm6, %v1818_v47 }
 0x909   : > { %6149 = vmatprep.subr.msk.bf16.mxu1 %vm1490_vm6, %v1822_v49 }
 0x910   : > { %5839 = vmatpush3.bf16.xpose.msra.mxu1 %v1832_v50 }
 0x917   : > { %5841 = vmatmul.mubr.msk.bf16.vlgmr.msra.gmra.mxu1 %vm1490_vm6, %v1820_v51 }
 0x9c7   : > { %v7137_v52 = vpop.f32.mrf.mxu1 }
 0x9c9   : > { %v7139_v53 = vpop.f32.mrf.mxu1 }
 0x9cb   : > { %v5835_v54 = vpop.f32.mrf.mxu1 }
 0x9cd   : > { %v7141_v56 = vpop.f32.mrf.mxu1 }
 0x9ce   : > { %v6236_v57 = vpack.i.bf16 %v7141_v56, %v7139_v53 }
 0x9d7   : > { %v5842_v58 = vpop.f32.mrf.mxu1 }
 0x9d8   : > { %v1880_v6 = vadd.f32 %v5842_v58, %v7067_v12 }
 0x9d9   : > { %v1871_v61 = vpop.f32.mrf.mxu1 }
 0x9da   : > { %v1872_v3 = vadd.f32 %v1871_v61, %v7067_v12  ;;  %v1891_v13 = vsel %vm1551_vm8, %v1880_v6, -inf }
 0x9db   : > { %v5843_v4 = vpop.f32.mrf.mxu1 }
 0x9dc   : > { %v1885_v7 = vsel %vm1551_vm8, %v1872_v3, -inf }
 0x9dd   : > { %v1874_v9 = vpop.f32.mrf.mxu1  ;;  %1886 = vmax.xlane.f32.xlu0 %v1885_v7 }
 0x9de   : > { %v1875_v10 = vadd.f32 %v1874_v9, %v7067_v12 }
 0x9e0   : > { %v1888_v11 = vsel %vm1551_vm8, %v1875_v10, -inf }
 0x9e1   : > { %1889 = vmax.xlane.f32.xlu1 %v1888_v11  ;;  %1892 = vmax.xlane.f32.xlu0 %v1891_v13 }
 0xa66   : > { %v1887_v14 = vpop.xlane.xlu0 %1886 }
 0xa67   : > { %v1894_v15 = vsub.f32 %v1872_v3, %v1887_v14 }
 0xa69   : > { %v1897_v16 = vmul.f32 1.442695, %v1894_v15 }
 0xa6a   : > { %v1890_v17 = vpop.xlane.xlu1 %1889  ;;  %v1893_v18 = vpop.xlane.xlu0 %1892 }
 0xa6b   : > { %6400 = vpow2.f32 %v1897_v16  ;;  %v1895_v19 = vsub.f32 %v1875_v10, %v1890_v17  ;;  %v1896_v39 = vsub.f32 %v1880_v6, %v1893_v18 }
 0xa6d   : > { %v1899_v20 = vmul.f32 1.442695, %v1895_v19  ;;  %v1901_v21 = vmul.f32 1.442695, %v1896_v39 }
 0xa6f   : > { %6402 = vpow2.f32 %v1899_v20 }
 0xa70   : > { %6404 = vpow2.f32 %v1901_v21 }
 0xa78   : > { %v6401_v22 = vpop.eup %6400 }
 0xa79   : > { %v1903_v23 = vsel %vm1551_vm8, %v6401_v22, 0.0 }
 0xa7a   : > { %1904 = vadd.xlane.f32.xlu0 %v1903_v23 }
 0xa7c   : > { %v6403_v24 = vpop.eup %6402 }
 0xa7d   : > { %v6405_v25 = vpop.eup %6404  ;;  %v1906_v26 = vsel %vm1551_vm8, %v6403_v24, 0.0 }
 0xa7e   : > { %1907 = vadd.xlane.f32.xlu0 %v1906_v26  ;;  %v1909_v27 = vsel %vm1551_vm8, %v6405_v25, 0.0 }
 0xa7f   : > { %1910 = vadd.xlane.f32.xlu1 %v1909_v27 }
 0xa90   : > { %1920 = vrot.lane.b32.xlu1 %v7050_v62, %s8013_s27 }
 0xa94   : > { %1988 = vrot.lane.b32.xlu1 %v7046_v55, %s8011_s28  ;;  %1922 = vrot.lane.b32.xlu0 %v7046_v55, %s8013_s27  ;;  %s8015_s27 = smov 16  }
 0xa98   : > { %1986 = vrot.lane.b32.xlu1 %v7050_v62, %s8011_s28  ;;  %1982 = vrot.lane.b32.xlu0 %v7052_v63, %s8009_s2  ;;  %s8017_s28 = smov 8  }
 0xa9c   : > { %1984 = vrot.lane.b32.xlu1 %v7062_v8, %s8009_s2  ;;  %s8019_s2 = smov 40  }
 0xb03   : > { %v1905_v28 = vpop.xlane.xlu0 %1904 }
 0xb04   : > { %6406 = vrcp.f32 %v1905_v28 }
 0xb07   : > { %v1908_v29 = vpop.xlane.xlu0 %1907 }
 0xb08   : > { %v1911_v30 = vpop.xlane.xlu1 %1910  ;;  %6408 = vrcp.f32 %v1908_v29 }
 0xb09   : > { %6410 = vrcp.f32 %v1911_v30 }
 0xb0b   : > { %v1923_v31 = vpop.permute.xlu0 %1922 }
 0xb0c   : > { %v1921_v32 = vpop.permute.xlu1 %1920  ;;  %6150 = vmatprep.subr.msk.bf16.mxu0 %vm1598_vm9, %v1923_v31  ;;  %v1932_v33 = vsel %vm1598_vm9, %v1923_v31, 0 }
 0xb0d   : > { %5845 = vmatpush3.bf16.msra.mxu0 %v1932_v33 }
 0xb0e   : > { %5846 = vmatprep.subr.bf16.mxu0 %v1921_v32 }
 0xb0f   : > { %v1983_v43 = vpop.permute.xlu0 %1982 }
 0xb10   : > { %v1989_v34 = vpop.permute.xlu1 %1988 }
 0xb11   : > { %5847 = vmatpush3.bf16.msra.mxu0 %v1921_v32  ;;  %v6407_v63 = vpop.eup %6406  ;;  %v2000_v44 = vsel %vm1490_vm6, %v1989_v34, 0 }
 0xb12   : > { %6151 = vmatprep.subr.msk.bf16.mxu0 %vm1490_vm6, %v1989_v34  ;;  %v1915_v37 = vmul.f32 %v6407_v63, %v6401_v22 }
 0xb14   : > { %v1987_v45 = vpop.permute.xlu1 %1986 }
 0xb15   : > { %v6409_v8 = vpop.eup %6408  ;;  %v1997_v46 = vsel %vm1490_vm6, %v1987_v45, 0 }
 0xb16   : > { %v6411_v35 = vpop.eup %6410  ;;  %v1916_v38 = vmul.f32 %v6409_v8, %v6403_v24  ;;  %v6319_v8 = vld [vmem:[%s7972_s11 + $0x8] sm:$0xff]  }
 0xb17   : > { %v1917_v40 = vmul.f32 %v6411_v35, %v6405_v25  ;;  %v6320_v35 = vld [vmem:[%s7972_s11] sm:$0xff]  }
 0xb18   : > { %v1918_v41 = vpack.c.bf16 %v1916_v38, %v1915_v37  ;;  %v1985_v47 = vpop.permute.xlu1 %1984 }
 0xb19   : > { %v1919_v42 = vpack.c.bf16 %v1917_v40, %v1917_v40 }
 0xb1a   : > { %5848 = vmatprep.mubr.msk.bf16.mxu0 %vm1551_vm8, %v1918_v41 }
 0xb1b   : > { %5849 = vmatmul.mubr.msk.bf16.vlgmr.msra.gmra.mxu0 %vm1551_vm8, %v1919_v42 }
 0xb1c   : > { %5853 = vmatpush3.bf16.xpose.msra.mxu0 %v2000_v44  ;;  %5856 = vmatprep.mubr.msk.bf16.mxu0 %vm1490_vm6, %v1983_v43 }
 0xb1d   : > { %6152 = vmatprep.subr.msk.bf16.mxu0 %vm1490_vm6, %v1987_v45 }
 0xb24   : > { %5855 = vmatpush3.bf16.xpose.msra.mxu0 %v1997_v46 }
 0xb2b   : > { %5857 = vmatmul.mubr.msk.bf16.vlgmr.msra.gmra.mxu0 %vm1490_vm6, %v1985_v47 }
 0xbdb   : > { %v5850_v48 = vpop.f32.mrf.mxu0 }
 0xbdd   : > { %v1968_v49 = vpop.f32.mrf.mxu0 }
 0xbdf   : > { %v5851_v50 = vpop.f32.mrf.mxu0 }
 0xbe1   : > { %v1971_v51 = vpop.f32.mrf.mxu0 }
 0xbe2   : > { %v6241_v54 = vpack.i.bf16 %v1971_v51, %v1968_v49 }
 0xbeb   : > { %v5858_v58 = vpop.f32.mrf.mxu0 }
 0xbec   : > { %v2045_v6 = vadd.f32 %v5858_v58, %v7067_v12 }
 0xbed   : > { %v2036_v61 = vpop.f32.mrf.mxu0 }
 0xbee   : > { %v2037_v3 = vadd.f32 %v2036_v61, %v7067_v12  ;;  %v2056_v13 = vsel %vm1551_vm8, %v2045_v6, -inf }
 0xbef   : > { %v5859_v4 = vpop.f32.mrf.mxu0 }
 0xbf0   : > { %v2050_v7 = vsel %vm1551_vm8, %v2037_v3, -inf }
 0xbf1   : > { %v2039_v9 = vpop.f32.mrf.mxu0  ;;  %2051 = vmax.xlane.f32.xlu0 %v2050_v7 }
 0xbf2   : > { %v2040_v10 = vadd.f32 %v2039_v9, %v7067_v12 }
 0xbf4   : > { %v2053_v11 = vsel %vm1551_vm8, %v2040_v10, -inf }
 0xbf5   : > { %2054 = vmax.xlane.f32.xlu1 %v2053_v11  ;;  %2057 = vmax.xlane.f32.xlu0 %v2056_v13 }
 0xc7a   : > { %v2052_v14 = vpop.xlane.xlu0 %2051 }
 0xc7b   : > { %v2059_v15 = vsub.f32 %v2037_v3, %v2052_v14 }
 0xc7d   : > { %v2062_v16 = vmul.f32 1.442695, %v2059_v15  ;;  %v5364_v15 = vld [vmem:[%s8083_s12] ss:$0 sm:$0xff] }
 0xc7e   : > { %v2055_v17 = vpop.xlane.xlu1 %2054  ;;  %v2058_v18 = vpop.xlane.xlu0 %2057 }
 0xc7f   : > { %6412 = vpow2.f32 %v2062_v16  ;;  %v2060_v19 = vsub.f32 %v2040_v10, %v2055_v17  ;;  %v2061_v39 = vsub.f32 %v2045_v6, %v2058_v18 }
 0xc81   : > { %v2064_v20 = vmul.f32 1.442695, %v2060_v19  ;;  %v2066_v21 = vmul.f32 1.442695, %v2061_v39 }
 0xc83   : > { %6414 = vpow2.f32 %v2064_v20 }
 0xc84   : > { %6416 = vpow2.f32 %v2066_v21 }
 0xc8c   : > { %v6413_v22 = vpop.eup %6412 }
 0xc8d   : > { %v2068_v23 = vsel %vm1551_vm8, %v6413_v22, 0.0 }
 0xc8e   : > { %2069 = vadd.xlane.f32.xlu0 %v2068_v23 }
 0xc90   : > { %v6415_v24 = vpop.eup %6414 }
 0xc91   : > { %v6417_v25 = vpop.eup %6416  ;;  %v2071_v26 = vsel %vm1551_vm8, %v6415_v24, 0.0 }
 0xc92   : > { %2072 = vadd.xlane.f32.xlu0 %v2071_v26  ;;  %v2074_v27 = vsel %vm1551_vm8, %v6417_v25, 0.0 }
 0xc93   : > { %2075 = vadd.xlane.f32.xlu1 %v2074_v27 }
 0xca4   : > { %2085 = vrot.lane.b32.xlu1 %v7050_v62, %s8019_s2 }
 0xca8   : > { %6237 = vrot.lane.b32.xlu1 %v6236_v57, %s8017_s28  ;;  %2087 = vrot.lane.b32.xlu0 %v7046_v55, %s8019_s2  ;;  %s8091_s2 = smov 64  }
 0xcac   : > { %2154 = vrot.lane.b32.xlu1 %v7137_v52, %s8017_s28  ;;  %6242 = vrot.lane.b32.xlu0 %v6241_v54, %s8015_s27  ;;  %s7295_s28 = scalar_lea.vmem %s8087_s10, %s6179_s0  ;;  %s8090_s0 = smov 88  }
 0xcad   : > { %s8093_s10 = smov 80  }
 0xcb0   : > { %2166 = vrot.lane.b32.xlu1 %v5850_v48, %s8015_s27  ;;  %s8095_s27 = smov 48  }
 0xd17   : > { %v2070_v28 = vpop.xlane.xlu0 %2069 }
 0xd18   : > { %6418 = vrcp.f32 %v2070_v28 }
 0xd1b   : > { %v2073_v62 = vpop.xlane.xlu0 %2072 }
 0xd1c   : > { %v2076_v29 = vpop.xlane.xlu1 %2075  ;;  %6420 = vrcp.f32 %v2073_v62 }
 0xd1d   : > { %6422 = vrcp.f32 %v2076_v29 }
 0xd1f   : > { %v2088_v30 = vpop.permute.xlu0 %2087 }
 0xd20   : > { %6153 = vmatprep.subr.msk.bf16.mxu1 %vm1598_vm9, %v2088_v30  ;;  %v2097_v53 = vsel %vm1598_vm9, %v2088_v30, 0  ;;  %v2086_v55 = vpop.permute.xlu1 %2085 }
 0xd21   : > { %5861 = vmatpush3.bf16.msra.mxu1 %v2097_v53 }
 0xd22   : > { %5862 = vmatprep.subr.bf16.mxu1 %v2086_v55 }
 0xd23   : > { %v6243_v47 = vpop.permute.xlu0 %6242 }
 0xd24   : > { %v6238_v43 = vpop.permute.xlu1 %6237  ;;  %v6245_v49 = vunpack.i.h.bf16 %v6243_v47  ;;  %v6244_v50 = vunpack.i.l.bf16 %v6243_v47 }
 0xd25   : > { %5863 = vmatpush3.bf16.msra.mxu1 %v2086_v55  ;;  %v6419_v52 = vpop.eup %6418  ;;  %v6240_v45 = vunpack.i.h.bf16 %v6238_v43  ;;  %v6239_v46 = vunpack.i.l.bf16 %v6238_v43 }
 0xd26   : > { %v2080_v31 = vmul.f32 %v6419_v52, %v6413_v22  ;;  %5868 = vmatprep.subr.bf16.mxu1 %v6319_v8 }
 0xd27   : > { %v2184_v51 = vsel %vm1490_vm6, %v7104_v0, %v6240_v45  ;;  %v2183_v54 = vsel %vm1490_vm6, %v7102_v60, %v6239_v46  ;;  %v5369_v46 = vld [vmem:[%s8085_s13] ss:$0 sm:$0xff] }
 0xd28   : > { %v2155_v44 = vpop.permute.xlu1 %2154  ;;  %v2188_v9 = vsel %vm2186_vm10, %v2184_v51, %v6245_v49  ;;  %v2187_v10 = vsel %vm2186_vm10, %v2183_v54, %v6244_v50  ;;  %v5370_v54 = vld [vmem:[%s8086_s14] ss:$0 sm:$0xff] }
 0xd29   : > { %v6421_v56 = vpop.eup %6420  ;;  %v2185_v61 = vsel %vm1490_vm6, %v7100_v59, %v2155_v44 }
 0xd2a   : > { %v6423_v57 = vpop.eup %6422  ;;  %v2081_v32 = vmul.f32 %v6421_v56, %v6415_v24 }
 0xd2b   : > { %v2082_v33 = vmul.f32 %v6423_v57, %v6417_v25 }
 0xd2c   : > { %v2083_v34 = vpack.c.bf16 %v2081_v32, %v2080_v31  ;;  %v2167_v48 = vpop.permute.xlu1 %2166 }
 0xd2d   : > { %v2084_v63 = vpack.c.bf16 %v2082_v33, %v2082_v33  ;;  %v2189_v4 = vsel %vm2186_vm10, %v2185_v61, %v2167_v48  ;;  %v6321_v33 = vld [vmem:[%s8084_s15 + $0x8] sm:$0xff]  }
 0xd2e   : > { %5864 = vmatprep.mubr.msk.bf16.mxu1 %vm1551_vm8, %v2083_v34  ;;  %v6322_v34 = vld [vmem:[%s8084_s15] sm:$0xff]   ;;  %5876 = vmatprep.subr.bf16.mxu0 %v6321_v33 }
 0xd2f   : > { %5865 = vmatmul.mubr.msk.bf16.vlgmr.msra.gmra.mxu1 %vm1551_vm8, %v2084_v63  ;;  %5877 = vmatpush3.bf16.msra.mxu0 %v6321_v33 }
 0xd30   : > { %5869 = vmatpush3.bf16.msra.mxu1 %v6319_v8  ;;  %5878 = vmatprep.subr.bf16.mxu0 %v6322_v34 }
 0xd31   : > { %5870 = vmatprep.subr.bf16.mxu1 %v6320_v35 }
 0xd33   : > { %5879 = vmatpush3.bf16.msra.mxu0 %v6322_v34 }
 0xd34   : > { %5871 = vmatpush3.bf16.msra.mxu1 %v6320_v35 }
 0xdef   : > { %v5866_v37 = vpop.f32.mrf.mxu1 }
 0xdf0   : > { %2178 = vrot.lane.b32.xlu1 %v5866_v37, %s8025_s7 }
 0xdf1   : > { %v2133_v38 = vpop.f32.mrf.mxu1 }
 0xdf3   : > { %v5867_v40 = vpop.f32.mrf.mxu1 }
 0xdf5   : > { %v2136_v41 = vpop.f32.mrf.mxu1 }
 0xdf6   : > { %v6246_v42 = vpack.i.bf16 %v2136_v41, %v2133_v38 }
 0xdf8   : > { %6247 = vrot.lane.b32.xlu0 %v6246_v42, %s8025_s7  ;;  %s8088_s7 = smov 96  }
 0xe62   : > { %v2179_v58 = vpop.permute.xlu1 %2178 }
 0xe63   : > { %v2192_v11 = vsel %vm1551_vm8, %v2189_v4, %v2179_v58 }
 0xe64   : > { %v2194_v14 = vpack.c.bf16 %v2192_v11, %v2192_v11  ;;  %v6324_v11 = vld [vmem:[%s7978_s17 + $0x30] sm:$0xff]  }
 0xe6a   : > { %v6248_v3 = vpop.permute.xlu0 %6247 }
 0xe6b   : > { %v6250_v6 = vunpack.i.h.bf16 %v6248_v3  ;;  %v6249_v7 = vunpack.i.l.bf16 %v6248_v3 }
 0xe6d   : > { %v2190_v0 = vsel %vm1551_vm8, %v2187_v10, %v6249_v7  ;;  %v2191_v60 = vsel %vm1551_vm8, %v2188_v9, %v6250_v6  ;;  %v6323_v10 = vld [vmem:[%s7978_s17 + $0x38] sm:$0xff]  }
 0xe6e   : > { %v2193_v13 = vpack.c.bf16 %v2191_v60, %v2190_v0  ;;  %5884 = vmatprep.subr.bf16.mxu1 %v6323_v10  ;;  %v6325_v0 = vld [vmem:[%s7978_s17 + $0x28] sm:$0xff]   ;;  %v6326_v60 = vld [vmem:[%s7978_s17 + $0x20] sm:$0xff]  }
 0xe70   : > { %5872 = vmatprep.mubr.msk.bf16.mxu1 %vm1244_vm3, %v2193_v13  ;;  %v6327_v13 = vld [vmem:[%s7978_s17 + $0x18] sm:$0xff]  }
 0xe71   : > { %5873 = vmatmul.mubr.msk.bf16.vlgmr.msra.gmra.mxu1 %vm1244_vm3, %v2194_v14  ;;  %v6328_v14 = vld [vmem:[%s7978_s17 + $0x10] sm:$0xff]  }
 0xe72   : > { %5885 = vmatpush3.bf16.msra.mxu1 %v6323_v10 }
 0xe73   : > { %5886 = vmatprep.subr.bf16.mxu1 %v6324_v11 }
 0xe76   : > { %5887 = vmatpush3.bf16.msra.mxu1 %v6324_v11 }
 0xe77   : > { %5888 = vmatprep.subr.bf16.mxu1 %v6325_v0 }
 0xe7a   : > { %5889 = vmatpush3.bf16.msra.mxu1 %v6325_v0 }
 0xe7b   : > { %5890 = vmatprep.subr.bf16.mxu1 %v6326_v60 }
 0xe7e   : > { %5891 = vmatpush3.bf16.msra.mxu1 %v6326_v60 }
 0xe7f   : > { %5892 = vmatprep.subr.bf16.mxu1 %v6327_v13 }
 0xe82   : > { %5893 = vmatpush3.bf16.msra.mxu1 %v6327_v13 }
 0xe83   : > { %5894 = vmatprep.subr.bf16.mxu1 %v6328_v14 }
 0xe86   : > { %5895 = vmatpush3.bf16.msra.mxu1 %v6328_v14 }
 0xf31   : > { %v5874_v59 = vpop.f32.mrf.mxu1 }
 0xf32   : > { %v2267_v17 = vadd.f32 %v5874_v59, %v5364_v15  ;;  %v6329_v59 = vld [vmem:[%s7978_s17 + $0x8] sm:$0xff]  }
 0xf33   : > { %v2258_v16 = vpop.f32.mrf.mxu1  ;;  %5896 = vmatprep.subr.bf16.mxu1 %v6329_v59 }
 0xf34   : > { %v2259_v18 = vadd.f32 %v5364_v15, %v2258_v16  ;;  %v7230_v21 = vadd.f32 %v2267_v17, %v7019_v5  ;;  %5897 = vmatpush3.bf16.msra.mxu1 %v6329_v59  ;;  %v5371_v16 = vld [vmem:[%s7977_s16] ss:$0 sm:$0xff] }
 0xf35   : > { %v5875_v19 = vpop.f32.mrf.mxu1 }
 0xf36   : > { %v7227_v39 = vadd.f32 %v2259_v18, %v7011_v1  ;;  %v2283_v26 = vsel %vm1244_vm3, %v7230_v21, 0.0 }
 0xf37   : > { %v2261_v20 = vpop.f32.mrf.mxu1 }
 0xf38   : > { %v2262_v22 = vadd.f32 %v5364_v15, %v2261_v20  ;;  %v2277_v23 = vsel %vm1244_vm3, %v7227_v39, 0.0  ;;  %v6330_v15 = vld [vmem:[%s7978_s17] sm:$0xff]  }
 0xf39   : > { %2278 = vadd.xlane.f32.xlu0 %v2277_v23  ;;  %5898 = vmatprep.subr.bf16.mxu1 %v6330_v15 }
 0xf3a   : > { %v7235_v24 = vadd.f32 %v2262_v22, %v7013_v2  ;;  %5899 = vmatpush3.bf16.msra.mxu1 %v6330_v15 }
 0xf3c   : > { %v2280_v25 = vsel %vm1244_vm3, %v7235_v24, 0.0 }
 0xf3d   : > { %2281 = vadd.xlane.f32.xlu1 %v2280_v25  ;;  %2284 = vadd.xlane.f32.xlu0 %v2283_v26 }
 0xfc2   : > { %v2279_v1 = vpop.xlane.xlu0 %2278 }
 0xfc3   : > { %v2286_v27 = vmul.f32 0.03125, %v2279_v1 }
 0xfc5   : > { %v2289_v5 = vsub.f32 %v7227_v39, %v2286_v27 }
 0xfc6   : > { %v2282_v28 = vpop.xlane.xlu1 %2281  ;;  %v2285_v62 = vpop.xlane.xlu0 %2284 }
 0xfc7   : > { %v2287_v29 = vmul.f32 0.03125, %v2282_v28  ;;  %v2288_v30 = vmul.f32 0.03125, %v2285_v62  ;;  %v2292_v53 = vmul.f32 %v2289_v5, %v2289_v5 }
 0xfc9   : > { %v2290_v2 = vsub.f32 %v7235_v24, %v2287_v29  ;;  %v2291_v55 = vsub.f32 %v7230_v21, %v2288_v30  ;;  %v2295_v52 = vsel %vm1244_vm3, %v2292_v53, 0.0 }
 0xfca   : > { %2296 = vadd.xlane.f32.xlu0 %v2295_v52 }
 0xfcb   : > { %v2293_v56 = vmul.f32 %v2290_v2, %v2290_v2  ;;  %v2294_v57 = vmul.f32 %v2291_v55, %v2291_v55 }
 0xfcd   : > { %v2298_v31 = vsel %vm1244_vm3, %v2293_v56, 0.0  ;;  %v2301_v32 = vsel %vm1244_vm3, %v2294_v57, 0.0 }
 0xfce   : > { %2299 = vadd.xlane.f32.xlu0 %v2298_v31  ;;  %2302 = vadd.xlane.f32.xlu1 %v2301_v32 }
0x1053   : > { %v2297_v63 = vpop.xlane.xlu0 %2296 }
0x1054   : > { %v2304_v8 = vmul.f32 0.03125, %v2297_v63 }
0x1056   : > { %v2307_v35 = vadd.f32 1e-05, %v2304_v8 }
0x1057   : > { %v2303_v37 = vpop.xlane.xlu1 %2302  ;;  %v2300_v38 = vpop.xlane.xlu0 %2299 }
0x1058   : > { %6424 = vrsqrt.f32 %v2307_v35  ;;  %v2306_v40 = vmul.f32 0.03125, %v2303_v37  ;;  %v2305_v41 = vmul.f32 0.03125, %v2300_v38  ;;  %v5379_v35 = vld [vmem:[%s7979_s18] ss:$0 sm:$0xff] }
0x105a   : > { %v2309_v42 = vadd.f32 1e-05, %v2306_v40  ;;  %v2308_v43 = vadd.f32 1e-05, %v2305_v41 }
0x105c   : > { %6426 = vrsqrt.f32 %v2309_v42  ;;  %v1333_v42 = vld [vmem:[%s7295_s28] sm:$0xff] }
0x105d   : > { %6428 = vrsqrt.f32 %v2308_v43 }
0x1065   : > { %v6425_v44 = vpop.eup %6424 }
0x1066   : > { %v2313_v45 = vmul.f32 %v6425_v44, %v2289_v5 }
0x1068   : > { %v2322_v51 = vmul.f32 %v5369_v46, %v2313_v45 }
0x1069   : > { %v6427_v47 = vpop.eup %6426 }
0x106a   : > { %v6429_v48 = vpop.eup %6428  ;;  %v2315_v49 = vmul.f32 %v6427_v47, %v2291_v55  ;;  %v2331_v4 = vadd.f32 %v5370_v54, %v2322_v51 }
0x106b   : > { %v2314_v50 = vmul.f32 %v6429_v48, %v2290_v2 }
0x106c   : > { %v2324_v58 = vmul.f32 %v5369_v46, %v2315_v49 }
0x106d   : > { %v2323_v61 = vmul.f32 %v5369_v46, %v2314_v50  ;;  %v1335_v46 = vld [vmem:[%s7295_s28 + $0x10] sm:$0xff]  ;;  %v1334_v50 = vld [vmem:[%s7295_s28 + $0x8] sm:$0xff] }
0x106e   : > { %v2333_v3 = vadd.f32 %v5370_v54, %v2324_v58 }
0x106f   : > { %v2332_v6 = vadd.f32 %v5370_v54, %v2323_v61 }
0x1070   : > { %v2335_v7 = vpack.c.bf16 %v2333_v3, %v2333_v3 }
0x1071   : > { %v2334_v9 = vpack.c.bf16 %v2332_v6, %v2331_v4 }
0x1073   : > { %5880 = vmatprep.mubr.msk.bf16.mxu0 %vm1244_vm3, %v2334_v9 }
0x1074   : > { %5881 = vmatmul.mubr.msk.bf16.vlgmr.msra.gmra.mxu0 %vm1244_vm3, %v2335_v7 }
0x1134   : > { %v5882_v17 = vpop.f32.mrf.mxu0 }
0x1135   : > { %v2408_v18 = vadd.f32 %v5882_v17, %v5371_v16  ;;  %v6331_v17 = vld [vmem:[%s8078_s6 + $0x18] sm:$0xff]  }
0x1136   : > { %v2399_v19 = vpop.f32.mrf.mxu0  ;;  %5904 = vmatprep.subr.bf16.mxu0 %v6331_v17 }
0x1137   : > { %v5378_v20 = vmul.f32 -1.702, %v2408_v18  ;;  %v2400_v22 = vadd.f32 %v5371_v16, %v2399_v19  ;;  %5905 = vmatpush3.bf16.msra.mxu0 %v6331_v17 }
0x1138   : > { %v5883_v23 = vpop.f32.mrf.mxu0 }
0x1139   : > { %v2423_v25 = vmul.f32 1.442695, %v5378_v20  ;;  %v5376_v26 = vmul.f32 -1.702, %v2400_v22 }
0x113a   : > { %v2402_v1 = vpop.f32.mrf.mxu0 }
0x113b   : > { %6430 = vpow2.f32 %v2423_v25  ;;  %v2419_v27 = vmul.f32 1.442695, %v5376_v26  ;;  %v2403_v5 = vadd.f32 %v5371_v16, %v2402_v1 }
0x113d   : > { %6432 = vpow2.f32 %v2419_v27  ;;  %v5377_v28 = vmul.f32 -1.702, %v2403_v5 }
0x113f   : > { %v2421_v62 = vmul.f32 1.442695, %v5377_v28 }
0x1141   : > { %6434 = vpow2.f32 %v2421_v62 }
0x1148   : > { %v6431_v29 = vpop.eup %6430 }
0x1149   : > { %v2427_v53 = vadd.f32 1.0, %v6431_v29  ;;  %v5390_v29 = vld [vmem:[%s8079_s30 + $0x1] ss:$0 sm:$0xff] }
0x114a   : > { %v6433_v30 = vpop.eup %6432 }
0x114b   : > { %v2425_v2 = vadd.f32 1.0, %v6433_v30  ;;  %6436 = vrcp.f32 %v2427_v53 }
0x114d   : > { %6438 = vrcp.f32 %v2425_v2 }
0x114e   : > { %v6435_v55 = vpop.eup %6434 }
0x114f   : > { %v2426_v52 = vadd.f32 1.0, %v6435_v55 }
0x1151   : > { %6440 = vrcp.f32 %v2426_v52 }
0x1158   : > { %v6437_v56 = vpop.eup %6436 }
0x1159   : > { %v2436_v32 = vmul.f32 %v6437_v56, %v2408_v18  ;;  %v6332_v18 = vld [vmem:[%s8078_s6 + $0x10] sm:$0xff]   ;;  %v5391_v56 = vld [vmem:[%s8080_s26 + $0x1] ss:$0 sm:$0xff] }
0x115a   : > { %v6439_v57 = vpop.eup %6438  ;;  %5906 = vmatprep.subr.bf16.mxu0 %v6332_v18 }
0x115b   : > { %v2434_v33 = vmul.f32 %v6439_v57, %v2400_v22  ;;  %v2438_v8 = vpack.c.bf16 %v2436_v32, %v2436_v32  ;;  %5907 = vmatpush3.bf16.msra.mxu0 %v6332_v18 }
0x115e   : > { %v6441_v31 = vpop.eup %6440 }
0x115f   : > { %v2435_v34 = vmul.f32 %v6441_v31, %v2403_v5 }
0x1161   : > { %v2437_v63 = vpack.c.bf16 %v2435_v34, %v2434_v33 }
0x1163   : > { %5900 = vmatprep.mubr.bf16.mxu1 %v2437_v63 }
0x1164   : > { %5901 = vmatmul.mubr.bf16.vlgmr.msra.gmra.mxu1 %v2438_v8 }
0x1224   : > { %v5902_v37 = vpop.f32.mrf.mxu1 }
0x1225   : > { %v2553_v38 = vadd.f32 %v5902_v37, %v5379_v35 }
0x1226   : > { %v2544_v40 = vpop.f32.mrf.mxu1 }
0x1227   : > { %v2545_v41 = vadd.f32 %v5379_v35, %v2544_v40  ;;  %v2560_v44 = vadd.f32 %v2553_v38, %v7230_v21 }
0x1228   : > { %v5903_v43 = vpop.f32.mrf.mxu1 }
0x1229   : > { %v2558_v45 = vadd.f32 %v2545_v41, %v7227_v39  ;;  %v7304_v51 = vmul.f32 %v2560_v44, %v1335_v46 }
0x122a   : > { %v2547_v47 = vpop.f32.mrf.mxu1 }
0x122b   : > { %v7301_v48 = vmul.f32 %v2558_v45, %v1333_v42  ;;  %v2548_v49 = vadd.f32 %v5379_v35, %v2547_v47  ;;  %v2574_v39 = vsel %vm1244_vm3, %v7304_v51, 0.0  ;;  %v5397_v35 = vld [vmem:[%s8082_s5 + $0x1] ss:$0 sm:$0xff] }
0x122d   : > { %v2559_v54 = vadd.f32 %v2548_v49, %v7235_v24  ;;  %v2568_v58 = vsel %vm1244_vm3, %v7301_v48, 0.0 }
0x122e   : > { %2569 = vadd.xlane.f32.xlu0 %v2568_v58 }
0x122f   : > { %v7309_v61 = vmul.f32 %v2559_v54, %v1334_v50 }
0x1231   : > { %v2571_v21 = vsel %vm1244_vm3, %v7309_v61, 0.0 }
0x1232   : > { %2572 = vadd.xlane.f32.xlu1 %v2571_v21  ;;  %2575 = vadd.xlane.f32.xlu0 %v2574_v39 }
0x12b7   : > { %v2570_v3 = vpop.xlane.xlu0 %2569 }
0x12b8   : > { %v2577_v4 = vmul.f32 0.03125, %v2570_v3 }
0x12ba   : > { %v2580_v6 = vsub.f32 %v7301_v48, %v2577_v4 }
0x12bb   : > { %v2573_v7 = vpop.xlane.xlu1 %2572  ;;  %v2576_v24 = vpop.xlane.xlu0 %2575 }
0x12bc   : > { %v2578_v9 = vmul.f32 0.03125, %v2573_v7  ;;  %v2579_v10 = vmul.f32 0.03125, %v2576_v24  ;;  %v2583_v11 = vmul.f32 %v2580_v6, %v2580_v6 }
0x12be   : > { %v2581_v0 = vsub.f32 %v7309_v61, %v2578_v9  ;;  %v2582_v60 = vsub.f32 %v7304_v51, %v2579_v10  ;;  %v2586_v13 = vsel %vm1244_vm3, %v2583_v11, 0.0 }
0x12bf   : > { %2587 = vadd.xlane.f32.xlu1 %v2586_v13 }
0x12c0   : > { %v2584_v14 = vmul.f32 %v2581_v0, %v2581_v0  ;;  %v2585_v59 = vmul.f32 %v2582_v60, %v2582_v60 }
0x12c2   : > { %v2589_v15 = vsel %vm1244_vm3, %v2584_v14, 0.0  ;;  %v2592_v16 = vsel %vm1244_vm3, %v2585_v59, 0.0 }
0x12c3   : > { %2590 = vadd.xlane.f32.xlu0 %v2589_v15  ;;  %2593 = vadd.xlane.f32.xlu1 %v2592_v16 }
0x1348   : > { %v2588_v19 = vpop.xlane.xlu1 %2587 }
0x1349   : > { %v2595_v20 = vmul.f32 0.03125, %v2588_v19 }
0x134b   : > { %v2598_v22 = vadd.f32 1e-05, %v2595_v20 }
0x134c   : > { %v2594_v23 = vpop.xlane.xlu1 %2593  ;;  %v2591_v25 = vpop.xlane.xlu0 %2590 }
0x134d   : > { %6442 = vrsqrt.f32 %v2598_v22  ;;  %v2597_v26 = vmul.f32 0.03125, %v2594_v23  ;;  %v2596_v1 = vmul.f32 0.03125, %v2591_v25 }
0x134f   : > { %v2600_v27 = vadd.f32 1e-05, %v2597_v26  ;;  %v2599_v5 = vadd.f32 1e-05, %v2596_v1 }
0x1351   : > { %6444 = vrsqrt.f32 %v2600_v27 }
0x1352   : > { %6446 = vrsqrt.f32 %v2599_v5 }
0x135a   : > { %v6443_v28 = vpop.eup %6442 }
0x135b   : > { %v2604_v62 = vmul.f32 %v6443_v28, %v2580_v6 }
0x135d   : > { %v2613_v52 = vmul.f32 %v5390_v29, %v2604_v62 }
0x135e   : > { %v6445_v30 = vpop.eup %6444 }
0x135f   : > { %v6447_v53 = vpop.eup %6446  ;;  %v2606_v2 = vmul.f32 %v6445_v30, %v2582_v60  ;;  %v2622_v33 = vadd.f32 %v5391_v56, %v2613_v52 }
0x1360   : > { %v2605_v55 = vmul.f32 %v6447_v53, %v2581_v0 }
0x1361   : > { %v2615_v57 = vmul.f32 %v5390_v29, %v2606_v2 }
0x1362   : > { %v2614_v31 = vmul.f32 %v5390_v29, %v2605_v55 }
0x1363   : > { %v2624_v32 = vadd.f32 %v5391_v56, %v2615_v57 }
0x1364   : > { %v2623_v34 = vadd.f32 %v5391_v56, %v2614_v31 }
0x1365   : > { %v2626_v63 = vpack.c.bf16 %v2624_v32, %v2624_v32 }
0x1366   : > { %v2625_v8 = vpack.c.bf16 %v2623_v34, %v2622_v33 }
0x1368   : > { %5908 = vmatprep.mubr.msk.bf16.mxu0 %vm1244_vm3, %v2625_v8 }
0x1369   : > { %5909 = vmatmul.mubr.msk.bf16.vlgmr.msra.gmra.mxu0 %vm1244_vm3, %v2626_v63 }
0x1429   : > { %v5910_v37 = vpop.f32.mrf.mxu0 }
0x142a   : > { %v2701_v38 = vadd.f32 %v5910_v37, %v5397_v35 }
0x142b   : > { %v2692_v40 = vpop.f32.mrf.mxu0 }
0x142c   : > { %v7338_v41 = vpack.c.bf16 %v2701_v38, %v2701_v38  ;;  %v2693_v43 = vadd.f32 %v5397_v35, %v2692_v40  ;;  %v2708_v54 = vmul.f32 0.35355338, %v2701_v38 }
0x142d   : > { %v5911_v42 = vpop.f32.mrf.mxu0 }
0x142e   : > { %2717 = vrot.lane.b32.xlu0 %v7338_v41, %s8088_s7  ;;  %v2706_v46 = vmul.f32 0.35355338, %v2693_v43  ;;  %v7356_v58 = vpack.c.bf16 %v2708_v54, %v2708_v54 }
0x142f   : > { %v2695_v44 = vpop.f32.mrf.mxu0 }
0x1430   : > { %v2696_v45 = vadd.f32 %v5397_v35, %v2695_v44 }
0x1432   : > { %v2707_v47 = vmul.f32 0.35355338, %v2696_v45  ;;  %v7342_v49 = vpack.c.bf16 %v2696_v45, %v2693_v43 }
0x1434   : > { %v7344_v50 = vpack.c.bf16 %v2707_v47, %v2706_v46  ;;  %2715 = vrot.lane.b32.xlu1 %v7342_v49, %s8088_s7 }
0x1436   : > { %2878 = vrot.lane.b32.xlu0 %v7344_v50, %s8089_s4  ;;  %5916 = vmatprep.mubr.msk.bf16.mxu0 %vm1490_vm6, %v7344_v50 }
0x1438   : > { %2884 = vrot.lane.b32.xlu1 %v7338_v41, %s8090_s0 }
0x143c   : > { %2882 = vrot.lane.b32.xlu1 %v7342_v49, %s8090_s0 }
0x1440   : > { %2880 = vrot.lane.b32.xlu1 %v7356_v58, %s8089_s4 }
0x14a0   : > { %v2718_v21 = vpop.permute.xlu0 %2717 }
0x14a1   : > { %6154 = vmatprep.subr.msk.bf16.mxu0 %vm1490_vm6, %v2718_v21  ;;  %v2729_v39 = vsel %vm1490_vm6, %v2718_v21, 0 }
0x14a2   : > { %5913 = vmatpush3.bf16.xpose.msra.mxu0 %v2729_v39 }
0x14a6   : > { %v2716_v3 = vpop.permute.xlu1 %2715 }
0x14a7   : > { %6155 = vmatprep.subr.msk.bf16.mxu0 %vm1490_vm6, %v2716_v3  ;;  %v2726_v6 = vsel %vm1490_vm6, %v2716_v3, 0 }
0x14a8   : > { %v2879_v4 = vpop.permute.xlu0 %2878 }
0x14a9   : > { %5932 = vmatprep.mubr.msk.bf16.mxu1 %vm1490_vm6, %v2879_v4 }
0x14aa   : > { %5915 = vmatpush3.bf16.xpose.msra.mxu0 %v2726_v6  ;;  %v2885_v7 = vpop.permute.xlu1 %2884 }
0x14ab   : > { %6157 = vmatprep.subr.msk.bf16.mxu1 %vm1490_vm6, %v2885_v7  ;;  %v2896_v24 = vsel %vm1490_vm6, %v2885_v7, 0 }
0x14ac   : > { %5929 = vmatpush3.bf16.xpose.msra.mxu1 %v2896_v24 }
0x14ae   : > { %v2883_v9 = vpop.permute.xlu1 %2882 }
0x14af   : > { %6158 = vmatprep.subr.msk.bf16.mxu1 %vm1490_vm6, %v2883_v9  ;;  %v2893_v10 = vsel %vm1490_vm6, %v2883_v9, 0 }
0x14b1   : > { %5917 = vmatmul.mubr.msk.bf16.vlgmr.msra.gmra.mxu0 %vm1490_vm6, %v7356_v58 }
0x14b2   : > { %v2881_v11 = vpop.permute.xlu1 %2880 }
0x14b4   : > { %5931 = vmatpush3.bf16.xpose.msra.mxu1 %v2893_v10 }
0x14bb   : > { %5933 = vmatmul.mubr.msk.bf16.vlgmr.msra.gmra.mxu1 %vm1490_vm6, %v2881_v11 }
0x1571   : > { %v5918_v0 = vpop.f32.mrf.mxu0 }
0x1572   : > { %v2774_v59 = vadd.f32 %v5918_v0, %v7067_v12 }
0x1573   : > { %v2765_v60 = vpop.f32.mrf.mxu0 }
0x1574   : > { %v2766_v13 = vadd.f32 %v2765_v60, %v7067_v12  ;;  %v2785_v19 = vsel %vm1551_vm8, %v2774_v59, -inf }
0x1575   : > { %v5919_v14 = vpop.f32.mrf.mxu0 }
0x1576   : > { %v2779_v15 = vsel %vm1551_vm8, %v2766_v13, -inf }
0x1577   : > { %v2768_v16 = vpop.f32.mrf.mxu0  ;;  %2780 = vmax.xlane.f32.xlu0 %v2779_v15 }
0x1578   : > { %v2769_v17 = vadd.f32 %v2768_v16, %v7067_v12 }
0x157a   : > { %v2782_v18 = vsel %vm1551_vm8, %v2769_v17, -inf }
0x157b   : > { %v5934_v20 = vpop.f32.mrf.mxu1  ;;  %2783 = vmax.xlane.f32.xlu1 %v2782_v18  ;;  %2786 = vmax.xlane.f32.xlu0 %v2785_v19 }
0x157c   : > { %v2941_v22 = vadd.f32 %v5934_v20, %v7067_v12 }
0x157d   : > { %v2932_v23 = vpop.f32.mrf.mxu1 }
0x157e   : > { %v2933_v25 = vadd.f32 %v2932_v23, %v7067_v12  ;;  %v2952_v26 = vsel %vm1551_vm8, %v2941_v22, -inf }
0x157f   : > { %v5935_v1 = vpop.f32.mrf.mxu1  ;;  %2953 = vmax.xlane.f32.xlu1 %v2952_v26 }
0x1580   : > { %v2946_v27 = vsel %vm1551_vm8, %v2933_v25, -inf }
0x1581   : > { %v2935_v5 = vpop.f32.mrf.mxu1  ;;  %2947 = vmax.xlane.f32.xlu0 %v2946_v27 }
0x1582   : > { %v2936_v28 = vadd.f32 %v2935_v5, %v7067_v12 }
0x1584   : > { %v2949_v62 = vsel %vm1551_vm8, %v2936_v28, -inf }
0x1585   : > { %2950 = vmax.xlane.f32.xlu0 %v2949_v62 }
0x1600   : > { %v2781_v29 = vpop.xlane.xlu0 %2780 }
0x1601   : > { %v2788_v30 = vsub.f32 %v2766_v13, %v2781_v29 }
0x1603   : > { %v2791_v56 = vmul.f32 1.442695, %v2788_v30 }
0x1604   : > { %v2784_v53 = vpop.xlane.xlu1 %2783  ;;  %v2787_v2 = vpop.xlane.xlu0 %2786 }
0x1605   : > { %v2790_v55 = vsub.f32 %v2774_v59, %v2787_v2  ;;  %v2789_v45 = vsub.f32 %v2769_v17, %v2784_v53 }
0x1607   : > { %v2795_v52 = vmul.f32 1.442695, %v2790_v55  ;;  %v2793_v47 = vmul.f32 1.442695, %v2789_v45 }
0x1608   : > { %v2954_v57 = vpop.xlane.xlu1 %2953 }
0x1609   : > { %v2957_v31 = vsub.f32 %v2941_v22, %v2954_v57  ;;  %6448 = vpow2.f32 %v2795_v52 }
0x160a   : > { %6450 = vpow2.f32 %v2791_v56  ;;  %v2948_v38 = vpop.xlane.xlu0 %2947 }
0x160b   : > { %v2962_v32 = vmul.f32 1.442695, %v2957_v31  ;;  %v2955_v43 = vsub.f32 %v2933_v25, %v2948_v38 }
0x160d   : > { %6452 = vpow2.f32 %v2962_v32  ;;  %v2958_v46 = vmul.f32 1.442695, %v2955_v43 }
0x160e   : > { %v2951_v40 = vpop.xlane.xlu0 %2950 }
0x160f   : > { %v2956_v42 = vsub.f32 %v2936_v28, %v2951_v40 }
0x1611   : > { %v2960_v44 = vmul.f32 1.442695, %v2956_v42 }
0x1613   : > { %6454 = vpow2.f32 %v2960_v44 }
0x1614   : > { %6456 = vpow2.f32 %v2958_v46 }
0x1615   : > { %6458 = vpow2.f32 %v2793_v47 }
0x1616   : > { %v7384_v33 = vpop.eup %6448 }
0x1617   : > { %v2803_v34 = vsel %vm1551_vm8, %v7384_v33, 0.0  ;;  %v6451_v63 = vpop.eup %6450 }
0x1618   : > { %2804 = vadd.xlane.f32.xlu0 %v2803_v34  ;;  %v2797_v37 = vsel %vm1551_vm8, %v6451_v63, 0.0 }
0x161a   : > { %v7388_v8 = vpop.eup %6452 }
0x161b   : > { %v2970_v35 = vsel %vm1551_vm8, %v7388_v8, 0.0 }
0x161c   : > { %2971 = vadd.xlane.f32.xlu1 %v2970_v35  ;;  %2798 = vadd.xlane.f32.xlu0 %v2797_v37 }
0x1620   : > { %v6455_v54 = vpop.eup %6454 }
0x1621   : > { %v6457_v21 = vpop.eup %6456  ;;  %v2967_v39 = vsel %vm1551_vm8, %v6455_v54, 0.0 }
0x1622   : > { %v2964_v3 = vsel %vm1551_vm8, %v6457_v21, 0.0  ;;  %v6459_v4 = vpop.eup %6458 }
0x1623   : > { %v2800_v6 = vsel %vm1551_vm8, %v6459_v4, 0.0 }
0x162d   : > { %2814 = vrot.lane.b32.xlu1 %v7342_v49, %s8091_s2 }
0x1631   : > { %2983 = vrot.lane.b32.xlu1 %v7338_v41, %s8092_s1 }
0x1632   : > { %2816 = vrot.lane.b32.xlu0 %v7338_v41, %s8091_s2 }
0x1651   : > { %2968 = vadd.xlane.f32.xlu0 %v2967_v39 }
0x1655   : > { %2965 = vadd.xlane.f32.xlu1 %v2964_v3 }
0x1659   : > { %2801 = vadd.xlane.f32.xlu1 %v2800_v6 }
0x1667   : > { %3049 = vrot.lane.b32.xlu0 %v7338_v41, %s8093_s10 }
0x166a   : > { %2981 = vrot.lane.b32.xlu1 %v7342_v49, %s8092_s1 }
0x166b   : > { %3043 = vrot.lane.b32.xlu0 %v7344_v50, %s8094_s9 }
0x166e   : > { %3047 = vrot.lane.b32.xlu1 %v7342_v49, %s8093_s10 }
0x1672   : > { %3045 = vrot.lane.b32.xlu1 %v7356_v58, %s8094_s9 }
0x16a1   : > { %v2805_v7 = vpop.xlane.xlu0 %2804 }
0x16a2   : > { %6460 = vrcp.f32 %v2805_v7 }
0x16a5   : > { %v2972_v24 = vpop.xlane.xlu1 %2971  ;;  %v2799_v9 = vpop.xlane.xlu0 %2798 }
0x16a6   : > { %6462 = vrcp.f32 %v2799_v9 }
0x16a9   : > { %v2815_v10 = vpop.permute.xlu1 %2814  ;;  %v2817_v11 = vpop.permute.xlu0 %2816 }
0x16aa   : > { %6156 = vmatprep.subr.msk.bf16.mxu0 %vm1598_vm9, %v2817_v11  ;;  %v2826_v0 = vsel %vm1598_vm9, %v2817_v11, 0 }
0x16ab   : > { %5921 = vmatpush3.bf16.msra.mxu0 %v2826_v0 }
0x16ac   : > { %5922 = vmatprep.subr.bf16.mxu0 %v2815_v10 }
0x16ad   : > { %v2984_v60 = vpop.permute.xlu1 %2983 }
0x16ae   : > { %v2993_v62 = vsel %vm1598_vm9, %v2984_v60, 0 }
0x16af   : > { %5923 = vmatpush3.bf16.msra.mxu0 %v2815_v10  ;;  %v6461_v15 = vpop.eup %6460 }
0x16b0   : > { %6159 = vmatprep.subr.msk.bf16.mxu0 %vm1598_vm9, %v2984_v60  ;;  %v2811_v20 = vmul.f32 %v6461_v15, %v7384_v33 }
0x16b2   : > { %v2813_v27 = vpack.c.bf16 %v2811_v20, %v2811_v20 }
0x16b3   : > { %v6463_v16 = vpop.eup %6462 }
0x16b4   : > { %v2809_v22 = vmul.f32 %v6463_v16, %v6451_v63 }
0x16da   : > { %v2969_v14 = vpop.xlane.xlu0 %2968 }
0x16de   : > { %v2966_v13 = vpop.xlane.xlu1 %2965  ;;  %v3050_v30 = vpop.permute.xlu0 %3049 }
0x16df   : > { %6464 = vrcp.f32 %v2966_v13  ;;  %v3061_v52 = vsel %vm1490_vm6, %v3050_v30, 0 }
0x16e0   : > { %6466 = vrcp.f32 %v2969_v14 }
0x16e2   : > { %v2802_v59 = vpop.xlane.xlu1 %2801  ;;  %v3044_v55 = vpop.permute.xlu0 %3043 }
0x16e3   : > { %6468 = vrcp.f32 %v2802_v59 }
0x16e4   : > { %6470 = vrcp.f32 %v2972_v24 }
0x16e6   : > { %v2982_v29 = vpop.permute.xlu1 %2981 }
0x16ea   : > { %v3048_v56 = vpop.permute.xlu1 %3047 }
0x16eb   : > { %v3058_v57 = vsel %vm1490_vm6, %v3048_v56, 0 }
0x16ec   : > { %v6465_v17 = vpop.eup %6464 }
0x16ed   : > { %v6467_v18 = vpop.eup %6466  ;;  %v2976_v25 = vmul.f32 %v6465_v17, %v6457_v21 }
0x16ee   : > { %v2977_v1 = vmul.f32 %v6467_v18, %v6455_v54  ;;  %v3046_v31 = vpop.permute.xlu1 %3045 }
0x16f0   : > { %v6469_v19 = vpop.eup %6468  ;;  %v2979_v28 = vpack.c.bf16 %v2977_v1, %v2976_v25 }
0x16f1   : > { %v2810_v23 = vmul.f32 %v6469_v19, %v6459_v4  ;;  %v6471_v5 = vpop.eup %6470 }
0x16f2   : > { %v2978_v53 = vmul.f32 %v6471_v5, %v7388_v8 }
0x16f3   : > { %v2812_v26 = vpack.c.bf16 %v2810_v23, %v2809_v22 }
0x16f4   : > { %v2980_v2 = vpack.c.bf16 %v2978_v53, %v2978_v53 }
0x16f5   : > { %5924 = vmatprep.mubr.msk.bf16.mxu0 %vm1551_vm8, %v2812_v26 }
0x16f6   : > { %5925 = vmatmul.mubr.msk.bf16.vlgmr.msra.gmra.mxu0 %vm1551_vm8, %v2813_v27 }
0x16f7   : > { %5937 = vmatpush3.bf16.msra.mxu0 %v2993_v62  ;;  %5940 = vmatprep.mubr.msk.bf16.mxu0 %vm1551_vm8, %v2979_v28 }
0x16f8   : > { %5938 = vmatprep.subr.bf16.mxu0 %v2982_v29 }
0x16fb   : > { %5939 = vmatpush3.bf16.msra.mxu0 %v2982_v29 }
0x16fc   : > { %6160 = vmatprep.subr.msk.bf16.mxu0 %vm1490_vm6, %v3050_v30 }
0x16fe   : > { %5941 = vmatmul.mubr.msk.bf16.vlgmr.msra.gmra.mxu0 %vm1551_vm8, %v2980_v2 }
0x16ff   : > { %5945 = vmatpush3.bf16.xpose.msra.mxu0 %v3061_v52  ;;  %5948 = vmatprep.mubr.msk.bf16.mxu0 %vm1490_vm6, %v3044_v55 }
0x1700   : > { %6161 = vmatprep.subr.msk.bf16.mxu0 %vm1490_vm6, %v3048_v56 }
0x1707   : > { %5947 = vmatpush3.bf16.xpose.msra.mxu0 %v3058_v57 }
0x170e   : > { %5949 = vmatmul.mubr.msk.bf16.vlgmr.msra.gmra.mxu0 %vm1490_vm6, %v3046_v31 }
0x17b6   : > { %v7428_v32 = vpop.f32.mrf.mxu0 }
0x17b8   : > { %v7430_v33 = vpop.f32.mrf.mxu0 }
0x17ba   : > { %v5927_v34 = vpop.f32.mrf.mxu0 }
0x17bc   : > { %v7432_v63 = vpop.f32.mrf.mxu0 }
0x17be   : > { %v7434_v8 = vpop.f32.mrf.mxu0 }
0x17c0   : > { %v7436_v35 = vpop.f32.mrf.mxu0 }
0x17c2   : > { %v5943_v37 = vpop.f32.mrf.mxu0 }
0x17c4   : > { %v7438_v38 = vpop.f32.mrf.mxu0 }
0x17c5   : > { %v6251_v40 = vpack.i.bf16 %v7438_v38, %v7436_v35 }
0x17ce   : > { %v5950_v42 = vpop.f32.mrf.mxu0 }
0x17cf   : > { %v3106_v46 = vadd.f32 %v5950_v42, %v7067_v12 }
0x17d0   : > { %v3097_v43 = vpop.f32.mrf.mxu0 }
0x17d1   : > { %v3098_v44 = vadd.f32 %v3097_v43, %v7067_v12  ;;  %v3117_v3 = vsel %vm1551_vm8, %v3106_v46, -inf }
0x17d2   : > { %v5951_v45 = vpop.f32.mrf.mxu0 }
0x17d3   : > { %v3111_v47 = vsel %vm1551_vm8, %v3098_v44, -inf }
0x17d4   : > { %v3100_v54 = vpop.f32.mrf.mxu0  ;;  %3112 = vmax.xlane.f32.xlu0 %v3111_v47 }
0x17d5   : > { %v3101_v21 = vadd.f32 %v3100_v54, %v7067_v12 }
0x17d7   : > { %v3114_v39 = vsel %vm1551_vm8, %v3101_v21, -inf }
0x17d8   : > { %3115 = vmax.xlane.f32.xlu1 %v3114_v39  ;;  %3118 = vmax.xlane.f32.xlu0 %v3117_v3 }
0x185d   : > { %v3113_v4 = vpop.xlane.xlu0 %3112 }
0x185e   : > { %v3120_v6 = vsub.f32 %v3098_v44, %v3113_v4 }
0x1860   : > { %v3123_v7 = vmul.f32 1.442695, %v3120_v6 }
0x1861   : > { %v3116_v24 = vpop.xlane.xlu1 %3115  ;;  %v3119_v9 = vpop.xlane.xlu0 %3118 }
0x1862   : > { %6472 = vpow2.f32 %v3123_v7  ;;  %v3121_v10 = vsub.f32 %v3101_v21, %v3116_v24  ;;  %v3122_v11 = vsub.f32 %v3106_v46, %v3119_v9 }
0x1864   : > { %v3125_v0 = vmul.f32 1.442695, %v3121_v10  ;;  %v3127_v60 = vmul.f32 1.442695, %v3122_v11 }
0x1866   : > { %6474 = vpow2.f32 %v3125_v0 }
0x1867   : > { %6476 = vpow2.f32 %v3127_v60 }
0x186f   : > { %v6473_v13 = vpop.eup %6472 }
0x1870   : > { %v3129_v14 = vsel %vm1551_vm8, %v6473_v13, 0.0 }
0x1871   : > { %3130 = vadd.xlane.f32.xlu0 %v3129_v14 }
0x1873   : > { %v6475_v59 = vpop.eup %6474 }
0x1874   : > { %v6477_v15 = vpop.eup %6476  ;;  %v3132_v16 = vsel %vm1551_vm8, %v6475_v59, 0.0 }
0x1875   : > { %3133 = vadd.xlane.f32.xlu0 %v3132_v16  ;;  %v3135_v17 = vsel %vm1551_vm8, %v6477_v15, 0.0 }
0x1876   : > { %3136 = vadd.xlane.f32.xlu1 %v3135_v17 }
0x1887   : > { %3146 = vrot.lane.b32.xlu1 %v7342_v49, %s8095_s27 }
0x188b   : > { %3214 = vrot.lane.b32.xlu1 %v7338_v41, %s8096_s29  ;;  %3148 = vrot.lane.b32.xlu0 %v7338_v41, %s8095_s27 }
0x188f   : > { %3212 = vrot.lane.b32.xlu1 %v7342_v49, %s8096_s29  ;;  %3208 = vrot.lane.b32.xlu0 %v7344_v50, %s8097_s25 }
0x1893   : > { %3210 = vrot.lane.b32.xlu1 %v7356_v58, %s8097_s25 }
0x18fa   : > { %v3131_v18 = vpop.xlane.xlu0 %3130 }
0x18fb   : > { %6478 = vrcp.f32 %v3131_v18 }
0x18fe   : > { %v3134_v19 = vpop.xlane.xlu0 %3133 }
0x18ff   : > { %v3137_v20 = vpop.xlane.xlu1 %3136  ;;  %6480 = vrcp.f32 %v3134_v19 }
0x1900   : > { %6482 = vrcp.f32 %v3137_v20 }
0x1902   : > { %v3149_v22 = vpop.permute.xlu0 %3148 }
0x1903   : > { %v3147_v23 = vpop.permute.xlu1 %3146  ;;  %v3158_v25 = vsel %vm1598_vm9, %v3149_v22, 0  ;;  %6162 = vmatprep.subr.msk.bf16.mxu1 %vm1598_vm9, %v3149_v22 }
0x1904   : > { %5953 = vmatpush3.bf16.msra.mxu1 %v3158_v25 }
0x1905   : > { %5954 = vmatprep.subr.bf16.mxu1 %v3147_v23 }
0x1906   : > { %v3209_v53 = vpop.permute.xlu0 %3208 }
0x1907   : > { %v3215_v26 = vpop.permute.xlu1 %3214 }
0x1908   : > { %5955 = vmatpush3.bf16.msra.mxu1 %v3147_v23  ;;  %v6479_v50 = vpop.eup %6478  ;;  %v3226_v30 = vsel %vm1490_vm6, %v3215_v26, 0 }
0x1909   : > { %6163 = vmatprep.subr.msk.bf16.mxu1 %vm1490_vm6, %v3215_v26  ;;  %v3141_v27 = vmul.f32 %v6479_v50, %v6473_v13 }
0x190b   : > { %v3213_v2 = vpop.permute.xlu1 %3212 }
0x190c   : > { %v6481_v58 = vpop.eup %6480  ;;  %v3223_v55 = vsel %vm1490_vm6, %v3213_v2, 0 }
0x190d   : > { %v6483_v1 = vpop.eup %6482  ;;  %v3142_v5 = vmul.f32 %v6481_v58, %v6475_v59  ;;  %v6333_v58 = vld [vmem:[%s7972_s11 + $0x18] sm:$0xff]  }
0x190e   : > { %v3143_v28 = vmul.f32 %v6483_v1, %v6477_v15  ;;  %v6334_v1 = vld [vmem:[%s7972_s11 + $0x10] sm:$0xff]  }
0x190f   : > { %v3144_v62 = vpack.c.bf16 %v3142_v5, %v3141_v27  ;;  %v3211_v52 = vpop.permute.xlu1 %3210 }
0x1910   : > { %v3145_v29 = vpack.c.bf16 %v3143_v28, %v3143_v28 }
0x1911   : > { %5956 = vmatprep.mubr.msk.bf16.mxu1 %vm1551_vm8, %v3144_v62 }
0x1912   : > { %5957 = vmatmul.mubr.msk.bf16.vlgmr.msra.gmra.mxu1 %vm1551_vm8, %v3145_v29 }
0x1913   : > { %5961 = vmatpush3.bf16.xpose.msra.mxu1 %v3226_v30  ;;  %5964 = vmatprep.mubr.msk.bf16.mxu1 %vm1490_vm6, %v3209_v53 }
0x1914   : > { %6164 = vmatprep.subr.msk.bf16.mxu1 %vm1490_vm6, %v3213_v2 }
0x191b   : > { %5963 = vmatpush3.bf16.xpose.msra.mxu1 %v3223_v55 }
0x1922   : > { %5965 = vmatmul.mubr.msk.bf16.vlgmr.msra.gmra.mxu1 %vm1490_vm6, %v3211_v52 }
0x19d2   : > { %v5958_v56 = vpop.f32.mrf.mxu1 }
0x19d4   : > { %v3194_v57 = vpop.f32.mrf.mxu1 }
0x19d6   : > { %v5959_v31 = vpop.f32.mrf.mxu1 }
0x19d8   : > { %v3197_v34 = vpop.f32.mrf.mxu1 }
0x19d9   : > { %v6256_v37 = vpack.i.bf16 %v3197_v34, %v3194_v57 }
0x19e2   : > { %v5966_v42 = vpop.f32.mrf.mxu1 }
0x19e3   : > { %v3271_v46 = vadd.f32 %v5966_v42, %v7067_v12 }
0x19e4   : > { %v3262_v43 = vpop.f32.mrf.mxu1 }
0x19e5   : > { %v3263_v44 = vadd.f32 %v3262_v43, %v7067_v12  ;;  %v3282_v3 = vsel %vm1551_vm8, %v3271_v46, -inf }
0x19e6   : > { %v5967_v45 = vpop.f32.mrf.mxu1 }
0x19e7   : > { %v3276_v47 = vsel %vm1551_vm8, %v3263_v44, -inf }
0x19e8   : > { %v3265_v54 = vpop.f32.mrf.mxu1  ;;  %3277 = vmax.xlane.f32.xlu0 %v3276_v47 }
0x19e9   : > { %v3266_v21 = vadd.f32 %v3265_v54, %v7067_v12 }
0x19eb   : > { %v3279_v39 = vsel %vm1551_vm8, %v3266_v21, -inf }
0x19ec   : > { %3280 = vmax.xlane.f32.xlu1 %v3279_v39  ;;  %3283 = vmax.xlane.f32.xlu0 %v3282_v3 }
0x1a71   : > { %v3278_v4 = vpop.xlane.xlu0 %3277 }
0x1a72   : > { %v3285_v6 = vsub.f32 %v3263_v44, %v3278_v4 }
0x1a74   : > { %v3288_v7 = vmul.f32 1.442695, %v3285_v6  ;;  %v5423_v6 = vld [vmem:[%s8083_s12 + $0x1] ss:$0 sm:$0xff] }
0x1a75   : > { %v3281_v24 = vpop.xlane.xlu1 %3280  ;;  %v3284_v9 = vpop.xlane.xlu0 %3283 }
0x1a76   : > { %6484 = vpow2.f32 %v3288_v7  ;;  %v3286_v10 = vsub.f32 %v3266_v21, %v3281_v24  ;;  %v3287_v11 = vsub.f32 %v3271_v46, %v3284_v9 }
0x1a78   : > { %v3290_v0 = vmul.f32 1.442695, %v3286_v10  ;;  %v3292_v60 = vmul.f32 1.442695, %v3287_v11 }
0x1a7a   : > { %6486 = vpow2.f32 %v3290_v0 }
0x1a7b   : > { %6488 = vpow2.f32 %v3292_v60 }
0x1a83   : > { %v6485_v13 = vpop.eup %6484 }
0x1a84   : > { %v3294_v14 = vsel %vm1551_vm8, %v6485_v13, 0.0 }
0x1a85   : > { %3295 = vadd.xlane.f32.xlu0 %v3294_v14 }
0x1a87   : > { %v6487_v59 = vpop.eup %6486 }
0x1a88   : > { %v6489_v15 = vpop.eup %6488  ;;  %v3297_v16 = vsel %vm1551_vm8, %v6487_v59, 0.0 }
0x1a89   : > { %3298 = vadd.xlane.f32.xlu0 %v3297_v16  ;;  %v3300_v17 = vsel %vm1551_vm8, %v6489_v15, 0.0 }
0x1a8a   : > { %3301 = vadd.xlane.f32.xlu1 %v3300_v17 }
0x1a9b   : > { %3311 = vrot.lane.b32.xlu1 %v7342_v49, %s8098_s23 }
0x1a9f   : > { %6252 = vrot.lane.b32.xlu1 %v6251_v40, %s8099_s8  ;;  %3313 = vrot.lane.b32.xlu0 %v7338_v41, %s8098_s23 }
0x1aa3   : > { %3380 = vrot.lane.b32.xlu1 %v7434_v8, %s8099_s8  ;;  %6257 = vrot.lane.b32.xlu0 %v6256_v37, %s8100_s3 }
0x1aa7   : > { %3392 = vrot.lane.b32.xlu1 %v5958_v56, %s8100_s3 }
0x1b0e   : > { %v3296_v18 = vpop.xlane.xlu0 %3295 }
0x1b0f   : > { %6490 = vrcp.f32 %v3296_v18 }
0x1b12   : > { %v3299_v19 = vpop.xlane.xlu0 %3298 }
0x1b13   : > { %v3302_v20 = vpop.xlane.xlu1 %3301  ;;  %6492 = vrcp.f32 %v3299_v19 }
0x1b14   : > { %6494 = vrcp.f32 %v3302_v20 }
0x1b16   : > { %v3314_v49 = vpop.permute.xlu0 %3313 }
0x1b17   : > { %v3323_v35 = vsel %vm1598_vm9, %v3314_v49, 0  ;;  %6165 = vmatprep.subr.msk.bf16.mxu0 %vm1598_vm9, %v3314_v49  ;;  %v3312_v38 = vpop.permute.xlu1 %3311 }
0x1b18   : > { %5969 = vmatpush3.bf16.msra.mxu0 %v3323_v35 }
0x1b19   : > { %5970 = vmatprep.subr.bf16.mxu0 %v3312_v38 }
0x1b1a   : > { %v6258_v52 = vpop.permute.xlu0 %6257 }
0x1b1b   : > { %v6253_v30 = vpop.permute.xlu1 %6252  ;;  %v6260_v57 = vunpack.i.h.bf16 %v6258_v52  ;;  %v6259_v31 = vunpack.i.l.bf16 %v6258_v52 }
0x1b1c   : > { %5971 = vmatpush3.bf16.msra.mxu0 %v3312_v38  ;;  %v6491_v41 = vpop.eup %6490  ;;  %v6255_v2 = vunpack.i.h.bf16 %v6253_v30  ;;  %v6254_v55 = vunpack.i.l.bf16 %v6253_v30 }
0x1b1d   : > { %v3306_v22 = vmul.f32 %v6491_v41, %v6485_v13  ;;  %5976 = vmatprep.subr.bf16.mxu0 %v6333_v58 }
0x1b1e   : > { %v3410_v34 = vsel %vm1490_vm6, %v7432_v63, %v6255_v2  ;;  %v3409_v37 = vsel %vm1490_vm6, %v7430_v33, %v6254_v55  ;;  %v5430_v55 = vld [vmem:[%s8085_s13 + $0x1] ss:$0 sm:$0xff]  ;;  %s8114_s13 = sld [smem:[#allocation35_spill]] }
0x1b1f   : > { %v3381_v53 = vpop.permute.xlu1 %3380  ;;  %v3413_v54 = vsel %vm2186_vm10, %v3410_v34, %v6260_v57  ;;  %v3412_v21 = vsel %vm2186_vm10, %v3409_v37, %v6259_v31  ;;  %v5431_v37 = vld [vmem:[%s8086_s14 + $0x1] ss:$0 sm:$0xff]  ;;  %s8104_s14 = sld [smem:[#allocation26_spill]] }
0x1b20   : > { %v6493_v8 = vpop.eup %6492  ;;  %v3411_v43 = vsel %vm1490_vm6, %v7428_v32, %v3381_v53 }
0x1b21   : > { %v6495_v40 = vpop.eup %6494  ;;  %v3307_v23 = vmul.f32 %v6493_v8, %v6487_v59 }
0x1b22   : > { %v3308_v25 = vmul.f32 %v6495_v40, %v6489_v15 }
0x1b23   : > { %v3309_v26 = vpack.c.bf16 %v3307_v23, %v3306_v22  ;;  %v3393_v56 = vpop.permute.xlu1 %3392 }
0x1b24   : > { %v3310_v50 = vpack.c.bf16 %v3308_v25, %v3308_v25  ;;  %v3414_v45 = vsel %vm2186_vm10, %v3411_v43, %v3393_v56  ;;  %v6335_v25 = vld [vmem:[%s8084_s15 + $0x18] sm:$0xff]  }
0x1b25   : > { %5972 = vmatprep.mubr.msk.bf16.mxu0 %vm1551_vm8, %v3309_v26  ;;  %v6336_v26 = vld [vmem:[%s8084_s15 + $0x10] sm:$0xff]   ;;  %5984 = vmatprep.subr.bf16.mxu1 %v6335_v25  ;;  %s8105_s15 = sld [smem:[#allocation27_spill]] }
0x1b26   : > { %5973 = vmatmul.mubr.msk.bf16.vlgmr.msra.gmra.mxu0 %vm1551_vm8, %v3310_v50  ;;  %5985 = vmatpush3.bf16.msra.mxu1 %v6335_v25 }
0x1b27   : > { %5977 = vmatpush3.bf16.msra.mxu0 %v6333_v58  ;;  %5986 = vmatprep.subr.bf16.mxu1 %v6336_v26 }
0x1b28   : > { %5978 = vmatprep.subr.bf16.mxu0 %v6334_v1 }
0x1b2a   : > { %5987 = vmatpush3.bf16.msra.mxu1 %v6336_v26 }
0x1b2b   : > { %5979 = vmatpush3.bf16.msra.mxu0 %v6334_v1 }
0x1be6   : > { %v5974_v27 = vpop.f32.mrf.mxu0 }
0x1be7   : > { %3404 = vrot.lane.b32.xlu1 %v5974_v27, %s8101_s21 }
0x1be8   : > { %v3359_v5 = vpop.f32.mrf.mxu0 }
0x1bea   : > { %v5975_v28 = vpop.f32.mrf.mxu0 }
0x1bec   : > { %v3362_v62 = vpop.f32.mrf.mxu0 }
0x1bed   : > { %v6261_v29 = vpack.i.bf16 %v3362_v62, %v3359_v5 }
0x1bef   : > { %6262 = vrot.lane.b32.xlu0 %v6261_v29, %s8101_s21 }
0x1c59   : > { %v3405_v42 = vpop.permute.xlu1 %3404 }
0x1c5a   : > { %v3417_v39 = vsel %vm1551_vm8, %v3414_v45, %v3405_v42 }
0x1c5b   : > { %v3419_v4 = vpack.c.bf16 %v3417_v39, %v3417_v39  ;;  %v6338_v39 = vld [vmem:[%s7978_s17 + $0x70] sm:$0xff]  }
0x1c61   : > { %v6263_v44 = vpop.permute.xlu0 %6262 }
0x1c62   : > { %v6265_v46 = vunpack.i.h.bf16 %v6263_v44  ;;  %v6264_v47 = vunpack.i.l.bf16 %v6263_v44 }
0x1c64   : > { %v3415_v63 = vsel %vm1551_vm8, %v3412_v21, %v6264_v47  ;;  %v3416_v3 = vsel %vm1551_vm8, %v3413_v54, %v6265_v46  ;;  %v6337_v21 = vld [vmem:[%s7978_s17 + $0x78] sm:$0xff]  }
0x1c65   : > { %v3418_v33 = vpack.c.bf16 %v3416_v3, %v3415_v63  ;;  %5992 = vmatprep.subr.bf16.mxu0 %v6337_v21  ;;  %v6339_v63 = vld [vmem:[%s7978_s17 + $0x68] sm:$0xff]   ;;  %v6340_v3 = vld [vmem:[%s7978_s17 + $0x60] sm:$0xff]  }
0x1c67   : > { %5980 = vmatprep.mubr.msk.bf16.mxu0 %vm1244_vm3, %v3418_v33  ;;  %v6341_v33 = vld [vmem:[%s7978_s17 + $0x58] sm:$0xff]  }
0x1c68   : > { %5981 = vmatmul.mubr.msk.bf16.vlgmr.msra.gmra.mxu0 %vm1244_vm3, %v3419_v4  ;;  %v6342_v4 = vld [vmem:[%s7978_s17 + $0x50] sm:$0xff]  }
0x1c69   : > { %5993 = vmatpush3.bf16.msra.mxu0 %v6337_v21 }
0x1c6a   : > { %5994 = vmatprep.subr.bf16.mxu0 %v6338_v39 }
0x1c6d   : > { %5995 = vmatpush3.bf16.msra.mxu0 %v6338_v39 }
0x1c6e   : > { %5996 = vmatprep.subr.bf16.mxu0 %v6339_v63 }
0x1c71   : > { %5997 = vmatpush3.bf16.msra.mxu0 %v6339_v63 }
0x1c72   : > { %5998 = vmatprep.subr.bf16.mxu0 %v6340_v3 }
0x1c75   : > { %5999 = vmatpush3.bf16.msra.mxu0 %v6340_v3 }
0x1c76   : > { %6000 = vmatprep.subr.bf16.mxu0 %v6341_v33 }
0x1c79   : > { %6001 = vmatpush3.bf16.msra.mxu0 %v6341_v33 }
0x1c7a   : > { %6002 = vmatprep.subr.bf16.mxu0 %v6342_v4 }
0x1c7d   : > { %6003 = vmatpush3.bf16.msra.mxu0 %v6342_v4 }
0x1d28   : > { %v5982_v32 = vpop.f32.mrf.mxu0 }
0x1d29   : > { %v3494_v24 = vadd.f32 %v5982_v32, %v5423_v6  ;;  %v6343_v32 = vld [vmem:[%s7978_s17 + $0x48] sm:$0xff]  }
0x1d2a   : > { %v3485_v7 = vpop.f32.mrf.mxu0  ;;  %6004 = vmatprep.subr.bf16.mxu0 %v6343_v32 }
0x1d2b   : > { %v3486_v9 = vadd.f32 %v5423_v6, %v3485_v7  ;;  %v7527_v60 = vadd.f32 %v3494_v24, %v7304_v51  ;;  %6005 = vmatpush3.bf16.msra.mxu0 %v6343_v32  ;;  %v5437_v7 = vld [vmem:[%s7977_s16 + $0x1] ss:$0 sm:$0xff] }
0x1d2c   : > { %v5983_v10 = vpop.f32.mrf.mxu0 }
0x1d2d   : > { %v7524_v11 = vadd.f32 %v3486_v9, %v7301_v48  ;;  %v3512_v16 = vsel %vm1244_vm3, %v7527_v60, 0.0 }
0x1d2e   : > { %v3488_v0 = vpop.f32.mrf.mxu0 }
0x1d2f   : > { %v3489_v13 = vadd.f32 %v5423_v6, %v3488_v0  ;;  %v3506_v14 = vsel %vm1244_vm3, %v7524_v11, 0.0  ;;  %v6344_v6 = vld [vmem:[%s7978_s17 + $0x40] sm:$0xff]  }
0x1d30   : > { %3507 = vadd.xlane.f32.xlu0 %v3506_v14  ;;  %6006 = vmatprep.subr.bf16.mxu0 %v6344_v6 }
0x1d31   : > { %v7532_v59 = vadd.f32 %v3489_v13, %v7309_v61  ;;  %6007 = vmatpush3.bf16.msra.mxu0 %v6344_v6 }
0x1d33   : > { %v3509_v15 = vsel %vm1244_vm3, %v7532_v59, 0.0 }
0x1d34   : > { %3510 = vadd.xlane.f32.xlu1 %v3509_v15  ;;  %3513 = vadd.xlane.f32.xlu0 %v3512_v16 }
0x1db9   : > { %v3508_v48 = vpop.xlane.xlu0 %3507 }
0x1dba   : > { %v3515_v17 = vmul.f32 0.03125, %v3508_v48 }
0x1dbc   : > { %v3518_v51 = vsub.f32 %v7524_v11, %v3515_v17 }
0x1dbd   : > { %v3511_v18 = vpop.xlane.xlu1 %3510  ;;  %v3514_v19 = vpop.xlane.xlu0 %3513 }
0x1dbe   : > { %v3516_v20 = vmul.f32 0.03125, %v3511_v18  ;;  %v3517_v49 = vmul.f32 0.03125, %v3514_v19  ;;  %v3521_v35 = vmul.f32 %v3518_v51, %v3518_v51 }
0x1dc0   : > { %v3519_v61 = vsub.f32 %v7532_v59, %v3516_v20  ;;  %v3520_v38 = vsub.f32 %v7527_v60, %v3517_v49  ;;  %v3524_v41 = vsel %vm1244_vm3, %v3521_v35, 0.0 }
0x1dc1   : > { %3525 = vadd.xlane.f32.xlu0 %v3524_v41 }
0x1dc2   : > { %v3522_v8 = vmul.f32 %v3519_v61, %v3519_v61  ;;  %v3523_v40 = vmul.f32 %v3520_v38, %v3520_v38 }
0x1dc4   : > { %v3527_v22 = vsel %vm1244_vm3, %v3522_v8, 0.0  ;;  %v3530_v23 = vsel %vm1244_vm3, %v3523_v40, 0.0 }
0x1dc5   : > { %3528 = vadd.xlane.f32.xlu0 %v3527_v22  ;;  %3531 = vadd.xlane.f32.xlu1 %v3530_v23 }
0x1e4a   : > { %v3526_v50 = vpop.xlane.xlu0 %3525 }
0x1e4b   : > { %v3533_v58 = vmul.f32 0.03125, %v3526_v50 }
0x1e4d   : > { %v3536_v1 = vadd.f32 1e-05, %v3533_v58 }
0x1e4e   : > { %v3532_v27 = vpop.xlane.xlu1 %3531  ;;  %v3529_v5 = vpop.xlane.xlu0 %3528 }
0x1e4f   : > { %6496 = vrsqrt.f32 %v3536_v1  ;;  %v3535_v28 = vmul.f32 0.03125, %v3532_v27  ;;  %v3534_v62 = vmul.f32 0.03125, %v3529_v5  ;;  %v5462_v1 = vld [vmem:[%s7979_s18 + $0x1] ss:$0 sm:$0xff] }
0x1e51   : > { %v3538_v29 = vadd.f32 1e-05, %v3535_v28  ;;  %v3537_v30 = vadd.f32 1e-05, %v3534_v62 }
0x1e53   : > { %6498 = vrsqrt.f32 %v3538_v29 }
0x1e54   : > { %6500 = vrsqrt.f32 %v3537_v30 }
0x1e5c   : > { %v6497_v53 = vpop.eup %6496 }
0x1e5d   : > { %v3542_v2 = vmul.f32 %v6497_v53, %v3518_v51 }
0x1e5f   : > { %v3551_v34 = vmul.f32 %v5430_v55, %v3542_v2 }
0x1e60   : > { %v6499_v52 = vpop.eup %6498 }
0x1e61   : > { %v6501_v56 = vpop.eup %6500  ;;  %v3544_v57 = vmul.f32 %v6499_v52, %v3520_v38  ;;  %v3560_v45 = vadd.f32 %v5431_v37, %v3551_v34 }
0x1e62   : > { %v3543_v31 = vmul.f32 %v6501_v56, %v3519_v61 }
0x1e63   : > { %v3553_v42 = vmul.f32 %v5430_v55, %v3544_v57  ;;  %v6589_v57 = vld [vmem:[%s7295_s28 + $0x10] sm:$0xff] }
0x1e64   : > { %v3552_v43 = vmul.f32 %v5430_v55, %v3543_v31  ;;  %v6588_v55 = vld [vmem:[%s7295_s28] sm:$0xff] }
0x1e65   : > { %v3562_v44 = vadd.f32 %v5431_v37, %v3553_v42  ;;  %v6590_v42 = vld [vmem:[%s7295_s28 + $0x8] sm:$0xff]  ;;  %s8107_s28 = sld [smem:[#allocation29_spill]] }
0x1e66   : > { %v3561_v46 = vadd.f32 %v5431_v37, %v3552_v43 }
0x1e67   : > { %v3564_v47 = vpack.c.bf16 %v3562_v44, %v3562_v44 }
0x1e68   : > { %v3563_v54 = vpack.c.bf16 %v3561_v46, %v3560_v45 }
0x1e6a   : > { %5988 = vmatprep.mubr.msk.bf16.mxu1 %vm1244_vm3, %v3563_v54 }
0x1e6b   : > { %5989 = vmatmul.mubr.msk.bf16.vlgmr.msra.gmra.mxu1 %vm1244_vm3, %v3564_v47 }
0x1f2b   : > { %v5990_v24 = vpop.f32.mrf.mxu1 }
0x1f2c   : > { %v3639_v9 = vadd.f32 %v5990_v24, %v5437_v7  ;;  %v6345_v24 = vld [vmem:[%s8078_s6 + $0x28] sm:$0xff]  }
0x1f2d   : > { %v3630_v10 = vpop.f32.mrf.mxu1  ;;  %6012 = vmatprep.subr.bf16.mxu1 %v6345_v24 }
0x1f2e   : > { %v5444_v0 = vmul.f32 -1.702, %v3639_v9  ;;  %v3631_v13 = vadd.f32 %v5437_v7, %v3630_v10  ;;  %6013 = vmatpush3.bf16.msra.mxu1 %v6345_v24 }
0x1f2f   : > { %v5991_v14 = vpop.f32.mrf.mxu1 }
0x1f30   : > { %v3654_v15 = vmul.f32 1.442695, %v5444_v0  ;;  %v5442_v16 = vmul.f32 -1.702, %v3631_v13 }
0x1f31   : > { %v3633_v48 = vpop.f32.mrf.mxu1 }
0x1f32   : > { %6502 = vpow2.f32 %v3654_v15  ;;  %v3650_v17 = vmul.f32 1.442695, %v5442_v16  ;;  %v3634_v51 = vadd.f32 %v5437_v7, %v3633_v48 }
0x1f34   : > { %6504 = vpow2.f32 %v3650_v17  ;;  %v5443_v18 = vmul.f32 -1.702, %v3634_v51 }
0x1f36   : > { %v3652_v19 = vmul.f32 1.442695, %v5443_v18 }
0x1f38   : > { %6506 = vpow2.f32 %v3652_v19 }
0x1f3f   : > { %v6503_v20 = vpop.eup %6502 }
0x1f40   : > { %v3658_v35 = vadd.f32 1.0, %v6503_v20  ;;  %v5473_v20 = vld [vmem:[%s8079_s30 + $0x2] ss:$0 sm:$0xff] }
0x1f41   : > { %v6505_v49 = vpop.eup %6504 }
0x1f42   : > { %v3656_v61 = vadd.f32 1.0, %v6505_v49  ;;  %6508 = vrcp.f32 %v3658_v35 }
0x1f44   : > { %6510 = vrcp.f32 %v3656_v61 }
0x1f45   : > { %v6507_v38 = vpop.eup %6506 }
0x1f46   : > { %v3657_v41 = vadd.f32 1.0, %v6507_v38 }
0x1f48   : > { %6512 = vrcp.f32 %v3657_v41 }
0x1f4f   : > { %v6509_v8 = vpop.eup %6508 }
0x1f50   : > { %v3667_v23 = vmul.f32 %v6509_v8, %v3639_v9  ;;  %v6346_v9 = vld [vmem:[%s8078_s6 + $0x20] sm:$0xff]  }
0x1f51   : > { %v6511_v40 = vpop.eup %6510  ;;  %6014 = vmatprep.subr.bf16.mxu1 %v6346_v9  ;;  %v5474_v8 = vld [vmem:[%s8080_s26 + $0x2] ss:$0 sm:$0xff] }
0x1f52   : > { %v3665_v25 = vmul.f32 %v6511_v40, %v3631_v13  ;;  %v3669_v58 = vpack.c.bf16 %v3667_v23, %v3667_v23  ;;  %6015 = vmatpush3.bf16.msra.mxu1 %v6346_v9 }
0x1f55   : > { %v6513_v22 = vpop.eup %6512 }
0x1f56   : > { %v3666_v26 = vmul.f32 %v6513_v22, %v3634_v51 }
0x1f58   : > { %v3668_v50 = vpack.c.bf16 %v3666_v26, %v3665_v25 }
0x1f5a   : > { %6008 = vmatprep.mubr.bf16.mxu0 %v3668_v50 }
0x1f5b   : > { %6009 = vmatmul.mubr.bf16.vlgmr.msra.gmra.mxu0 %v3669_v58 }
0x201b   : > { %v6010_v27 = vpop.f32.mrf.mxu0 }
0x201c   : > { %v3786_v5 = vadd.f32 %v6010_v27, %v5462_v1 }
0x201d   : > { %v3777_v28 = vpop.f32.mrf.mxu0 }
0x201e   : > { %v3778_v62 = vadd.f32 %v5462_v1, %v3777_v28  ;;  %v3793_v30 = vadd.f32 %v3786_v5, %v7527_v60 }
0x201f   : > { %v6011_v29 = vpop.f32.mrf.mxu0 }
0x2020   : > { %v3791_v53 = vadd.f32 %v3778_v62, %v7524_v11  ;;  %v7594_v31 = vmul.f32 %v6589_v57, %v3793_v30 }
0x2021   : > { %v3780_v2 = vpop.f32.mrf.mxu0 }
0x2022   : > { %v7591_v52 = vmul.f32 %v6588_v55, %v3791_v53  ;;  %v3781_v56 = vadd.f32 %v5462_v1, %v3780_v2  ;;  %v3807_v60 = vsel %vm1244_vm3, %v7594_v31, 0.0  ;;  %v5480_v1 = vld [vmem:[%s8082_s5 + $0x2] ss:$0 sm:$0xff] }
0x2024   : > { %v3792_v34 = vadd.f32 %v3781_v56, %v7532_v59  ;;  %v3801_v37 = vsel %vm1244_vm3, %v7591_v52, 0.0 }
0x2025   : > { %3802 = vadd.xlane.f32.xlu0 %v3801_v37 }
0x2026   : > { %v7600_v43 = vmul.f32 %v6590_v42, %v3792_v34 }
0x2028   : > { %v3804_v11 = vsel %vm1244_vm3, %v7600_v43, 0.0 }
0x2029   : > { %3805 = vadd.xlane.f32.xlu1 %v3804_v11  ;;  %3808 = vadd.xlane.f32.xlu0 %v3807_v60 }
0x20ae   : > { %v3803_v44 = vpop.xlane.xlu0 %3802 }
0x20af   : > { %v3810_v45 = vmul.f32 0.03125, %v3803_v44 }
0x20b1   : > { %v3813_v46 = vsub.f32 %v7591_v52, %v3810_v45 }
0x20b2   : > { %v3806_v59 = vpop.xlane.xlu1 %3805  ;;  %v3809_v47 = vpop.xlane.xlu0 %3808 }
0x20b3   : > { %v3811_v54 = vmul.f32 0.03125, %v3806_v59  ;;  %v3812_v21 = vmul.f32 0.03125, %v3809_v47  ;;  %v3816_v39 = vmul.f32 %v3813_v46, %v3813_v46 }
0x20b5   : > { %v3814_v63 = vsub.f32 %v7600_v43, %v3811_v54  ;;  %v3815_v3 = vsub.f32 %v7594_v31, %v3812_v21  ;;  %v3819_v33 = vsel %vm1244_vm3, %v3816_v39, 0.0 }
0x20b6   : > { %3820 = vadd.xlane.f32.xlu1 %v3819_v33 }
0x20b7   : > { %v3817_v4 = vmul.f32 %v3814_v63, %v3814_v63  ;;  %v3818_v32 = vmul.f32 %v3815_v3, %v3815_v3 }
0x20b9   : > { %v3822_v6 = vsel %vm1244_vm3, %v3817_v4, 0.0  ;;  %v3825_v7 = vsel %vm1244_vm3, %v3818_v32, 0.0 }
0x20ba   : > { %3823 = vadd.xlane.f32.xlu0 %v3822_v6  ;;  %3826 = vadd.xlane.f32.xlu1 %v3825_v7 }
0x213f   : > { %v3821_v10 = vpop.xlane.xlu1 %3820 }
0x2140   : > { %v3828_v0 = vmul.f32 0.03125, %v3821_v10 }
0x2142   : > { %v3831_v13 = vadd.f32 1e-05, %v3828_v0 }
0x2143   : > { %v3827_v14 = vpop.xlane.xlu1 %3826  ;;  %v3824_v15 = vpop.xlane.xlu0 %3823 }
0x2144   : > { %6514 = vrsqrt.f32 %v3831_v13  ;;  %v3830_v16 = vmul.f32 0.03125, %v3827_v14  ;;  %v3829_v48 = vmul.f32 0.03125, %v3824_v15 }
0x2146   : > { %v3833_v17 = vadd.f32 1e-05, %v3830_v16  ;;  %v3832_v51 = vadd.f32 1e-05, %v3829_v48 }
0x2148   : > { %6516 = vrsqrt.f32 %v3833_v17 }
0x2149   : > { %6518 = vrsqrt.f32 %v3832_v51 }
0x2151   : > { %v6515_v18 = vpop.eup %6514 }
0x2152   : > { %v3837_v19 = vmul.f32 %v6515_v18, %v3813_v46 }
0x2154   : > { %v3846_v41 = vmul.f32 %v5473_v20, %v3837_v19 }
0x2155   : > { %v6517_v49 = vpop.eup %6516 }
0x2156   : > { %v6519_v35 = vpop.eup %6518  ;;  %v3839_v61 = vmul.f32 %v6517_v49, %v3815_v3  ;;  %v3855_v25 = vadd.f32 %v5474_v8, %v3846_v41 }
0x2157   : > { %v3838_v38 = vmul.f32 %v6519_v35, %v3814_v63 }
0x2158   : > { %v3848_v40 = vmul.f32 %v5473_v20, %v3839_v61 }
0x2159   : > { %v3847_v22 = vmul.f32 %v5473_v20, %v3838_v38 }
0x215a   : > { %v3857_v23 = vadd.f32 %v5474_v8, %v3848_v40 }
0x215b   : > { %v3856_v26 = vadd.f32 %v5474_v8, %v3847_v22 }
0x215c   : > { %v3859_v50 = vpack.c.bf16 %v3857_v23, %v3857_v23 }
0x215d   : > { %v3858_v58 = vpack.c.bf16 %v3856_v26, %v3855_v25 }
0x215f   : > { %6016 = vmatprep.mubr.msk.bf16.mxu1 %vm1244_vm3, %v3858_v58 }
0x2160   : > { %6017 = vmatmul.mubr.msk.bf16.vlgmr.msra.gmra.mxu1 %vm1244_vm3, %v3859_v50 }
0x2220   : > { %v6018_v27 = vpop.f32.mrf.mxu1 }
0x2221   : > { %v3934_v5 = vadd.f32 %v6018_v27, %v5480_v1 }
0x2222   : > { %v3925_v28 = vpop.f32.mrf.mxu1 }
0x2223   : > { %v7629_v62 = vpack.c.bf16 %v3934_v5, %v3934_v5  ;;  %v3926_v30 = vadd.f32 %v5480_v1, %v3925_v28  ;;  %v3941_v37 = vmul.f32 0.35355338, %v3934_v5 }
0x2224   : > { %v6019_v29 = vpop.f32.mrf.mxu1 }
0x2225   : > { %3950 = vrot.lane.b32.xlu0 %v7629_v62, %s8088_s7  ;;  %v3939_v55 = vmul.f32 0.35355338, %v3926_v30  ;;  %v7647_v42 = vpack.c.bf16 %v3941_v37, %v3941_v37 }
0x2226   : > { %v3928_v53 = vpop.f32.mrf.mxu1 }
0x2227   : > { %v3929_v2 = vadd.f32 %v5480_v1, %v3928_v53 }
0x2229   : > { %v3940_v56 = vmul.f32 0.35355338, %v3929_v2  ;;  %v7633_v57 = vpack.c.bf16 %v3929_v2, %v3926_v30 }
0x222b   : > { %v7635_v34 = vpack.c.bf16 %v3940_v56, %v3939_v55  ;;  %3948 = vrot.lane.b32.xlu1 %v7633_v57, %s8088_s7  ;;  %s8102_s7 = sld [smem:[#allocation25_spill]] }
0x222d   : > { %4111 = vrot.lane.b32.xlu0 %v7635_v34, %s8089_s4  ;;  %6024 = vmatprep.mubr.msk.bf16.mxu1 %vm1490_vm6, %v7635_v34 }
0x222f   : > { %4117 = vrot.lane.b32.xlu1 %v7629_v62, %s8090_s0 }
0x2233   : > { %4115 = vrot.lane.b32.xlu1 %v7633_v57, %s8090_s0  ;;  %s8110_s0 = sld [smem:[#allocation34_spill]] }
0x2237   : > { %4113 = vrot.lane.b32.xlu1 %v7647_v42, %s8089_s4 }
0x2297   : > { %v3951_v11 = vpop.permute.xlu0 %3950 }
0x2298   : > { %v3962_v60 = vsel %vm1490_vm6, %v3951_v11, 0  ;;  %6166 = vmatprep.subr.msk.bf16.mxu1 %vm1490_vm6, %v3951_v11 }
0x2299   : > { %6021 = vmatpush3.bf16.xpose.msra.mxu1 %v3962_v60 }
0x229d   : > { %v3949_v44 = vpop.permute.xlu1 %3948 }
0x229e   : > { %6167 = vmatprep.subr.msk.bf16.mxu1 %vm1490_vm6, %v3949_v44  ;;  %v3959_v46 = vsel %vm1490_vm6, %v3949_v44, 0 }
0x229f   : > { %v4112_v45 = vpop.permute.xlu0 %4111 }
0x22a0   : > { %6040 = vmatprep.mubr.msk.bf16.mxu0 %vm1490_vm6, %v4112_v45 }
0x22a1   : > { %6023 = vmatpush3.bf16.xpose.msra.mxu1 %v3959_v46  ;;  %v4118_v59 = vpop.permute.xlu1 %4117 }
0x22a2   : > { %v4129_v47 = vsel %vm1490_vm6, %v4118_v59, 0  ;;  %6169 = vmatprep.subr.msk.bf16.mxu0 %vm1490_vm6, %v4118_v59 }
0x22a3   : > { %6037 = vmatpush3.bf16.xpose.msra.mxu0 %v4129_v47 }
0x22a5   : > { %v4116_v54 = vpop.permute.xlu1 %4115 }
0x22a6   : > { %6170 = vmatprep.subr.msk.bf16.mxu0 %vm1490_vm6, %v4116_v54  ;;  %v4126_v21 = vsel %vm1490_vm6, %v4116_v54, 0 }
0x22a8   : > { %6025 = vmatmul.mubr.msk.bf16.vlgmr.msra.gmra.mxu1 %vm1490_vm6, %v7647_v42 }
0x22a9   : > { %v4114_v39 = vpop.permute.xlu1 %4113 }
0x22ab   : > { %6039 = vmatpush3.bf16.xpose.msra.mxu0 %v4126_v21 }
0x22b2   : > { %6041 = vmatmul.mubr.msk.bf16.vlgmr.msra.gmra.mxu0 %vm1490_vm6, %v4114_v39 }
0x2368   : > { %v6026_v63 = vpop.f32.mrf.mxu1 }
0x2369   : > { %v4007_v32 = vadd.f32 %v6026_v63, %v7067_v12 }
0x236a   : > { %v3998_v3 = vpop.f32.mrf.mxu1 }
0x236b   : > { %v3999_v33 = vadd.f32 %v3998_v3, %v7067_v12  ;;  %v4018_v10 = vsel %vm1551_vm8, %v4007_v32, -inf }
0x236c   : > { %v6027_v4 = vpop.f32.mrf.mxu1 }
0x236d   : > { %v4012_v6 = vsel %vm1551_vm8, %v3999_v33, -inf }
0x236e   : > { %v4001_v7 = vpop.f32.mrf.mxu1  ;;  %4013 = vmax.xlane.f32.xlu0 %v4012_v6 }
0x236f   : > { %v4002_v24 = vadd.f32 %v4001_v7, %v7067_v12 }
0x2371   : > { %v4015_v9 = vsel %vm1551_vm8, %v4002_v24, -inf }
0x2372   : > { %v6042_v0 = vpop.f32.mrf.mxu0  ;;  %4016 = vmax.xlane.f32.xlu1 %v4015_v9  ;;  %4019 = vmax.xlane.f32.xlu0 %v4018_v10 }
0x2373   : > { %v4174_v13 = vadd.f32 %v6042_v0, %v7067_v12 }
0x2374   : > { %v4165_v14 = vpop.f32.mrf.mxu0 }
0x2375   : > { %v4166_v15 = vadd.f32 %v4165_v14, %v7067_v12  ;;  %v4185_v16 = vsel %vm1551_vm8, %v4174_v13, -inf }
0x2376   : > { %v6043_v48 = vpop.f32.mrf.mxu0  ;;  %4186 = vmax.xlane.f32.xlu1 %v4185_v16 }
0x2377   : > { %v4179_v17 = vsel %vm1551_vm8, %v4166_v15, -inf }
0x2378   : > { %v4168_v51 = vpop.f32.mrf.mxu0  ;;  %4180 = vmax.xlane.f32.xlu0 %v4179_v17 }
0x2379   : > { %v4169_v18 = vadd.f32 %v4168_v51, %v7067_v12 }
0x237b   : > { %v4182_v19 = vsel %vm1551_vm8, %v4169_v18, -inf }
0x237c   : > { %4183 = vmax.xlane.f32.xlu0 %v4182_v19 }
0x23f7   : > { %v4014_v20 = vpop.xlane.xlu0 %4013 }
0x23f8   : > { %v4021_v49 = vsub.f32 %v3999_v33, %v4014_v20 }
0x23fa   : > { %v4024_v8 = vmul.f32 1.442695, %v4021_v49 }
0x23fb   : > { %v4017_v35 = vpop.xlane.xlu1 %4016  ;;  %v4020_v61 = vpop.xlane.xlu0 %4019 }
0x23fc   : > { %v4023_v38 = vsub.f32 %v4007_v32, %v4020_v61  ;;  %v4022_v2 = vsub.f32 %v4002_v24, %v4017_v35 }
0x23fe   : > { %v4028_v41 = vmul.f32 1.442695, %v4023_v38  ;;  %v4026_v56 = vmul.f32 1.442695, %v4022_v2 }
0x23ff   : > { %v4187_v40 = vpop.xlane.xlu1 %4186 }
0x2400   : > { %v4190_v22 = vsub.f32 %v4174_v13, %v4187_v40  ;;  %6520 = vpow2.f32 %v4028_v41 }
0x2401   : > { %6522 = vpow2.f32 %v4024_v8  ;;  %v4181_v5 = vpop.xlane.xlu0 %4180 }
0x2402   : > { %v4195_v23 = vmul.f32 1.442695, %v4190_v22  ;;  %v4188_v30 = vsub.f32 %v4166_v15, %v4181_v5 }
0x2404   : > { %6524 = vpow2.f32 %v4195_v23  ;;  %v4191_v55 = vmul.f32 1.442695, %v4188_v30 }
0x2405   : > { %v4184_v28 = vpop.xlane.xlu0 %4183 }
0x2406   : > { %v4189_v29 = vsub.f32 %v4169_v18, %v4184_v28 }
0x2408   : > { %v4193_v53 = vmul.f32 1.442695, %v4189_v29 }
0x240a   : > { %6526 = vpow2.f32 %v4193_v53 }
0x240b   : > { %6528 = vpow2.f32 %v4191_v55 }
0x240c   : > { %6530 = vpow2.f32 %v4026_v56 }
0x240d   : > { %v7675_v25 = vpop.eup %6520 }
0x240e   : > { %v4036_v26 = vsel %vm1551_vm8, %v7675_v25, 0.0  ;;  %v6523_v50 = vpop.eup %6522 }
0x240f   : > { %4037 = vadd.xlane.f32.xlu0 %v4036_v26  ;;  %v4030_v27 = vsel %vm1551_vm8, %v6523_v50, 0.0 }
0x2411   : > { %v7679_v58 = vpop.eup %6524 }
0x2412   : > { %v4203_v1 = vsel %vm1551_vm8, %v7679_v58, 0.0 }
0x2413   : > { %4204 = vadd.xlane.f32.xlu1 %v4203_v1  ;;  %4031 = vadd.xlane.f32.xlu0 %v4030_v27 }
0x2417   : > { %v6527_v37 = vpop.eup %6526 }
0x2418   : > { %v6529_v11 = vpop.eup %6528  ;;  %v4200_v60 = vsel %vm1551_vm8, %v6527_v37, 0.0 }
0x2419   : > { %v4197_v44 = vsel %vm1551_vm8, %v6529_v11, 0.0  ;;  %v6531_v45 = vpop.eup %6530 }
0x241a   : > { %v4033_v46 = vsel %vm1551_vm8, %v6531_v45, 0.0 }
0x2424   : > { %4047 = vrot.lane.b32.xlu1 %v7633_v57, %s8091_s2 }
0x2428   : > { %4216 = vrot.lane.b32.xlu1 %v7629_v62, %s8092_s1 }
0x2429   : > { %4049 = vrot.lane.b32.xlu0 %v7629_v62, %s8091_s2  ;;  %s8103_s2 = sld [smem:[#allocation28_spill]] }
0x2448   : > { %4201 = vadd.xlane.f32.xlu0 %v4200_v60 }
0x244c   : > { %4198 = vadd.xlane.f32.xlu1 %v4197_v44 }
0x2450   : > { %4034 = vadd.xlane.f32.xlu1 %v4033_v46 }
0x245e   : > { %4282 = vrot.lane.b32.xlu0 %v7629_v62, %s8093_s10 }
0x2461   : > { %4214 = vrot.lane.b32.xlu1 %v7633_v57, %s8092_s1  ;;  %s8112_s1 = sld [smem:[#allocation9_spill]] }
0x2462   : > { %4276 = vrot.lane.b32.xlu0 %v7635_v34, %s8094_s9 }
0x2465   : > { %4280 = vrot.lane.b32.xlu1 %v7633_v57, %s8093_s10 }
0x2469   : > { %4278 = vrot.lane.b32.xlu1 %v7647_v42, %s8094_s9 }
0x2498   : > { %v4038_v59 = vpop.xlane.xlu0 %4037 }
0x2499   : > { %6532 = vrcp.f32 %v4038_v59 }
0x249c   : > { %v4205_v47 = vpop.xlane.xlu1 %4204  ;;  %v4032_v54 = vpop.xlane.xlu0 %4031 }
0x249d   : > { %6534 = vrcp.f32 %v4032_v54 }
0x24a0   : > { %v4048_v21 = vpop.permute.xlu1 %4047  ;;  %v4050_v39 = vpop.permute.xlu0 %4049 }
0x24a1   : > { %v4059_v63 = vsel %vm1598_vm9, %v4050_v39, 0  ;;  %6168 = vmatprep.subr.msk.bf16.mxu1 %vm1598_vm9, %v4050_v39 }
0x24a2   : > { %6029 = vmatpush3.bf16.msra.mxu1 %v4059_v63 }
0x24a3   : > { %6030 = vmatprep.subr.bf16.mxu1 %v4048_v21 }
0x24a4   : > { %v4217_v3 = vpop.permute.xlu1 %4216 }
0x24a5   : > { %v4226_v19 = vsel %vm1598_vm9, %v4217_v3, 0 }
0x24a6   : > { %6031 = vmatpush3.bf16.msra.mxu1 %v4048_v21  ;;  %v6533_v6 = vpop.eup %6532 }
0x24a7   : > { %6171 = vmatprep.subr.msk.bf16.mxu1 %vm1598_vm9, %v4217_v3  ;;  %v4044_v0 = vmul.f32 %v6533_v6, %v7675_v25 }
0x24a9   : > { %v4046_v17 = vpack.c.bf16 %v4044_v0, %v4044_v0 }
0x24aa   : > { %v6535_v7 = vpop.eup %6534 }
0x24ab   : > { %v4042_v13 = vmul.f32 %v6535_v7, %v6523_v50 }
0x24d1   : > { %v4202_v4 = vpop.xlane.xlu0 %4201 }
0x24d5   : > { %v4199_v33 = vpop.xlane.xlu1 %4198  ;;  %v4283_v49 = vpop.permute.xlu0 %4282 }
0x24d6   : > { %6536 = vrcp.f32 %v4199_v33  ;;  %v4294_v38 = vsel %vm1490_vm6, %v4283_v49, 0 }
0x24d7   : > { %6538 = vrcp.f32 %v4202_v4 }
0x24d9   : > { %v4035_v32 = vpop.xlane.xlu1 %4034  ;;  %v4277_v41 = vpop.permute.xlu0 %4276 }
0x24da   : > { %6540 = vrcp.f32 %v4035_v32 }
0x24db   : > { %6542 = vrcp.f32 %v4205_v47 }
0x24dd   : > { %v4215_v20 = vpop.permute.xlu1 %4214 }
0x24e1   : > { %v4281_v8 = vpop.permute.xlu1 %4280 }
0x24e2   : > { %v4291_v40 = vsel %vm1490_vm6, %v4281_v8, 0 }
0x24e3   : > { %v6537_v24 = vpop.eup %6536 }
0x24e4   : > { %v6539_v9 = vpop.eup %6538  ;;  %v4209_v15 = vmul.f32 %v6537_v24, %v6529_v11 }
0x24e5   : > { %v4210_v48 = vmul.f32 %v6539_v9, %v6527_v37  ;;  %v4279_v22 = vpop.permute.xlu1 %4278 }
0x24e7   : > { %v6541_v10 = vpop.eup %6540  ;;  %v4212_v18 = vpack.c.bf16 %v4210_v48, %v4209_v15 }
0x24e8   : > { %v4043_v14 = vmul.f32 %v6541_v10, %v6531_v45  ;;  %v6543_v51 = vpop.eup %6542 }
0x24e9   : > { %v4211_v35 = vmul.f32 %v6543_v51, %v7679_v58 }
0x24ea   : > { %v4045_v16 = vpack.c.bf16 %v4043_v14, %v4042_v13 }
0x24eb   : > { %v4213_v61 = vpack.c.bf16 %v4211_v35, %v4211_v35 }
0x24ec   : > { %6032 = vmatprep.mubr.msk.bf16.mxu1 %vm1551_vm8, %v4045_v16 }
0x24ed   : > { %6033 = vmatmul.mubr.msk.bf16.vlgmr.msra.gmra.mxu1 %vm1551_vm8, %v4046_v17 }
0x24ee   : > { %6045 = vmatpush3.bf16.msra.mxu1 %v4226_v19  ;;  %6048 = vmatprep.mubr.msk.bf16.mxu1 %vm1551_vm8, %v4212_v18 }
0x24ef   : > { %6046 = vmatprep.subr.bf16.mxu1 %v4215_v20 }
0x24f2   : > { %6047 = vmatpush3.bf16.msra.mxu1 %v4215_v20 }
0x24f3   : > { %6172 = vmatprep.subr.msk.bf16.mxu1 %vm1490_vm6, %v4283_v49 }
0x24f5   : > { %6049 = vmatmul.mubr.msk.bf16.vlgmr.msra.gmra.mxu1 %vm1551_vm8, %v4213_v61 }
0x24f6   : > { %6053 = vmatpush3.bf16.xpose.msra.mxu1 %v4294_v38  ;;  %6056 = vmatprep.mubr.msk.bf16.mxu1 %vm1490_vm6, %v4277_v41 }
0x24f7   : > { %6173 = vmatprep.subr.msk.bf16.mxu1 %vm1490_vm6, %v4281_v8 }
0x24fe   : > { %6055 = vmatpush3.bf16.xpose.msra.mxu1 %v4291_v40 }
0x2505   : > { %6057 = vmatmul.mubr.msk.bf16.vlgmr.msra.gmra.mxu1 %vm1490_vm6, %v4279_v22 }
0x25ad   : > { %v7719_v23 = vpop.f32.mrf.mxu1 }
0x25af   : > { %v7721_v25 = vpop.f32.mrf.mxu1 }
0x25b1   : > { %v6035_v26 = vpop.f32.mrf.mxu1 }
0x25b3   : > { %v7723_v50 = vpop.f32.mrf.mxu1 }
0x25b5   : > { %v7725_v58 = vpop.f32.mrf.mxu1 }
0x25b7   : > { %v7727_v1 = vpop.f32.mrf.mxu1 }
0x25b9   : > { %v6051_v27 = vpop.f32.mrf.mxu1 }
0x25bb   : > { %v7729_v5 = vpop.f32.mrf.mxu1 }
0x25bc   : > { %v6266_v28 = vpack.i.bf16 %v7729_v5, %v7727_v1 }
0x25c5   : > { %v6058_v29 = vpop.f32.mrf.mxu1 }
0x25c6   : > { %v4339_v55 = vadd.f32 %v6058_v29, %v7067_v12 }
0x25c7   : > { %v4330_v30 = vpop.f32.mrf.mxu1 }
0x25c8   : > { %v4331_v53 = vadd.f32 %v4330_v30, %v7067_v12  ;;  %v4350_v44 = vsel %vm1551_vm8, %v4339_v55, -inf }
0x25c9   : > { %v6059_v2 = vpop.f32.mrf.mxu1 }
0x25ca   : > { %v4344_v56 = vsel %vm1551_vm8, %v4331_v53, -inf }
0x25cb   : > { %v4333_v37 = vpop.f32.mrf.mxu1  ;;  %4345 = vmax.xlane.f32.xlu0 %v4344_v56 }
0x25cc   : > { %v4334_v11 = vadd.f32 %v4333_v37, %v7067_v12 }
0x25ce   : > { %v4347_v60 = vsel %vm1551_vm8, %v4334_v11, -inf }
0x25cf   : > { %4348 = vmax.xlane.f32.xlu1 %v4347_v60  ;;  %4351 = vmax.xlane.f32.xlu0 %v4350_v44 }
0x2654   : > { %v4346_v45 = vpop.xlane.xlu0 %4345 }
0x2655   : > { %v4353_v46 = vsub.f32 %v4331_v53, %v4346_v45 }
0x2657   : > { %v4356_v59 = vmul.f32 1.442695, %v4353_v46 }
0x2658   : > { %v4349_v47 = vpop.xlane.xlu1 %4348  ;;  %v4352_v54 = vpop.xlane.xlu0 %4351 }
0x2659   : > { %6544 = vpow2.f32 %v4356_v59  ;;  %v4354_v21 = vsub.f32 %v4334_v11, %v4349_v47  ;;  %v4355_v39 = vsub.f32 %v4339_v55, %v4352_v54 }
0x265b   : > { %v4358_v63 = vmul.f32 1.442695, %v4354_v21  ;;  %v4360_v3 = vmul.f32 1.442695, %v4355_v39 }
0x265d   : > { %6546 = vpow2.f32 %v4358_v63 }
0x265e   : > { %6548 = vpow2.f32 %v4360_v3 }
0x2666   : > { %v6545_v33 = vpop.eup %6544 }
0x2667   : > { %v4362_v4 = vsel %vm1551_vm8, %v6545_v33, 0.0 }
0x2668   : > { %4363 = vadd.xlane.f32.xlu0 %v4362_v4 }
0x266a   : > { %v6547_v32 = vpop.eup %6546 }
0x266b   : > { %v6549_v6 = vpop.eup %6548  ;;  %v4365_v7 = vsel %vm1551_vm8, %v6547_v32, 0.0 }
0x266c   : > { %4366 = vadd.xlane.f32.xlu0 %v4365_v7  ;;  %v4368_v24 = vsel %vm1551_vm8, %v6549_v6, 0.0 }
0x266d   : > { %4369 = vadd.xlane.f32.xlu1 %v4368_v24 }
0x267e   : > { %4379 = vrot.lane.b32.xlu1 %v7633_v57, %s8095_s27 }
0x2682   : > { %4447 = vrot.lane.b32.xlu1 %v7629_v62, %s8096_s29  ;;  %4381 = vrot.lane.b32.xlu0 %v7629_v62, %s8095_s27 }
0x2686   : > { %4445 = vrot.lane.b32.xlu1 %v7633_v57, %s8096_s29  ;;  %4441 = vrot.lane.b32.xlu0 %v7635_v34, %s8097_s25  ;;  %s8109_s29 = sld [smem:[#allocation32_spill]] }
0x268a   : > { %4443 = vrot.lane.b32.xlu1 %v7647_v42, %s8097_s25 }
0x26f1   : > { %v4364_v9 = vpop.xlane.xlu0 %4363 }
0x26f2   : > { %6550 = vrcp.f32 %v4364_v9 }
0x26f5   : > { %v4367_v10 = vpop.xlane.xlu0 %4366 }
0x26f6   : > { %v4370_v0 = vpop.xlane.xlu1 %4369  ;;  %6552 = vrcp.f32 %v4367_v10 }
0x26f7   : > { %6554 = vrcp.f32 %v4370_v0 }
0x26f9   : > { %v4382_v13 = vpop.permute.xlu0 %4381 }
0x26fa   : > { %v4380_v14 = vpop.permute.xlu1 %4379  ;;  %v4391_v15 = vsel %vm1598_vm9, %v4382_v13, 0  ;;  %6174 = vmatprep.subr.msk.bf16.mxu0 %vm1598_vm9, %v4382_v13 }
0x26fb   : > { %6061 = vmatpush3.bf16.msra.mxu0 %v4391_v15 }
0x26fc   : > { %6062 = vmatprep.subr.bf16.mxu0 %v4380_v14 }
0x26fd   : > { %v4442_v35 = vpop.permute.xlu0 %4441 }
0x26fe   : > { %v4448_v16 = vpop.permute.xlu1 %4447 }
0x26ff   : > { %6063 = vmatpush3.bf16.msra.mxu0 %v4380_v14  ;;  %v6551_v34 = vpop.eup %6550  ;;  %v4459_v49 = vsel %vm1490_vm6, %v4448_v16, 0 }
0x2700   : > { %6175 = vmatprep.subr.msk.bf16.mxu0 %vm1490_vm6, %v4448_v16  ;;  %v4374_v17 = vmul.f32 %v6551_v34, %v6545_v33  ;;  %v6347_v34 = vld [vmem:[%s7972_s11 + $0x28] sm:$0xff]  }
0x2702   : > { %v4446_v61 = vpop.permute.xlu1 %4445 }
0x2703   : > { %v6553_v42 = vpop.eup %6552  ;;  %v4456_v38 = vsel %vm1490_vm6, %v4446_v61, 0 }
0x2704   : > { %v6555_v48 = vpop.eup %6554  ;;  %v4375_v51 = vmul.f32 %v6553_v42, %v6547_v32  ;;  %v6348_v42 = vld [vmem:[%s7972_s11 + $0x20] sm:$0xff]  }
0x2705   : > { %v4376_v18 = vmul.f32 %v6555_v48, %v6549_v6 }
0x2706   : > { %v4377_v19 = vpack.c.bf16 %v4375_v51, %v4374_v17  ;;  %v4444_v41 = vpop.permute.xlu1 %4443 }
0x2707   : > { %v4378_v20 = vpack.c.bf16 %v4376_v18, %v4376_v18 }
0x2708   : > { %6064 = vmatprep.mubr.msk.bf16.mxu0 %vm1551_vm8, %v4377_v19 }
0x2709   : > { %6065 = vmatmul.mubr.msk.bf16.vlgmr.msra.gmra.mxu0 %vm1551_vm8, %v4378_v20 }
0x270a   : > { %6069 = vmatpush3.bf16.xpose.msra.mxu0 %v4459_v49  ;;  %6072 = vmatprep.mubr.msk.bf16.mxu0 %vm1490_vm6, %v4442_v35 }
0x270b   : > { %6176 = vmatprep.subr.msk.bf16.mxu0 %vm1490_vm6, %v4446_v61 }
0x2712   : > { %6071 = vmatpush3.bf16.xpose.msra.mxu0 %v4456_v38 }
0x2719   : > { %6073 = vmatmul.mubr.msk.bf16.vlgmr.msra.gmra.mxu0 %vm1490_vm6, %v4444_v41 }
0x27c9   : > { %v6066_v8 = vpop.f32.mrf.mxu0 }
0x27cb   : > { %v4427_v40 = vpop.f32.mrf.mxu0 }
0x27cd   : > { %v6067_v22 = vpop.f32.mrf.mxu0 }
0x27cf   : > { %v4430_v26 = vpop.f32.mrf.mxu0 }
0x27d0   : > { %v6271_v27 = vpack.i.bf16 %v4430_v26, %v4427_v40 }
0x27d9   : > { %v6074_v29 = vpop.f32.mrf.mxu0 }
0x27da   : > { %v4504_v55 = vadd.f32 %v6074_v29, %v7067_v12 }
0x27db   : > { %v4495_v30 = vpop.f32.mrf.mxu0 }
0x27dc   : > { %v4496_v53 = vadd.f32 %v4495_v30, %v7067_v12  ;;  %v4515_v44 = vsel %vm1551_vm8, %v4504_v55, -inf }
0x27dd   : > { %v6075_v2 = vpop.f32.mrf.mxu0 }
0x27de   : > { %v4509_v56 = vsel %vm1551_vm8, %v4496_v53, -inf }
0x27df   : > { %v4498_v37 = vpop.f32.mrf.mxu0  ;;  %4510 = vmax.xlane.f32.xlu0 %v4509_v56 }
0x27e0   : > { %v4499_v11 = vadd.f32 %v4498_v37, %v7067_v12 }
0x27e2   : > { %v4512_v60 = vsel %vm1551_vm8, %v4499_v11, -inf }
0x27e3   : > { %4513 = vmax.xlane.f32.xlu1 %v4512_v60  ;;  %4516 = vmax.xlane.f32.xlu0 %v4515_v44 }
0x2868   : > { %v4511_v45 = vpop.xlane.xlu0 %4510 }
0x2869   : > { %v4518_v46 = vsub.f32 %v4496_v53, %v4511_v45  ;;  %v5506_v45 = vld [vmem:[%s8102_s7 + $0x2] ss:$0 sm:$0xff] }
0x286b   : > { %v4521_v59 = vmul.f32 1.442695, %v4518_v46 }
0x286c   : > { %v4514_v47 = vpop.xlane.xlu1 %4513  ;;  %v4517_v54 = vpop.xlane.xlu0 %4516 }
0x286d   : > { %6556 = vpow2.f32 %v4521_v59  ;;  %v4519_v21 = vsub.f32 %v4499_v11, %v4514_v47  ;;  %v4520_v39 = vsub.f32 %v4504_v55, %v4517_v54 }
0x286f   : > { %v4523_v63 = vmul.f32 1.442695, %v4519_v21  ;;  %v4525_v3 = vmul.f32 1.442695, %v4520_v39 }
0x2871   : > { %6558 = vpow2.f32 %v4523_v63 }
0x2872   : > { %6560 = vpow2.f32 %v4525_v3 }
0x287a   : > { %v6557_v33 = vpop.eup %6556 }
0x287b   : > { %v4527_v12 = vsel %vm1551_vm8, %v6557_v33, 0.0 }
0x287c   : > { %4528 = vadd.xlane.f32.xlu0 %v4527_v12 }
0x287e   : > { %v6559_v4 = vpop.eup %6558 }
0x287f   : > { %v6561_v32 = vpop.eup %6560  ;;  %v4530_v6 = vsel %vm1551_vm8, %v6559_v4, 0.0 }
0x2880   : > { %4531 = vadd.xlane.f32.xlu0 %v4530_v6  ;;  %v4533_v7 = vsel %vm1551_vm8, %v6561_v32, 0.0 }
0x2881   : > { %4534 = vadd.xlane.f32.xlu1 %v4533_v7 }
0x2892   : > { %4544 = vrot.lane.b32.xlu1 %v7633_v57, %s8098_s23 }
0x2896   : > { %6267 = vrot.lane.b32.xlu1 %v6266_v28, %s8099_s8  ;;  %4546 = vrot.lane.b32.xlu0 %v7629_v62, %s8098_s23 }
0x289a   : > { %4613 = vrot.lane.b32.xlu1 %v7725_v58, %s8099_s8  ;;  %6272 = vrot.lane.b32.xlu0 %v6271_v27, %s8100_s3 }
0x289e   : > { %4625 = vrot.lane.b32.xlu1 %v6066_v8, %s8100_s3  ;;  %s8108_s3 = sld [smem:[#allocation30_spill]] }
0x2905   : > { %v4529_v24 = vpop.xlane.xlu0 %4528 }
0x2906   : > { %6562 = vrcp.f32 %v4529_v24 }
0x2909   : > { %v4532_v9 = vpop.xlane.xlu0 %4531 }
0x290a   : > { %v4535_v10 = vpop.xlane.xlu1 %4534  ;;  %6564 = vrcp.f32 %v4532_v9 }
0x290b   : > { %6566 = vrcp.f32 %v4535_v10 }
0x290d   : > { %v4547_v57 = vpop.permute.xlu0 %4546 }
0x290e   : > { %v4556_v1 = vsel %vm1598_vm9, %v4547_v57, 0  ;;  %6177 = vmatprep.subr.msk.bf16.mxu1 %vm1598_vm9, %v4547_v57  ;;  %v4545_v5 = vpop.permute.xlu1 %4544 }
0x290f   : > { %6077 = vmatpush3.bf16.msra.mxu1 %v4556_v1 }
0x2910   : > { %6078 = vmatprep.subr.bf16.mxu1 %v4545_v5 }
0x2911   : > { %v6273_v38 = vpop.permute.xlu0 %6272 }
0x2912   : > { %v6268_v20 = vpop.permute.xlu1 %6267  ;;  %v6275_v8 = vunpack.i.h.bf16 %v6273_v38  ;;  %v6274_v40 = vunpack.i.l.bf16 %v6273_v38 }
0x2913   : > { %6079 = vmatpush3.bf16.msra.mxu1 %v4545_v5  ;;  %v6563_v62 = vpop.eup %6562  ;;  %v6270_v35 = vunpack.i.h.bf16 %v6268_v20  ;;  %v6269_v61 = vunpack.i.l.bf16 %v6268_v20 }
0x2914   : > { %v4539_v0 = vmul.f32 %v6563_v62, %v6557_v33  ;;  %6084 = vmatprep.subr.bf16.mxu1 %v6347_v34 }
0x2915   : > { %v4643_v22 = vsel %vm1490_vm6, %v7723_v50, %v6270_v35  ;;  %v4642_v26 = vsel %vm1490_vm6, %v7721_v25, %v6269_v61  ;;  %v5513_v35 = vld [vmem:[%s8104_s14 + $0x2] ss:$0 sm:$0xff] }
0x2916   : > { %v4614_v49 = vpop.permute.xlu1 %4613  ;;  %v4646_v56 = vsel %vm2186_vm10, %v4643_v22, %v6275_v8  ;;  %v4645_v37 = vsel %vm2186_vm10, %v4642_v26, %v6274_v40  ;;  %v5514_v22 = vld [vmem:[%s8105_s15 + $0x2] ss:$0 sm:$0xff]  ;;  %s8106_s15 = sld [smem:[#allocation31_spill]] }
0x2917   : > { %v6565_v58 = vpop.eup %6564  ;;  %v4644_v29 = vsel %vm1490_vm6, %v7719_v23, %v4614_v49 }
0x2918   : > { %v6567_v28 = vpop.eup %6566  ;;  %v4540_v13 = vmul.f32 %v6565_v58, %v6559_v4 }
0x2919   : > { %v4541_v14 = vmul.f32 %v6567_v28, %v6561_v32 }
0x291a   : > { %v4542_v15 = vpack.c.bf16 %v4540_v13, %v4539_v0  ;;  %v4626_v41 = vpop.permute.xlu1 %4625  ;;  %v6349_v13 = vld [vmem:[%s8103_s2 + $0x28] sm:$0xff]  }
0x291b   : > { %v4543_v16 = vpack.c.bf16 %v4541_v14, %v4541_v14  ;;  %v4647_v53 = vsel %vm2186_vm10, %v4644_v29, %v4626_v41  ;;  %v6350_v14 = vld [vmem:[%s8103_s2 + $0x20] sm:$0xff]   ;;  %6092 = vmatprep.subr.bf16.mxu0 %v6349_v13  ;;  %s8111_s2 = sld [smem:[#allocation6_spill]] }
0x291c   : > { %6080 = vmatprep.mubr.msk.bf16.mxu1 %vm1551_vm8, %v4542_v15  ;;  %6093 = vmatpush3.bf16.msra.mxu0 %v6349_v13 }
0x291d   : > { %6081 = vmatmul.mubr.msk.bf16.vlgmr.msra.gmra.mxu1 %vm1551_vm8, %v4543_v16  ;;  %6094 = vmatprep.subr.bf16.mxu0 %v6350_v14 }
0x291e   : > { %6085 = vmatpush3.bf16.msra.mxu1 %v6347_v34 }
0x291f   : > { %6086 = vmatprep.subr.bf16.mxu1 %v6348_v42 }
0x2920   : > { %6095 = vmatpush3.bf16.msra.mxu0 %v6350_v14 }
0x2921   : > { %6120 = vmatprep.subr.bf16.mxu0 %v6653_v36  ;;  %s797_s12 = sand.u32 1, %s8111_s2   ;;  %s6670_s2 = smov [#allocation2]  }
0x2922   : > { %6087 = vmatpush3.bf16.msra.mxu1 %v6348_v42  ;;  %s798_s23 = scalar_lea.vmem [#allocation2], %s797_s12  ;;  %s5218_s7 = scalar_lea.sflag [#allocation3], %s797_s12 }
0x2923   : > { %s5230_s25 = sshll.u32 %s798_s23, 4  ;;  %s7922_s25 = int_to_ptr.vmem [resolvable:$true] %s5230_s25 }
0x2924   : > { %s6591_s4 = scalar_lea.vmem %s7922_s25, 16 }
0x2925   : > { %p6592_p11 = scmp.ne.s32.totalorder %s7922_s25, %s6591_s4 }
0x2927   : > { %p6593_p12 = pnand %p6592_p11, %p6844_p5 }
0x2929   : > { %p6594_p13 = pneg %p6593_p12 }
0x29dd   : > { %v6082_v48 = vpop.f32.mrf.mxu1 }
0x29de   : > { %4637 = vrot.lane.b32.xlu1 %v6082_v48, %s8101_s21 }
0x29df   : > { %v4592_v17 = vpop.f32.mrf.mxu1 }
0x29e1   : > { %v6083_v51 = vpop.f32.mrf.mxu1 }
0x29e3   : > { %v4595_v18 = vpop.f32.mrf.mxu1 }
0x29e4   : > { %v6276_v19 = vpack.i.bf16 %v4595_v18, %v4592_v17 }
0x29e6   : > { %6277 = vrot.lane.b32.xlu0 %v6276_v19, %s8101_s21  ;;  %s8116_s21 = sld [smem:[#allocation36_spill]] }
0x2a50   : > { %v4638_v27 = vpop.permute.xlu1 %4637 }
0x2a51   : > { %v4650_v11 = vsel %vm1551_vm8, %v4647_v53, %v4638_v27 }
0x2a52   : > { %v4652_v44 = vpack.c.bf16 %v4650_v11, %v4650_v11  ;;  %v6353_v11 = vld [vmem:[%s7978_s17 + $0xa8] sm:$0xff]  }
0x2a58   : > { %v6278_v30 = vpop.permute.xlu0 %6277 }
0x2a59   : > { %v6280_v2 = vunpack.i.h.bf16 %v6278_v30  ;;  %v6279_v55 = vunpack.i.l.bf16 %v6278_v30 }
0x2a5b   : > { %v4648_v50 = vsel %vm1551_vm8, %v4645_v37, %v6279_v55  ;;  %v4649_v60 = vsel %vm1551_vm8, %v4646_v56, %v6280_v2  ;;  %v6351_v56 = vld [vmem:[%s7978_s17 + $0xb8] sm:$0xff]   ;;  %v6352_v37 = vld [vmem:[%s7978_s17 + $0xb0] sm:$0xff]  }
0x2a5c   : > { %v4651_v25 = vpack.c.bf16 %v4649_v60, %v4648_v50  ;;  %6100 = vmatprep.subr.bf16.mxu1 %v6351_v56  ;;  %v6354_v50 = vld [vmem:[%s7978_s17 + $0xa0] sm:$0xff]   ;;  %v6355_v60 = vld [vmem:[%s7978_s17 + $0x98] sm:$0xff]  }
0x2a5e   : > { %6088 = vmatprep.mubr.msk.bf16.mxu1 %vm1244_vm3, %v4651_v25  ;;  %v6356_v25 = vld [vmem:[%s7978_s17 + $0x90] sm:$0xff]  }
0x2a5f   : > { %6089 = vmatmul.mubr.msk.bf16.vlgmr.msra.gmra.mxu1 %vm1244_vm3, %v4652_v44  ;;  %v6357_v44 = vld [vmem:[%s7978_s17 + $0x88] sm:$0xff]  }
0x2a60   : > { %6101 = vmatpush3.bf16.msra.mxu1 %v6351_v56  ;;  %v6362_v56 = vld [vmem:[%s8110_s0 + $0x8] sm:$0xff]  }
0x2a61   : > { %6102 = vmatprep.subr.bf16.mxu1 %v6352_v37 }
0x2a64   : > { %6103 = vmatpush3.bf16.msra.mxu1 %v6352_v37 }
0x2a65   : > { %6104 = vmatprep.subr.bf16.mxu1 %v6353_v11 }
0x2a68   : > { %6105 = vmatpush3.bf16.msra.mxu1 %v6353_v11 }
0x2a69   : > { %6106 = vmatprep.subr.bf16.mxu1 %v6354_v50 }
0x2a6c   : > { %6107 = vmatpush3.bf16.msra.mxu1 %v6354_v50 }
0x2a6d   : > { %6108 = vmatprep.subr.bf16.mxu1 %v6355_v60 }
0x2a70   : > { %6109 = vmatpush3.bf16.msra.mxu1 %v6355_v60 }
0x2a71   : > { %6110 = vmatprep.subr.bf16.mxu1 %v6356_v25 }
0x2a74   : > { %6111 = vmatpush3.bf16.msra.mxu1 %v6356_v25  ;;  %v6363_v25 = vld [vmem:[%s8110_s0] sm:$0xff]  }
0x2a75   : > { %6112 = vmatprep.subr.bf16.mxu1 %v6357_v44 }
0x2a78   : > { %6113 = vmatpush3.bf16.msra.mxu1 %v6357_v44  ;;  %v5103_v44 = vld [vmem:[%s8113_s20] sm:$0x1] }
0x2b1f   : > { %v6090_v23 = vpop.f32.mrf.mxu1 }
0x2b20   : > { %v4727_v59 = vadd.f32 %v6090_v23, %v5506_v45  ;;  %v6358_v23 = vld [vmem:[%s7978_s17 + $0x80] sm:$0xff]  }
0x2b21   : > { %v4718_v46 = vpop.f32.mrf.mxu1  ;;  %6114 = vmatprep.subr.bf16.mxu1 %v6358_v23 }
0x2b22   : > { %v4719_v47 = vadd.f32 %v5506_v45, %v4718_v46  ;;  %v4734_v63 = vadd.f32 %v4727_v59, %v7594_v31  ;;  %6115 = vmatpush3.bf16.msra.mxu1 %v6358_v23 }
0x2b23   : > { %v6091_v54 = vpop.f32.mrf.mxu1 }
0x2b24   : > { %v7815_v21 = vadd.f32 %v4719_v47, %v7591_v52  ;;  %v4745_v32 = vsel %vm1244_vm3, %v4734_v63, 0.0 }
0x2b25   : > { %v4721_v39 = vpop.f32.mrf.mxu1 }
0x2b26   : > { %v4722_v3 = vadd.f32 %v5506_v45, %v4721_v39  ;;  %v4739_v33 = vsel %vm1244_vm3, %v7815_v21, 0.0  ;;  %v5520_v45 = vld [vmem:[%s7977_s16 + $0x2] ss:$0 sm:$0xff] }
0x2b27   : > { %4740 = vadd.xlane.f32.xlu0 %v4739_v33 }
0x2b28   : > { %v4733_v12 = vadd.f32 %v4722_v3, %v7600_v43 }
0x2b2a   : > { %v4742_v4 = vsel %vm1244_vm3, %v4733_v12, 0.0 }
0x2b2b   : > { %4743 = vadd.xlane.f32.xlu1 %v4742_v4  ;;  %4746 = vadd.xlane.f32.xlu0 %v4745_v32 }
0x2bb0   : > { %v4741_v6 = vpop.xlane.xlu0 %4740 }
0x2bb1   : > { %v4748_v7 = vmul.f32 0.03125, %v4741_v6 }
0x2bb3   : > { %v4751_v52 = vsub.f32 %v7815_v21, %v4748_v7 }
0x2bb4   : > { %v4744_v24 = vpop.xlane.xlu1 %4743  ;;  %v4747_v9 = vpop.xlane.xlu0 %4746 }
0x2bb5   : > { %v4749_v31 = vmul.f32 0.03125, %v4744_v24  ;;  %v4750_v10 = vmul.f32 0.03125, %v4747_v9  ;;  %v4754_v57 = vmul.f32 %v4751_v52, %v4751_v52 }
0x2bb7   : > { %v4752_v1 = vsub.f32 %v4733_v12, %v4749_v31  ;;  %v4753_v5 = vsub.f32 %v4734_v63, %v4750_v10  ;;  %v4757_v62 = vsel %vm1244_vm3, %v4754_v57, 0.0 }
0x2bb8   : > { %4758 = vadd.xlane.f32.xlu0 %v4757_v62 }
0x2bb9   : > { %v4755_v43 = vmul.f32 %v4752_v1, %v4752_v1  ;;  %v4756_v58 = vmul.f32 %v4753_v5, %v4753_v5 }
0x2bbb   : > { %v4760_v28 = vsel %vm1244_vm3, %v4755_v43, 0.0  ;;  %v4763_v0 = vsel %vm1244_vm3, %v4756_v58, 0.0 }
0x2bbc   : > { %4761 = vadd.xlane.f32.xlu0 %v4760_v28  ;;  %4764 = vadd.xlane.f32.xlu1 %v4763_v0 }
0x2c41   : > { %v4759_v15 = vpop.xlane.xlu0 %4758 }
0x2c42   : > { %v4766_v16 = vmul.f32 0.03125, %v4759_v15  ;;  %v5545_v15 = vld [vmem:[%s7979_s18 + $0x2] ss:$0 sm:$0xff] }
0x2c44   : > { %v4769_v34 = vadd.f32 1e-05, %v4766_v16 }
0x2c45   : > { %v4765_v42 = vpop.xlane.xlu1 %4764  ;;  %v4762_v48 = vpop.xlane.xlu0 %4761 }
0x2c46   : > { %6568 = vrsqrt.f32 %v4769_v34  ;;  %v4768_v17 = vmul.f32 0.03125, %v4765_v42  ;;  %v4767_v51 = vmul.f32 0.03125, %v4762_v48 }
0x2c48   : > { %v4771_v18 = vadd.f32 1e-05, %v4768_v17  ;;  %v4770_v19 = vadd.f32 1e-05, %v4767_v51 }
0x2c4a   : > { %6570 = vrsqrt.f32 %v4771_v18 }
0x2c4b   : > { %6572 = vrsqrt.f32 %v4770_v19 }
0x2c53   : > { %v6569_v20 = vpop.eup %6568 }
0x2c54   : > { %v4775_v49 = vmul.f32 %v6569_v20, %v4751_v52 }
0x2c56   : > { %v4784_v40 = vmul.f32 %v5513_v35, %v4775_v49 }
0x2c57   : > { %v6571_v61 = vpop.eup %6570 }
0x2c58   : > { %v6573_v38 = vpop.eup %6572  ;;  %v4777_v41 = vmul.f32 %v6571_v61, %v4753_v5  ;;  %v4793_v30 = vadd.f32 %v5514_v22, %v4784_v40  ;;  %v6359_v61 = vld [vmem:[%s8106_s15 + $0x8] sm:$0xff]  }
0x2c59   : > { %v4776_v8 = vmul.f32 %v6573_v38, %v4752_v1 }
0x2c5a   : > { %v4786_v26 = vmul.f32 %v5513_v35, %v4777_v41 }
0x2c5b   : > { %v4785_v27 = vmul.f32 %v5513_v35, %v4776_v8 }
0x2c5c   : > { %v4795_v29 = vadd.f32 %v5514_v22, %v4786_v26 }
0x2c5d   : > { %v4794_v53 = vadd.f32 %v5514_v22, %v4785_v27  ;;  %v5023_v22 = vld [vmem:[%s8107_s28] sm:$0x1]  ;;  %s5562_s28 = sshll.u32 %s8112_s1, 4  ;;  %s6595_s1 = sshll.u32 %s6670_s2, 4  ;;  %s6596_s1 = int_to_ptr.vmem [resolvable:$false] %s6595_s1 }
0x2c5e   : > { %v4797_v2 = vpack.c.bf16 %v4795_v29, %v4795_v29  ;;  %v5024_v27 = vld [vmem:[%s8108_s3] sm:$0x1]  ;;  %s6597_s10 = scalar_lea.vmem %s6596_s1, 32  ;;  %p6598_p0 = scmp.lt.s32.totalorder %s7922_s25, %s6596_s1 }
0x2c5f   : > { %v4796_v55 = vpack.c.bf16 %v4794_v53, %v4793_v30  ;;  %v6361_v53 = vld [vmem:[%s8109_s29] sm:$0xff]   ;;  %s7920_s29 = scalar_lea.hbm %s8116_s21, %s5562_s28  ;;  %p6599_p1 = scmp.lt.s32.totalorder %s6597_s10, %s6591_s4 }
0x2c61   : > { %6096 = vmatprep.mubr.msk.bf16.mxu0 %vm1244_vm3, %v4796_v55  ;;  %p6600_p2 = por %p6599_p1, %p6598_p0 }
0x2c62   : > { %6097 = vmatmul.mubr.msk.bf16.vlgmr.msra.gmra.mxu0 %vm1244_vm3, %v4797_v2 }
0x2c63   : > { %6124 = vmatprep.mubr.msk.bf16.mxu0 %vm6654_vm0, %v6653_v36  ;;  %6121 = vmatpush3.bf16.msra.mxu0 %v6359_v61  ;;  %p6601_p3 = pnand %p6600_p2, %p6594_p13 }
0x2c64   : > { %6122 = vmatprep.subr.bf16.mxu0 %v6653_v36 }
0x2d22   : > { %v6098_v46 = vpop.f32.mrf.mxu0 }
0x2d23   : > { %v4872_v59 = vadd.f32 %v6098_v46, %v5520_v45 }
0x2d24   : > { %v4863_v47 = vpop.f32.mrf.mxu0 }
0x2d25   : > { %v5527_v54 = vmul.f32 -1.702, %v4872_v59  ;;  %v4864_v39 = vadd.f32 %v5520_v45, %v4863_v47 }
0x2d26   : > { %v6099_v63 = vpop.f32.mrf.mxu0 }
0x2d27   : > { %v4887_v3 = vmul.f32 1.442695, %v5527_v54  ;;  %v5525_v33 = vmul.f32 -1.702, %v4864_v39 }
0x2d28   : > { %v4866_v12 = vpop.f32.mrf.mxu0 }
0x2d29   : > { %6574 = vpow2.f32 %v4887_v3  ;;  %v4883_v4 = vmul.f32 1.442695, %v5525_v33  ;;  %v4867_v32 = vadd.f32 %v5520_v45, %v4866_v12 }
0x2d2b   : > { %6576 = vpow2.f32 %v4883_v4  ;;  %v5526_v6 = vmul.f32 -1.702, %v4867_v32 }
0x2d2d   : > { %v4885_v7 = vmul.f32 1.442695, %v5526_v6 }
0x2d2f   : > { %6578 = vpow2.f32 %v4885_v7 }
0x2d36   : > { %v6575_v52 = vpop.eup %6574 }
0x2d37   : > { %v4891_v9 = vadd.f32 1.0, %v6575_v52 }
0x2d38   : > { %v6577_v24 = vpop.eup %6576 }
0x2d39   : > { %v4889_v31 = vadd.f32 1.0, %v6577_v24  ;;  %6580 = vrcp.f32 %v4891_v9 }
0x2d3b   : > { %6582 = vrcp.f32 %v4889_v31 }
0x2d3c   : > { %v6579_v10 = vpop.eup %6578 }
0x2d3d   : > { %v4890_v57 = vadd.f32 1.0, %v6579_v10 }
0x2d3f   : > { %6584 = vrcp.f32 %v4890_v57 }
0x2d46   : > { %v6581_v1 = vpop.eup %6580 }
0x2d47   : > { %v4900_v43 = vmul.f32 %v6581_v1, %v4872_v59 }
0x2d48   : > { %v6583_v5 = vpop.eup %6582 }
0x2d49   : > { %v4898_v58 = vmul.f32 %v6583_v5, %v4864_v39  ;;  %v4902_v13 = vpack.c.bf16 %v4900_v43, %v4900_v43 }
0x2d4c   : > { %v6585_v62 = vpop.eup %6584 }
0x2d4d   : > { %v4899_v28 = vmul.f32 %v6585_v62, %v4867_v32 }
0x2d4f   : > { %v4901_v0 = vpack.c.bf16 %v4899_v28, %v4898_v58 }
0x2d51   : > { %6116 = vmatprep.mubr.bf16.mxu1 %v4901_v0 }
0x2d52   : > { %6117 = vmatmul.mubr.bf16.vlgmr.msra.gmra.mxu1 %v4902_v13 }
0x2e12   : > { %v6118_v14 = vpop.f32.mrf.mxu1 }
0x2e14   : > { %v5010_v16 = vpop.f32.mrf.mxu1 }
0x2e15   : > { %v5011_v34 = vadd.f32 %v5545_v15, %v5010_v16 }
0x2e16   : > { %v6119_v42 = vpop.f32.mrf.mxu1 }
0x2e17   : > { %v5022_v48 = vadd.f32 %v5011_v34, %v7815_v21  ;;  %v6360_v21 = vld [vmem:[%s8106_s15] sm:$0xff]  }
0x2e18   : > { %v5013_v17 = vpop.f32.mrf.mxu1  ;;  %6123 = vmatpush3.bf16.msra.mxu0 %v6360_v21 }
0x2e19   : > { %v5025_v51 = vsel %vm1289_vm2, %v5022_v48, 0.0  ;;  %6128 = vmatprep.subr.bf16.mxu0 %v6653_v36 }
0x2e1a   : > { %5026 = vadd.xlane.f32.xlu0 %v5025_v51 }
0x2ea3   : > { %v5027_v18 = vpop.xlane.xlu0 %5026 }
0x2ea4   : > { %v5028_v19 = vmul.f32 0.03125, %v5027_v18 }
0x2ea6   : > { %v5029_v20 = vsub.f32 %v5022_v48, %v5028_v19 }
0x2ea8   : > { %v5030_v49 = vmul.f32 %v5029_v20, %v5029_v20 }
0x2eaa   : > { %v5031_v35 = vsel %vm1289_vm2, %v5030_v49, 0.0 }
0x2eab   : > { %5032 = vadd.xlane.f32.xlu1 %v5031_v35 }
0x2f34   : > { %v5033_v38 = vpop.xlane.xlu1 %5032 }
0x2f35   : > { %v5034_v41 = vmul.f32 0.03125, %v5033_v38 }
0x2f37   : > { %v5035_v8 = vadd.f32 1e-05, %v5034_v41 }
0x2f39   : > { %6586 = vrsqrt.f32 %v5035_v8 }
0x2f46   : > { %v6587_v40 = vpop.eup %6586 }
0x2f47   : > { %v5037_v26 = vmul.f32 %v6587_v40, %v5029_v20 }
0x2f49   : > { %v5038_v29 = vmul.f32 %v5037_v26, %v5023_v22 }
0x2f4b   : > { %v5039_v30 = vadd.f32 %v5038_v29, %v5024_v27 }
0x2f4d   : > { %v5040_v2 = vpack.c.bf16 %v5039_v30, %v5039_v30 }
0x2f4f   : > { %6125 = vmatmul.mubr.msk.bf16.vlgmr.msra.gmra.mxu0 %vm1244_vm3, %v5040_v2 }
0x2f50   : > { %6129 = vmatpush3.bf16.msra.mxu0 %v6361_v53  ;;  %6130 = vmatprep.mubr.msk.bf16.mxu0 %vm6654_vm0, %v6653_v36 }
0x2f51   : > { %6134 = vmatprep.subr.bf16.mxu0 %v6653_v36 }
0x300f   : > { %v5094_v55 = vpop.f32.mrf.mxu0 }
0x3010   : > { %v5100_v37 = vpack.c.bf16 %v5094_v55, %v5094_v55 }
0x3011   : > { %v6126_v11 = vpop.f32.mrf.mxu0 }
0x3012   : > { %6131 = vmatmul.mubr.msk.bf16.vlgmr.msra.gmra.mxu0 %vm2186_vm10, %v5100_v37 }
0x3013   : > { %v5097_v50 = vpop.f32.mrf.mxu0  ;;  %6135 = vmatpush3.bf16.msra.mxu0 %v6362_v56  ;;  %6138 = vmatprep.mubr.msk.bf16.mxu0 %vm6654_vm0, %v6653_v36 }
0x3014   : > { %6136 = vmatprep.subr.bf16.mxu0 %v6653_v36  ;;  %v5159_v36 = vld [vmem:[%s8114_s13] sm:$0x1] }
0x3015   : > { %v6127_v60 = vpop.f32.mrf.mxu0 }
0x3017   : > { %6137 = vmatpush3.bf16.msra.mxu0 %v6363_v25 }
0x30d2   : > { %v5147_v23 = vpop.f32.mrf.mxu0 }
0x30d3   : > { %v5148_v45 = vadd.f32 %v5147_v23, %v5103_v44 }
0x30d4   : > { %v6132_v46 = vpop.f32.mrf.mxu0 }
0x30d5   : > { %v5153_v59 = vmax.f32 %v5148_v45, 0.0 }
0x30d6   : > { %v5150_v47 = vpop.f32.mrf.mxu0 }
0x30d7   : > { %v5154_v54 = vpack.c.bf16 %v5153_v59, %v5153_v59 }
0x30d8   : > { %v6133_v39 = vpop.f32.mrf.mxu0 }
0x30d9   : > { %6139 = vmatmul.mubr.msk.bf16.vlgmr.msra.gmra.mxu0 %vm1244_vm3, %v5154_v54 }
0x3199   : > { %v5209_v63 = vpop.f32.mrf.mxu0 }
0x319a   : > { %v5210_v3 = vadd.f32 %v5209_v63, %v5159_v36 }
0x319b   : > { %v6140_v33 = vpop.f32.mrf.mxu0 }
0x319c   : > { %5216 = vst.msk [vmem:[%s798_s23] sm:$0x1] %vm5215_vm11, %v5210_v3 }
0x319d   : > { %v5212_v12 = vpop.f32.mrf.mxu0 }
0x319e   : > { %6604 = shalt.err (!%p6601_p3)
}
0x319f   : > { %s6605_s9 = scalar_lea.hbm %s7920_s29, 16  ;;  %s6609_s20 = scalar_lea.hbm %s8116_s21, 32 }
0x31a0   : > { %p6606_p4 = scmp.ne.s32.totalorder %s7920_s29, %s6605_s9  ;;  %p6610_p9 = scmp.lt.s32.totalorder %s7920_s29, %s8116_s21 }
0x31a1   : > { %p6611_p10 = scmp.lt.s32.totalorder %s6609_s20, %s6605_s9 }
0x31a2   : > { %p6607_p7 = pnand %p6606_p4, %p6844_p5 }
0x31a3   : > { %p6612_p11 = por %p6611_p10, %p6610_p9 }
0x31a4   : > { %p6608_p8 = pneg %p6607_p7 }
0x31a6   : > { %p6613_p12 = pnand %p6612_p11, %p6608_p8 }
0x31a8   : > { %6616 = shalt.err (!%p6613_p12)
}
0x31a9   : > { %6180 = dma.vmem_to_hbm [thread:$0]  (%p6844_p5), %s7922_s25, 16, %s7920_s29, %s5218_s7   ;;  %v6141_v4 = vpop.f32.mrf.mxu0 }
0x31aa PF: > { %s8117_s24 = sld [smem:[#allocation8_spill]] }
0x31ab   : > { %s8118_s13 = sld [smem:[#allocation5_spill]] }
0x31b0   : > { %p6186_p13 = scmp.ge.s32.totalorder %s8117_s24, 2 }
0x31b1   : > { %s5242_s23 = sand.u32 1, %s8118_s13  }
0x31b2   : > { %p6183_p0 = pnand %p6186_p13, %p6848_p6  ;;  %s5243_s3 = scalar_lea.sflag [#allocation3], %s5242_s23 }
0x31b4   : > { %p6184_p1 = pneg %p6183_p0 }
0x31b6   : > { %6634 = dma.done.wait (%p6184_p1), %s5243_s3, 16  }
0x31b7   : > { %6636 = vsyncadd (%p6184_p1), %s5243_s3, 4294967280  ;;  %s8120_s28 = sld [smem:[#allocation10_spill]] }
0x31b8   : > { %s8121_s27 = sld [smem:[#allocation6_spill]] }
0x31b9   : > { %s8122_s3 = sld [smem:[#allocation7_spill]] }
0x31ba   : > { %s8123_s7 = sld [smem:[#allocation11_spill]] }
0x31bd   : > { %p36_p2 = scmp.ge.s32.totalorder %s8120_s28, 4  }
0x31bf   :  { %38 = sbr.rel (!%p36_p2) target bundleno = 27 (0x1b), region = 186 }
0x31c4   :  { %5247 = vsyncpa [#allocation3], 1 }
0x31c5   :  { %5249 = vsyncpa [#allocation3 + $0x1], 1 }

</bundles_post_ra>
